<compile_context>
chip_gen: v7x
topology: tpu7x:2x2x1
jax: 0.10.0
libtpu: 0.0.40
codegen_flags: <defaults>
</compile_context>

<pallas_src>
import jax
import jax.numpy as jnp
import numpy as np
from jax.experimental import pallas as pl
from jax.experimental.pallas import tpu as pltpu


# ------------------------------ helpers -------------------------------------

def _round_up(x, m):
    return ((x + m - 1) // m) * m


def _tile_bytes(rows, cols, itemsize):
    """VMEM bytes of one buffered tile after (8, 128) layout padding."""
    return _round_up(max(int(rows), 1), 8) * _round_up(max(int(cols), 1), 128) * itemsize


def _vmem_budget_bytes():
    """Generation-aware scoped-VMEM budget with headroom.

    v5e/v6e (128 MiB physical) -> ~96 MiB; v7x (64 MiB per TC) -> ~48 MiB."""
    try:
        cap = int(pltpu.get_tpu_info().vmem_capacity_bytes)
    except Exception:
        cap = 64 << 20  # conservative (v7x per-TC) if the query is unavailable
    return int(cap) * 3 // 4


def _vmem_estimate(tm, tf, d_model, out_itemsize):
    """Double-buffered block residency + scratch + slack."""
    bf, f4 = 2, 4
    blocks = (_tile_bytes(tm, d_model, bf)             # x tile (bf16)
              + _tile_bytes(tm, 1, f4)                 # combine-weight column
              + _tile_bytes(d_model, tf, bf)           # W_up slice (bf16)
              + _tile_bytes(1, tf, f4)                 # b_up slice
              + _tile_bytes(tf, d_model, bf)           # W_down slice (bf16)
              + _tile_bytes(1, d_model, f4)            # b_down
              + _tile_bytes(tm, d_model, out_itemsize))  # out tile
    scratch = _tile_bytes(tm, d_model, f4)             # f32 accumulator
    return 2 * blocks + scratch + (4 << 20)


def _choose_tiles(n_tokens, d_model, d_ff, out_itemsize, budget):
    """Pick (tm, tf).  Arithmetic intensity of the weight stream is ~TM
    FLOP/byte vs. ridges of ~240 (v5e) / ~650 (v6e) / ~310 per-TC (v7x), so we
    want TM as large as the VMEM budget allows."""
    tm_target = 512 if budget >= (80 << 20) else 256
    tm = min(tm_target, _round_up(n_tokens, 128))

    def tf_candidates():
        yield d_ff                                     # prefer n_f = 1
        for c in (2048, 1024, 512, 256, 128):
            if c < d_ff and d_ff % c == 0:
                yield c

    while True:
        for tf in tf_candidates():
            if _vmem_estimate(tm, tf, d_model, out_itemsize) <= budget:
                return tm, tf
        if tm <= 128:
            return 128, (128 if d_ff % 128 == 0 else d_ff)
        tm = max(128, _round_up(tm // 2, 128))


# ----------------------------- Pallas kernel --------------------------------

def _moe_kernel(mask_ref, fetch_ref, x_ref, cw_ref, wup_ref, bup_ref,
                wdn_ref, bdn_ref, out_ref, acc_ref):
    """One grid step = (token tile t, expert e, d_ff tile f).

    mask_ref  : SMEM (n_t, E) int32  1 iff tile t has a token routed to e
    fetch_ref : SMEM (n_t, E) int32  DMA-dedup expert index (unused in body)
    x_ref     : (TM, D)  bf16        token tile (resident across e, f)
    cw_ref    : (TM, 1)  f32         this expert's combine-weight column
    wup_ref   : (D, TF)  bf16        up-proj slice (expert dim squeezed)
    bup_ref   : (1, TF)  f32
    wdn_ref   : (TF, D)  bf16        down-proj slice
    bdn_ref   : (1, D)   f32
    out_ref   : (TM, D)              written on the last (e, f) step
    acc_ref   : (TM, D)  f32 VMEM    accumulator, persists across e and f
    """
    del fetch_ref  # only consumed by the index_maps (DMA dedup)
    t = pl.program_id(0)
    e = pl.program_id(1)
    f = pl.program_id(2)
    last_e = pl.num_programs(1) - 1
    last_f = pl.num_programs(2) - 1

    @pl.when((e == 0) & (f == 0))
    def _init():
        acc_ref[...] = jnp.zeros_like(acc_ref)

    # Skip both matmuls when no token in this tile routes to expert e.  (The
    # weight DMA for such experts is already deduped by the fetch_e index_map.)
    @pl.when(mask_ref[t, e] != 0)
    def _compute():
        # up-projection slice + SiLU: bf16 MXU operands, f32 accumulate; all
        # elementwise work stays f32 (v5e has no bf16 VPU/EUP).
        h = jnp.dot(x_ref[...], wup_ref[...],
                    preferred_element_type=jnp.float32)            # (TM, TF)
        h = h + bup_ref[...]
        h = h * jax.nn.sigmoid(h)                                   # SiLU

        # down-projection slice (cast to bf16 only at the MXU input).
        y = jnp.dot(h.astype(wdn_ref.dtype), wdn_ref[...],
                    preferred_element_type=jnp.float32)             # (TM, D)

        cw = cw_ref[...]                                            # (TM, 1)

        # Down-proj bias belongs to the expert, not to each d_ff slice: fold
        # it into the first-slice accumulate so the accumulator is read/
        # written exactly once per step.
        @pl.when(f == 0)
        def _acc_with_down_bias():
            acc_ref[...] += cw * (y + bdn_ref[...])

        @pl.when(f != 0)
        def _acc():
            acc_ref[...] += cw * y

    @pl.when((e == last_e) & (f == last_f))
    def _finalize():
        out_ref[...] = acc_ref[...].astype(out_ref.dtype)


def moe_block_forward(x, combine_w, w_up_t, b_up, w_down_t, b_down,
                      *, tm=None, tf=None):
    """x: (N, D); combine_w: (N, E); w_up_t: (E, D, F); b_up: (E, F);
    w_down_t: (E, F, D); b_down: (E, D).  Returns (N, D)."""
    N, D = x.shape
    E, _, F = w_up_t.shape
    out_dtype = x.dtype
    out_itemsize = jnp.dtype(out_dtype).itemsize

    budget = _vmem_budget_bytes()
    auto_tm, auto_tf = _choose_tiles(N, D, F, out_itemsize, budget)
    tm = auto_tm if tm is None else tm
    tf = auto_tf if tf is None else tf
    if tf > F or F % tf != 0:
        tf = F
    n_f = F // tf
    n_pad = _round_up(N, tm)
    n_t = n_pad // tm

    # bf16 MXU operands; biases / combine weights / accumulator stay f32.
    xb = x.astype(jnp.bfloat16)
    wup = w_up_t.astype(jnp.bfloat16)
    wdn = w_down_t.astype(jnp.bfloat16)
    cw = combine_w.astype(jnp.float32)
    bup3 = b_up.reshape(E, 1, F).astype(jnp.float32)
    bdn3 = b_down.reshape(E, 1, D).astype(jnp.float32)

    if n_pad != N:
        xb = jnp.pad(xb, ((0, n_pad - N), (0, 0)))
        cw = jnp.pad(cw, ((0, n_pad - N), (0, 0)))

    # Per-(token tile, expert) activity mask for compute skipping (scalar
    # prefetch -> SMEM).  `!= 0` so non-positive routing weights still count.
    tile_mask = (cw.reshape(n_t, tm, E) != 0).any(axis=1).astype(jnp.int32)

    # DMA-dedup table: for an inactive expert, reuse the most recently fetched
    # active expert's index (BlockSpec skips the copy when the returned block
    # index does not change); leading inactives fall back to the first active.
    e_idx = jnp.arange(E, dtype=jnp.int32)
    marked = jnp.where(tile_mask != 0, e_idx[None, :], jnp.int32(-1))
    last_active = jax.lax.cummax(marked, axis=1)
    first_active = jnp.argmax(tile_mask != 0, axis=1).astype(jnp.int32)
    fetch_e = jnp.where(last_active >= 0, last_active,
                        first_active[:, None]).astype(jnp.int32)

    # Combine weights laid out per expert: (E, n_pad, 1) -> direct (TM, 1)
    # tile per (tile, expert); no in-kernel column select.
    cw_t = cw.T.reshape(E, n_pad, 1)

    # Advisory cost for XLA scheduling around the kernel (dense upper bound).
    cost = pl.CostEstimate(
        flops=4 * n_pad * D * F * E,
        transcendentals=n_pad * F * E,
        bytes_accessed=(n_pad * D * (2 + out_itemsize) + n_pad * E * 4
                        + n_t * E * (2 * D * F * 2 + F * 4 + D * 4)),
    )

    grid_spec = pltpu.PrefetchScalarGridSpec(
        num_scalar_prefetch=2,
        grid=(n_t, E, n_f),
        in_specs=[
            pl.BlockSpec((tm, D), lambda t, e, f, m, fe: (t, 0)),      # x
            pl.BlockSpec((None, tm, 1),
                         lambda t, e, f, m, fe: (e, t, 0)),            # cw col
            pl.BlockSpec((None, D, tf),
                         lambda t, e, f, m, fe: (fe[t, e], 0, f)),     # W_up
            pl.BlockSpec((None, 1, tf),
                         lambda t, e, f, m, fe: (fe[t, e], 0, f)),     # b_up
            pl.BlockSpec((None, tf, D),
                         lambda t, e, f, m, fe: (fe[t, e], f, 0)),     # W_down
            pl.BlockSpec((None, 1, D),
                         lambda t, e, f, m, fe: (fe[t, e], 0, 0)),     # b_down
        ],
        out_specs=pl.BlockSpec((tm, D), lambda t, e, f, m, fe: (t, 0)),
        scratch_shapes=[pltpu.VMEM((tm, D), jnp.float32)],             # acc
    )

    vmem_limit = int(min(max(_vmem_estimate(tm, tf, D, out_itemsize), 16 << 20),
                         budget))

    out = pl.pallas_call(
        _moe_kernel,
        out_shape=jax.ShapeDtypeStruct((n_pad, D), out_dtype),
        grid_spec=grid_spec,
        compiler_params=pltpu.CompilerParams(
            dimension_semantics=("parallel", "arbitrary", "arbitrary"),
            vmem_limit_bytes=vmem_limit,
        ),
        cost_estimate=cost,
    )(tile_mask, fetch_e, xb, cw_t, wup, bup3, wdn, bdn3)

    return out[:N]


# ------------------------------ JAX glue -------------------------------------

def simple_topk_router(x, w_gate, top_k):
    """Simple linear top-k router (stand-in for the externally supplied
    `router` module): returns (expert_indices [N,k], routing_weights [N,k])."""
    logits = x @ w_gate                              # (N, E)
    top_vals, top_idx = jax.lax.top_k(logits, top_k)
    routing_weights = jax.nn.softmax(top_vals, axis=-1)
    return top_idx, routing_weights


def make_combine_weights(expert_indices, routing_weights, num_experts):
    """combine_w[i, e] = sum_j routing_weights[i, j] * (expert_indices[i,j]==e)."""
    onehot = jax.nn.one_hot(expert_indices, num_experts,
                            dtype=routing_weights.dtype)      # (N, k, E)
    return jnp.einsum('nk,nke->ne', routing_weights, onehot)  # (N, E)


def reference_moe(x, combine_w, w_up_t, b_up, w_down_t, b_down):
    """Pure-JAX reference mirroring the kernel's mixed precision
    (bf16 MXU operands, f32 accumulation, f32 bias/SiLU/combine)."""
    xb = x.astype(jnp.bfloat16)
    wub = w_up_t.astype(jnp.bfloat16)
    wdb = w_down_t.astype(jnp.bfloat16)
    h = jnp.einsum('nd,edf->enf', xb, wub,
                   preferred_element_type=jnp.float32) + b_up[:, None, :]
    h = h * jax.nn.sigmoid(h)
    y = jnp.einsum('enf,efd->end', h.astype(jnp.bfloat16), wdb,
                   preferred_element_type=jnp.float32) + b_down[:, None, :]
    return jnp.einsum('ne,end->nd', combine_w.astype(jnp.float32), y)


# -------------------------------- main ---------------------------------------

if __name__ == "__main__":
    # Small but TPU-tile-friendly shapes: N tokens, d_model, d_ff = 4*d_model.
    N = 256          # number of tokens (e.g. batch 8 x seq 32, flattened)
    D = 128          # d_model
    F = 4 * D        # d_ff = 512
    E = 4            # num_experts
    TOP_K = 2

    key = jax.random.PRNGKey(0)
    k_x, k_gate, k_wu, k_bu, k_wd, k_bd = jax.random.split(key, 6)

    x = jax.random.normal(k_x, (N, D), dtype=jnp.float32)

    # Router gate weight (deterministic init).
    w_gate = jax.random.normal(k_gate, (D, E), dtype=jnp.float32) / np.sqrt(D)

    # Expert parameters. nn.Linear weight is [out, in]; we store the transpose
    # ([in, out]) so the kernel computes x @ W directly.
    w_up_t = jax.random.normal(k_wu, (E, D, F), dtype=jnp.float32) / np.sqrt(D)
    b_up = jax.random.normal(k_bu, (E, F), dtype=jnp.float32) * 0.02
    w_down_t = jax.random.normal(k_wd, (E, F, D), dtype=jnp.float32) / np.sqrt(F)
    b_down = jax.random.normal(k_bd, (E, D), dtype=jnp.float32) * 0.02

    # Router (glue, plain JAX) -> dense combine weights.
    expert_indices, routing_weights = simple_topk_router(x, w_gate, TOP_K)
    combine_w = make_combine_weights(expert_indices, routing_weights, E)

    # Pallas MoE forward (tiles auto-selected per TPU generation).
    out = moe_block_forward(x, combine_w, w_up_t, b_up, w_down_t, b_down)
    out = jax.block_until_ready(out)

    # Numerical check against a precision-matched pure-JAX reference.
    ref = reference_moe(x, combine_w, w_up_t, b_up, w_down_t, b_down)
    assert out.shape == (N, D)
    assert np.allclose(np.asarray(out, dtype=np.float32),
                       np.asarray(ref, dtype=np.float32),
                       atol=2e-2, rtol=2e-2)

    print("KERNEL_OK")
</pallas_src>

<mosaic_0001>
module attributes {stable_mosaic.version = 11 : i64} {
  func.func @_moe_kernel(%arg0: i32, %arg1: i32, %arg2: i32, %arg3: memref<1x4xi32, #tpu.memory_space<smem>>, %arg4: memref<1x4xi32, #tpu.memory_space<smem>>, %arg5: memref<256x128xbf16, #tpu.memory_space<vmem>>, %arg6: memref<1x256x1xf32, #tpu.memory_space<vmem>>, %arg7: memref<1x128x512xbf16, #tpu.memory_space<vmem>>, %arg8: memref<1x1x512xf32, #tpu.memory_space<vmem>>, %arg9: memref<1x512x128xbf16, #tpu.memory_space<vmem>>, %arg10: memref<1x1x128xf32, #tpu.memory_space<vmem>>, %arg11: memref<256x128xf32, #tpu.memory_space<vmem>>, %arg12: memref<256x128xf32, #tpu.memory_space<vmem>>) attributes {dimension_semantics = [#tpu.dimension_semantics<parallel>, #tpu.dimension_semantics<arbitrary>, #tpu.dimension_semantics<arbitrary>], iteration_bounds = array<i64: 1, 4, 1>, scalar_prefetch = 2 : i64, scratch_operands = 1 : i64, tpu.core_type = #tpu.core_type<tc>, window_params = [{transform_indices = @transform_0, window_bounds = array<i64: 256, 128>}, {transform_indices = @transform_1, window_bounds = array<i64: 1, 256, 1>}, {transform_indices = @transform_2, window_bounds = array<i64: 1, 128, 512>}, {transform_indices = @transform_3, window_bounds = array<i64: 1, 1, 512>}, {transform_indices = @transform_4, window_bounds = array<i64: 1, 512, 128>}, {transform_indices = @transform_5, window_bounds = array<i64: 1, 1, 128>}, {transform_indices = @transform_6, window_bounds = array<i64: 256, 128>}]} {
    %c0_i32 = arith.constant 0 : i32
    %0 = arith.cmpi eq, %arg1, %c0_i32 : i32
    %c0_i32_0 = arith.constant 0 : i32
    %1 = arith.cmpi eq, %arg2, %c0_i32_0 : i32
    %2 = arith.andi %0, %1 : i1
    %3 = arith.extui %2 : i1 to i32
    %c0_i32_1 = arith.constant 0 : i32
    %4 = arith.cmpi ne, %3, %c0_i32_1 : i32
    scf.if %4 {
      %cst = arith.constant 0.000000e+00 : f32
      %16 = vector.broadcast %cst : f32 to vector<256x128xf32>
      %c0 = arith.constant 0 : index
      %c0_6 = arith.constant 0 : index
      %17 = vector.load %arg12[%c0, %c0_6] : memref<256x128xf32, #tpu.memory_space<vmem>>, vector<256x128xf32>
      tpu.vector_store %arg12[%c0, %c0_6], %16 {strides = array<i32>} : memref<256x128xf32, #tpu.memory_space<vmem>>, vector<256x128xf32>,
    } else {
    }
    %5 = arith.index_cast %arg0 : i32 to index
    %6 = arith.index_cast %arg1 : i32 to index
    %7 = memref.load %arg3[%5, %6] : memref<1x4xi32, #tpu.memory_space<smem>>
    %c0_i32_2 = arith.constant 0 : i32
    %8 = arith.cmpi ne, %7, %c0_i32_2 : i32
    %9 = arith.extui %8 : i1 to i32
    %c0_i32_3 = arith.constant 0 : i32
    %10 = arith.cmpi ne, %9, %c0_i32_3 : i32
    scf.if %10 {
      %c0 = arith.constant 0 : index
      %c0_6 = arith.constant 0 : index
      %16 = vector.load %arg5[%c0, %c0_6] : memref<256x128xbf16, #tpu.memory_space<vmem>>, vector<256x128xbf16>
      %c0_7 = arith.constant 0 : index
      %c0_8 = arith.constant 0 : index
      %c0_9 = arith.constant 0 : index
      %17 = vector.load %arg7[%c0_7, %c0_8, %c0_9] : memref<1x128x512xbf16, #tpu.memory_space<vmem>>, vector<1x128x512xbf16>
      %18 = vector.shape_cast %17 : vector<1x128x512xbf16> to vector<128x512xbf16>
      %cst = arith.constant dense<0.000000e+00> : vector<256x512xf32>
      %19 = tpu.matmul %16, %18, %cst {dimension_numbers = #tpu.dot_dimension_numbers<[1], [0], [0], [1], [0, 0, 1, 1], [], []>} : vector<256x128xbf16>, vector<128x512xbf16>, vector<256x512xf32> -> vector<256x512xf32>
      %c0_10 = arith.constant 0 : index
      %c0_11 = arith.constant 0 : index
      %c0_12 = arith.constant 0 : index
      %20 = vector.load %arg8[%c0_10, %c0_11, %c0_12] : memref<1x1x512xf32, #tpu.memory_space<vmem>>, vector<1x1x512xf32>
      %21 = vector.shape_cast %20 : vector<1x1x512xf32> to vector<1x512xf32>
      %22 = vector.broadcast %21 : vector<1x512xf32> to vector<256x512xf32>
      %23 = arith.addf %19, %22 : vector<256x512xf32>
      %24 = arith.negf %23 : vector<256x512xf32>
      %25 = math.exp %24 : vector<256x512xf32>
      %cst_13 = arith.constant 1.000000e+00 : f32
      %26 = vector.broadcast %cst_13 : f32 to vector<256x512xf32>
      %27 = arith.addf %26, %25 : vector<256x512xf32>
      %28 = arith.divf %26, %27 : vector<256x512xf32>
      %29 = arith.mulf %23, %28 : vector<256x512xf32>
      %30 = arith.truncf %29 : vector<256x512xf32> to vector<256x512xbf16>
      %c0_14 = arith.constant 0 : index
      %c0_15 = arith.constant 0 : index
      %c0_16 = arith.constant 0 : index
      %31 = vector.load %arg9[%c0_14, %c0_15, %c0_16] : memref<1x512x128xbf16, #tpu.memory_space<vmem>>, vector<1x512x128xbf16>
      %32 = vector.shape_cast %31 : vector<1x512x128xbf16> to vector<512x128xbf16>
      %cst_17 = arith.constant dense<0.000000e+00> : vector<256x128xf32>
      %33 = tpu.matmul %30, %32, %cst_17 {dimension_numbers = #tpu.dot_dimension_numbers<[1], [0], [0], [1], [0, 0, 1, 1], [], []>} : vector<256x512xbf16>, vector<512x128xbf16>, vector<256x128xf32> -> vector<256x128xf32>
      %c0_18 = arith.constant 0 : index
      %c0_19 = arith.constant 0 : index
      %c0_20 = arith.constant 0 : index
      %34 = vector.load %arg6[%c0_18, %c0_19, %c0_20] : memref<1x256x1xf32, #tpu.memory_space<vmem>>, vector<1x256x1xf32>
      %35 = vector.shape_cast %34 : vector<1x256x1xf32> to vector<256x1xf32>
      %c0_i32_21 = arith.constant 0 : i32
      %36 = arith.cmpi eq, %arg2, %c0_i32_21 : i32
      %37 = arith.extui %36 : i1 to i32
      %c0_i32_22 = arith.constant 0 : i32
      %38 = arith.cmpi ne, %37, %c0_i32_22 : i32
      scf.if %38 {
        %c0_25 = arith.constant 0 : index
        %c0_26 = arith.constant 0 : index
        %42 = vector.load %arg12[%c0_25, %c0_26] : memref<256x128xf32, #tpu.memory_space<vmem>>, vector<256x128xf32>
        %c0_27 = arith.constant 0 : index
        %c0_28 = arith.constant 0 : index
        %c0_29 = arith.constant 0 : index
        %43 = vector.load %arg10[%c0_27, %c0_28, %c0_29] : memref<1x1x128xf32, #tpu.memory_space<vmem>>, vector<1x1x128xf32>
        %44 = vector.shape_cast %43 : vector<1x1x128xf32> to vector<1x128xf32>
        %45 = vector.broadcast %44 : vector<1x128xf32> to vector<256x128xf32>
        %46 = arith.addf %33, %45 : vector<256x128xf32>
        %47 = vector.broadcast %35 : vector<256x1xf32> to vector<256x128xf32>
        %48 = arith.mulf %47, %46 : vector<256x128xf32>
        %49 = arith.addf %42, %48 : vector<256x128xf32>
        %c0_30 = arith.constant 0 : index
        %c0_31 = arith.constant 0 : index
        %50 = vector.load %arg12[%c0_30, %c0_31] : memref<256x128xf32, #tpu.memory_space<vmem>>, vector<256x128xf32>
        tpu.vector_store %arg12[%c0_30, %c0_31], %49 {strides = array<i32>} : memref<256x128xf32, #tpu.memory_space<vmem>>, vector<256x128xf32>,
      } else {
      }
      %c0_i32_23 = arith.constant 0 : i32
      %39 = arith.cmpi ne, %arg2, %c0_i32_23 : i32
      %40 = arith.extui %39 : i1 to i32
      %c0_i32_24 = arith.constant 0 : i32
      %41 = arith.cmpi ne, %40, %c0_i32_24 : i32
      scf.if %41 {
        %c0_25 = arith.constant 0 : index
        %c0_26 = arith.constant 0 : index
        %42 = vector.load %arg12[%c0_25, %c0_26] : memref<256x128xf32, #tpu.memory_space<vmem>>, vector<256x128xf32>
        %43 = vector.broadcast %35 : vector<256x1xf32> to vector<256x128xf32>
        %44 = arith.mulf %43, %33 : vector<256x128xf32>
        %45 = arith.addf %42, %44 : vector<256x128xf32>
        %c0_27 = arith.constant 0 : index
        %c0_28 = arith.constant 0 : index
        %46 = vector.load %arg12[%c0_27, %c0_28] : memref<256x128xf32, #tpu.memory_space<vmem>>, vector<256x128xf32>
        tpu.vector_store %arg12[%c0_27, %c0_28], %45 {strides = array<i32>} : memref<256x128xf32, #tpu.memory_space<vmem>>, vector<256x128xf32>,
      } else {
      }
    } else {
    }
    %c3_i32 = arith.constant 3 : i32
    %11 = arith.cmpi eq, %arg1, %c3_i32 : i32
    %c0_i32_4 = arith.constant 0 : i32
    %12 = arith.cmpi eq, %arg2, %c0_i32_4 : i32
    %13 = arith.andi %11, %12 : i1
    %14 = arith.extui %13 : i1 to i32
    %c0_i32_5 = arith.constant 0 : i32
    %15 = arith.cmpi ne, %14, %c0_i32_5 : i32
    scf.if %15 {
      %c0 = arith.constant 0 : index
      %c0_6 = arith.constant 0 : index
      %16 = vector.load %arg12[%c0, %c0_6] : memref<256x128xf32, #tpu.memory_space<vmem>>, vector<256x128xf32>
      %c0_7 = arith.constant 0 : index
      %c0_8 = arith.constant 0 : index
      %17 = vector.load %arg11[%c0_7, %c0_8] : memref<256x128xf32, #tpu.memory_space<vmem>>, vector<256x128xf32>
      tpu.vector_store %arg11[%c0_7, %c0_8], %16 {strides = array<i32>} : memref<256x128xf32, #tpu.memory_space<vmem>>, vector<256x128xf32>,
    } else {
    }
    return
  }
  func.func @transform_0(%arg0: i32, %arg1: i32, %arg2: i32, %arg3: memref<1x4xi32, #tpu.memory_space<smem>>, %arg4: memref<1x4xi32, #tpu.memory_space<smem>>) -> (i32, i32) {
    %c0_i32 = arith.constant 0 : i32
    %c0_i32_0 = arith.constant 0 : i32
    return %arg0, %c0_i32 : i32, i32
  }
  func.func @transform_1(%arg0: i32, %arg1: i32, %arg2: i32, %arg3: memref<1x4xi32, #tpu.memory_space<smem>>, %arg4: memref<1x4xi32, #tpu.memory_space<smem>>) -> (i32, i32, i32) {
    %c0_i32 = arith.constant 0 : i32
    %c0_i32_0 = arith.constant 0 : i32
    return %arg1, %arg0, %c0_i32 : i32, i32, i32
  }
  func.func @transform_2(%arg0: i32, %arg1: i32, %arg2: i32, %arg3: memref<1x4xi32, #tpu.memory_space<smem>>, %arg4: memref<1x4xi32, #tpu.memory_space<smem>>) -> (i32, i32, i32) {
    %0 = arith.index_cast %arg0 : i32 to index
    %1 = arith.index_cast %arg1 : i32 to index
    %2 = memref.load %arg4[%0, %1] : memref<1x4xi32, #tpu.memory_space<smem>>
    %c0_i32 = arith.constant 0 : i32
    %c0_i32_0 = arith.constant 0 : i32
    return %2, %c0_i32, %arg2 : i32, i32, i32
  }
  func.func @transform_3(%arg0: i32, %arg1: i32, %arg2: i32, %arg3: memref<1x4xi32, #tpu.memory_space<smem>>, %arg4: memref<1x4xi32, #tpu.memory_space<smem>>) -> (i32, i32, i32) {
    %0 = arith.index_cast %arg0 : i32 to index
    %1 = arith.index_cast %arg1 : i32 to index
    %2 = memref.load %arg4[%0, %1] : memref<1x4xi32, #tpu.memory_space<smem>>
    %c0_i32 = arith.constant 0 : i32
    %c0_i32_0 = arith.constant 0 : i32
    return %2, %c0_i32, %arg2 : i32, i32, i32
  }
  func.func @transform_4(%arg0: i32, %arg1: i32, %arg2: i32, %arg3: memref<1x4xi32, #tpu.memory_space<smem>>, %arg4: memref<1x4xi32, #tpu.memory_space<smem>>) -> (i32, i32, i32) {
    %0 = arith.index_cast %arg0 : i32 to index
    %1 = arith.index_cast %arg1 : i32 to index
    %2 = memref.load %arg4[%0, %1] : memref<1x4xi32, #tpu.memory_space<smem>>
    %c0_i32 = arith.constant 0 : i32
    %c0_i32_0 = arith.constant 0 : i32
    return %2, %arg2, %c0_i32 : i32, i32, i32
  }
  func.func @transform_5(%arg0: i32, %arg1: i32, %arg2: i32, %arg3: memref<1x4xi32, #tpu.memory_space<smem>>, %arg4: memref<1x4xi32, #tpu.memory_space<smem>>) -> (i32, i32, i32) {
    %0 = arith.index_cast %arg0 : i32 to index
    %1 = arith.index_cast %arg1 : i32 to index
    %2 = memref.load %arg4[%0, %1] : memref<1x4xi32, #tpu.memory_space<smem>>
    %c0_i32 = arith.constant 0 : i32
    %c0_i32_0 = arith.constant 0 : i32
    %c0_i32_1 = arith.constant 0 : i32
    return %2, %c0_i32, %c0_i32_0 : i32, i32, i32
  }
  func.func @transform_6(%arg0: i32, %arg1: i32, %arg2: i32, %arg3: memref<1x4xi32, #tpu.memory_space<smem>>, %arg4: memref<1x4xi32, #tpu.memory_space<smem>>) -> (i32, i32) {
    %c0_i32 = arith.constant 0 : i32
    %c0_i32_0 = arith.constant 0 : i32
    return %arg0, %c0_i32 : i32, i32
  }
}

</mosaic_0001>

<bundles_post_ra>
// kernel: tpu_custom_call.1
= control target key start
LH: loop header
LB: loop body
LE: loop exit
PB: predicated region body
PF: predicated region fallthrough
CT: control target
= control target key end

     0   :  { %s6689_s0 = inlined_call_operand.vmem [shape: s32[1,4], index: 0, kind: input, shape index: {}]   ;;  %s6690_s2 = inlined_call_operand.hbm [shape: bf16[256,128], index: 2, kind: input, shape index: {}]   ;;  %s6691_s3 = inlined_call_operand.vmem [shape: f32[4,256,1], index: 3, kind: input, shape index: {}]   ;;  %s6692_s4 = inlined_call_operand.vmem [shape: bf16[4,128,512], index: 4, kind: input, shape index: {}]   ;;  %s6693_s5 = inlined_call_operand.vmem [shape: f32[4,1,512], index: 5, kind: input, shape index: {}]   ;;  %s6694_s6 = inlined_call_operand.hbm [shape: bf16[4,512,128], index: 6, kind: input, shape index: {}]   ;;  %s6695_s7 = inlined_call_operand.vmem [shape: f32[4,1,128], index: 7, kind: input, shape index: {}]   ;;  %s6696_s8 = inlined_call_operand.hbm [shape: f32[256,128], index: 8, kind: output, shape index: {}]   ;;  %s6697_s1 = inlined_call_operand.vmem [shape: s32[1,4], index: 1, kind: input, shape index: {}]  }
   0x1   :  { %s13_s29 = sshll.u32 %s6689_s0, 4  ;;  %s17_s10 = sshll.u32 %s6697_s1, 4  ;;  %s14_s29 = int_to_ptr.vmem [resolvable:$true] %s13_s29  ;;  %s18_s10 = int_to_ptr.vmem [resolvable:$true] %s17_s10 }
   0x2   :  { %s5004_s11 = scalar_lea.vmem %s14_s29, 16  ;;  %p5009_p1 = scmp.lt.s32.totalorder %s14_s29, %s14_s29 }
   0x3   :  { %p5005_p0 = scmp.ne.s32.totalorder %s14_s29, %s5004_s11  ;;  %p5010_p2 = scmp.lt.s32.totalorder %s5004_s11, %s5004_s11 }
   0x5   :  { %p5011_p3 = por %p5010_p2, %p5009_p1 }
   0x7   :  { %p5012_p4 = pnand %p5011_p3, %p5005_p0 }
   0x9   :  { %5015 = shalt.err (!%p5012_p4)  }
   0xa   :  { %s5174_s12 = smov [#allocation4]   ;;  %s5016_s13 = scalar_lea.vmem %s18_s10, 16 }
   0xb   :  { %16 = dma.vmem_to_smem %s14_s29, 16, %s5174_s12, [#allocation3] }
   0xc   :  { %p5017_p5 = scmp.ne.s32.totalorder %s18_s10, %s5016_s13  ;;  %p5021_p6 = scmp.lt.s32.totalorder %s18_s10, %s18_s10 }
   0xd   :  { %p5022_p7 = scmp.lt.s32.totalorder %s5016_s13, %s5016_s13 }
   0xf   :  { %p5023_p8 = por %p5022_p7, %p5021_p6 }
  0x11   :  { %p5024_p9 = pnand %p5023_p8, %p5017_p5 }
  0x13   :  { %5027 = shalt.err (!%p5024_p9)  }
  0x14   :  { %s5175_s0 = smov [#allocation5]  }
  0x15   :  { %20 = dma.vmem_to_smem %s18_s10, 16, %s5175_s0, [#allocation3] }
  0x16   :  { %5136 = dma.done.wait [#allocation3], 32 }
  0x17   :  { %5137 = vsyncadd [#allocation3], 4294967264 }
  0x18   :  { %22 = sfence }
  0x19   :  { %23 = vsyncpa [#allocation7], 0 }
  0x1a   :  { %24 = vsyncpa [#allocation10], 0 }
  0x1b   :  { %26 = vsyncpa [#allocation10 + $0x1], 0 }
  0x1c   :  { %27 = vsyncpa [#allocation8], 0  ;;  %s5236_s1 = smov 0   ;;  %s5238_s14 = smov 0  }
  0x1d   :  { %s5240_s15 = smov 0   ;;  %s5242_s16 = smov 0  }
  0x1e   :  { %s5244_s17 = smov 0   ;;  %s5246_s18 = smov 0  }
  0x1f LB: > { %s6702_s19 = sadd.s32 4294967295, %s5172_s18   ;;  %p232_p10 = scmp.ne.s32.totalorder %s5156_s14, %s5152_s1  ;;  %s5172_s18 = sphi %s5246_s18, %s33_s18   ;;  %s5168_s17 = sphi %s5244_s17, %s6841_s17   ;;  %s5164_s16 = sphi %s5242_s16, %s6840_s16   ;;  %s5160_s15 = sphi %s5240_s15, %s6839_s15   ;;  %s5156_s14 = sphi %s5238_s14, %s6838_s14   ;;  %s5152_s1 = sphi %s5236_s1, %s6837_s1  }
  0x20   : > { %p5268_p11 = scmp.eq.s32.totalorder %s6702_s19, 0  ;;  %p3845_p12 = scmp.ge.s32.totalorder %s5172_s18, 1 }
  0x21   : > { %p311_p13 = scmp.lt.s32.totalorder %s5172_s18, 5  ;;  %s5176_s23 = smov [#allocation6]  }
  0x22   : > { %s6708_s20 = scalar_select %p5268_p11, 1, 0 }
  0x23   : > { %p5276_p0 = por %p5268_p11, %p232_p10  ;;  %p5280_p1 = pnand %p3845_p12, %p311_p13 }
  0x24   : > { %s326_s24 = sshll.u32 %s5176_s23, 4  ;;  %s48_s26 = sadd.s32 1, %s5168_s17  ;;  %s327_s24 = int_to_ptr.vmem [resolvable:$true] %s326_s24 }
  0x25   : > { %s6709_s21 = scalar_select %p5276_p0, 1, 0 }
  0x26   : > { %s6710_s22 = scalar_select %p5280_p1, 1, 0 }
  0x27   : > { %p4321_p2 = pneg %p5280_p1  ;;  %s5028_s29 = scalar_lea.hbm %s6690_s2, 2048 }
  0x28   : > { %p5029_p4 = scmp.ne.s32.totalorder %s6690_s2, %s5028_s29  ;;  %p5035_p8 = scmp.lt.u32.totalorder %s5028_s29, %s6690_s2 }
  0x29   : > { %p5288_p3 = pnand %p4321_p2, %p5268_p11 }
  0x2b   : > { %p5030_p5 = pneg %p5288_p3 }
  0x2d   : > { %p5031_p6 = pnand %p5030_p5, %p5029_p4 }
  0x2f   : > { %p5032_p7 = pneg %p5031_p6 }
  0x31   : > { %p5037_p9 = pnand %p5035_p8, %p5032_p7 }
  0x33   : > { %5040 = shalt.err (!%p5037_p9)
}
  0x34   : > { %s5041_s12 = scalar_lea.vmem %s327_s24, 2048  ;;  %p5049_p2 = scmp.lt.s32.totalorder %s327_s24, %s327_s24 }
  0x35   : > { %p5042_p10 = scmp.ne.s32.totalorder %s327_s24, %s5041_s12  ;;  %p5050_p0 = scmp.lt.s32.totalorder %s5041_s12, %s5041_s12 }
  0x37   : > { %p5044_p12 = pnand %p5042_p10, %p5030_p5  ;;  %p5051_p11 = por %p5050_p0, %p5049_p2 }
  0x39   : > { %p5045_p13 = pneg %p5044_p12 }
  0x3b   : > { %p5052_p1 = pnand %p5051_p11, %p5045_p13 }
  0x3d   : > { %5055 = shalt.err (!%p5052_p1)
}
  0x3e   : > { %s6703_s13 = smov 64   ;;  %s6704_s0 = smov 4  }
  0x3f   : > { %4324 = dma.hbm_to_vmem [thread:$0]  (!%p5288_p3), %s6690_s2, 2048, %s327_s24, [#allocation7], %s6703_s13, %s6703_s13, %s6704_s0  }
  0x40   : > { %p50_p0 = scmp.ge.s32.totalorder %s48_s26, 4  ;;  %s198_s27 = sshra.s32 %s5168_s17, 7 }
  0x41   : > { %s3841_s28 = sshll.u32 %s198_s27, 7  ;;  %s203_s29 = sand.u32 127, %s5168_s17 }
  0x42   : > { %s6843_s26 = smov (%p50_p0, %s48_s26), 0  ;;  %s204_s30 = sadd.s32 %s3841_s28, %s203_s29 }
  0x43   : > { %s205_s25 = sld [smem:[#allocation5 + %s204_s30]]  ;;  %s206_s9 = sshra.s32 %s6843_s26, 7 }
  0x44   : > { %s3842_s10 = sshll.u32 %s206_s9, 7  ;;  %s211_s11 = sand.u32 127, %s6843_s26 }
  0x45   : > { %s212_s12 = sadd.s32 %s3842_s10, %s211_s11  ;;  %p226_p11 = scmp.ne.s32.totalorder %s5160_s15, %s5156_s14 }
  0x46   : > { %s213_s24 = sld [smem:[#allocation5 + %s212_s12]]  ;;  %p227_p1 = scmp.eq.s32.totalorder %s5172_s18, 0 }
  0x47   : > { %s410_s1 = sand.u32 1, %s5160_s15   ;;  %s219_s23 = sadd.s32 1, %s5160_s15 }
  0x48   : > { %p228_p3 = por %p227_p1, %p226_p11  ;;  %p4332_p4 = scmp.lt.s32.totalorder %s5172_s18, 4 }
  0x49   : > { %s3848_s13 = sshll.u32 %s410_s1, 8 }
  0x4a   : > { %s4311_s27 = scalar_select %p228_p3, [#allocation5], [#allocation12] }
  0x4b   : > { %p5324_p6 = pnand %p4332_p4, %p228_p3  ;;  %s6845_s30 = smov (!%p228_p3, %s204_s30), 0 }
  0x4c   : > { %s214_s19 = ssub.s32 %s205_s25, %s213_s24  ;;  %s6847_s27 = smov (!%p4332_p4, %s4311_s27), [#allocation13] }
  0x4d   : > { %p217_p5 = scmp.eq.s32.totalorder %s214_s19, 0  ;;  %s6849_s30 = smov (!%p4332_p4, %s6845_s30), 0 }
  0x4e   : > { %s422_s29 = sld [smem:[%s6847_s27 + %s6849_s30]]  ;;  %s414_s9 = scalar_lea.vmem [#allocation9], %s3848_s13 }
  0x4f   : > { %s5329_s28 = scalar_select %p217_p5, %s5160_s15, %s219_s23  }
  0x50   : > { %s431_s10 = sshll.u32 %s414_s9, 4  ;;  %s5338_s24 = scalar_lea.sflag [#allocation10], %s410_s1  ;;  %s5331_s10 = int_to_ptr.vmem [resolvable:$true] %s431_s10 }
  0x51   : > { %p5058_p8 = pneg %p5324_p6  ;;  %s5061_s27 = scalar_lea.hbm %s6694_s6, 16384 }
  0x54   : > { %s4080_s11 = sshll.u32 %s422_s29, 12 }
  0x55   : > { %s5336_s19 = scalar_lea.hbm %s6694_s6, %s4080_s11 }
  0x56   : > { %s5056_s23 = scalar_lea.hbm %s5336_s19, 4096  ;;  %p5062_p12 = scmp.lt.u32.totalorder %s5336_s19, %s6694_s6 }
  0x57   : > { %p5057_p7 = scmp.ne.s32.totalorder %s5336_s19, %s5056_s23  ;;  %p5063_p13 = scmp.lt.u32.totalorder %s5061_s27, %s5056_s23 }
  0x58   : > { %p5065_p0 = scmp.lt.u32.totalorder %s5056_s23, %s5336_s19 }
  0x59   : > { %p5059_p9 = pnand %p5058_p8, %p5057_p7  ;;  %p5064_p2 = por %p5063_p13, %p5062_p12 }
  0x5b   : > { %p5060_p10 = pneg %p5059_p9  ;;  %p5066_p11 = por %p5065_p0, %p5064_p2 }
  0x5d   : > { %p5067_p1 = pnand %p5066_p11, %p5060_p10 }
  0x5f   : > { %5070 = shalt.err (!%p5067_p1)
}
  0x60   : > { %s5071_s1 = scalar_lea.vmem %s5331_s10, 4096  ;;  %s5179_s11 = smov [#allocation9]  }
  0x61   : > { %p5072_p3 = scmp.ne.s32.totalorder %s5331_s10, %s5071_s1  ;;  %s5076_s25 = sshll.u32 %s5179_s11, 4  ;;  %s5077_s25 = int_to_ptr.vmem [resolvable:$false] %s5076_s25 }
  0x62   : > { %s5078_s12 = scalar_lea.vmem %s5077_s25, 8192  ;;  %p5079_p7 = scmp.lt.s32.totalorder %s5331_s10, %s5077_s25 }
  0x63   : > { %p5074_p4 = pnand %p5072_p3, %p5058_p8  ;;  %p5080_p9 = scmp.lt.s32.totalorder %s5078_s12, %s5071_s1 }
  0x65   : > { %p5075_p5 = pneg %p5074_p4  ;;  %p5081_p12 = por %p5080_p9, %p5079_p7 }
  0x67   : > { %p5082_p13 = pnand %p5081_p12, %p5075_p5 }
  0x69   : > { %5085 = shalt.err (!%p5082_p13)
}
  0x6a   : > { %s6713_s23 = smov 4   ;;  %s6714_s13 = smov 64  }
  0x6b   : > { %4330 = dma.hbm_to_vmem [thread:$0]  (!%p5324_p6), %s5336_s19, 4096, %s5331_s10, %s5338_s24, %s6714_s13, %s6714_s13, %s6713_s23  }
  0x6c   : > { %p6715_p8 = scmp.ne.s32.totalorder %s6710_s22, 0 }
  0x6d   : > { %p6716_p10 = scmp.ne.s32.totalorder (!%p6715_p8), %s6708_s20, 0 }
  0x6e   : > { %465 = sbr.rel (%p6715_p8) target bundleno = 954 (0x3ba), region = 44 }
  0x75   : > { %5139 = dma.done.wait (%p6716_p10), [#allocation7], 2048  }
  0x76   : > { %5141 = vsyncadd (%p6716_p10), [#allocation7], 4294965248  ;;  %s471_s30 = sand.u32 1, %s5156_s14   ;;  %p6717_p2 = scmp.ne.s32.totalorder %s6709_s21, 0 }
  0x77   : > { %s3854_s0 = sshll.u32 %s471_s30, 8  ;;  %s472_s27 = scalar_lea.sflag [#allocation10], %s471_s30 }
  0x78   : > { %s5376_s29 = scalar_lea.vmem [#allocation9], %s3854_s0 }
  0x79   : > { %5143 = dma.done.wait (%p6717_p2), %s472_s27, 4096  }
  0x7a   : > { %5145 = vsyncadd (%p6717_p2), %s472_s27, 4294963200  ;;  %s563_s22 = sshra.s32 %s5164_s16, 7  ;;  %s568_s20 = sand.u32 127, %s5164_s16 }
  0x7b   : > { %s3857_s10 = sshll.u32 %s563_s22, 7  ;;  %p554_p6 = scmp.lt.s32.totalorder %s5164_s16, 3 }
  0x7c   : > { %s5385_s19 = sadd.s32 %s3857_s10, %s568_s20  ;;  %p644_p0 = scmp.eq.s32.totalorder %s5164_s16, 0 }
  0x7d   : > { %s570_s24 = sld [smem:[#allocation5 + %s5385_s19]]  ;;  %v5180_v0 = vmov (%p644_p0), 0.0  }
  0x7e   : > { %s596_s9 = sld [smem:[#allocation5 + %s5385_s19]]  ;;  %650 = vst [vmem:[#allocation2] sm:$0xff] (%p644_p0), %v5180_v0  ;;  %651 = vst [vmem:[#allocation2 + $0x8] sm:$0xff] (%p644_p0), %v5180_v0 }
  0x7f   : > { %s630_s1 = sld [smem:[#allocation5 + %s5385_s19]]  ;;  %652 = vst [vmem:[#allocation2 + $0x10] sm:$0xff] (%p644_p0), %v5180_v0  ;;  %653 = vst [vmem:[#allocation2 + $0x18] sm:$0xff] (%p644_p0), %v5180_v0 }
  0x80   : > { %s555_s21 = scalar_select %p554_p6, %s5164_s16, 3 }
  0x81   : > { %654 = vst [vmem:[#allocation2 + $0x20] sm:$0xff] (%p644_p0), %v5180_v0  ;;  %655 = vst [vmem:[#allocation2 + $0x28] sm:$0xff] (%p644_p0), %v5180_v0 }
  0x82   : > { %s4081_s11 = sshll.u32 %s555_s21, 8  ;;  %656 = vst [vmem:[#allocation2 + $0x30] sm:$0xff] (%p644_p0), %v5180_v0  ;;  %657 = vst [vmem:[#allocation2 + $0x38] sm:$0xff] (%p644_p0), %v5180_v0 }
  0x83   : > { %s5395_s23 = scalar_lea.vmem %s6691_s3, %s4081_s11  ;;  %p572_p11 = scmp.lt.s32.totalorder %s570_s24, 3  ;;  %658 = vst [vmem:[#allocation2 + $0x40] sm:$0xff] (%p644_p0), %v5180_v0  ;;  %659 = vst [vmem:[#allocation2 + $0x48] sm:$0xff] (%p644_p0), %v5180_v0 }
  0x84   : > { %p598_p1 = scmp.lt.s32.totalorder %s596_s9, 3  ;;  %649 = sbr.rel (!%p644_p0) target bundleno = 143 (0x8f), region = 56  ;;  %660 = vst [vmem:[#allocation2 + $0x50] sm:$0xff] (%p644_p0), %v5180_v0  ;;  %661 = vst [vmem:[#allocation2 + $0x58] sm:$0xff] (%p644_p0), %v5180_v0 }
  0x85   : > { %p631_p3 = scmp.lt.s32.totalorder %s630_s1, 3  ;;  %s6851_s24 = smov (!%p572_p11, %s570_s24), 3  ;;  %662 = vst [vmem:[#allocation2 + $0x60] sm:$0xff] (%p644_p0), %v5180_v0  ;;  %663 = vst [vmem:[#allocation2 + $0x68] sm:$0xff] (%p644_p0), %v5180_v0 }
  0x86   : > { %s6853_s9 = smov (!%p598_p1, %s596_s9), 3  ;;  %s4082_s13 = sshll.u32 %s6851_s24, 8  ;;  %664 = vst [vmem:[#allocation2 + $0x70] sm:$0xff] (%p644_p0), %v5180_v0  ;;  %665 = vst [vmem:[#allocation2 + $0x78] sm:$0xff] (%p644_p0), %v5180_v0 }
  0x87   : > { %s5400_s27 = scalar_lea.vmem %s6692_s4, %s4082_s13  ;;  %s3861_s22 = sshll.u32 %s6853_s9, 2  ;;  %666 = vst [vmem:[#allocation2 + $0x80] sm:$0xff] (%p644_p0), %v5180_v0  ;;  %667 = vst [vmem:[#allocation2 + $0x88] sm:$0xff] (%p644_p0), %v5180_v0 }
  0x88   : > { %s5405_s21 = scalar_lea.vmem %s6693_s5, %s3861_s22  ;;  %s6855_s1 = smov (!%p631_p3, %s630_s1), 3  ;;  %668 = vst [vmem:[#allocation2 + $0x90] sm:$0xff] (%p644_p0), %v5180_v0  ;;  %669 = vst [vmem:[#allocation2 + $0x98] sm:$0xff] (%p644_p0), %v5180_v0 }
  0x89   : > { %s633_s12 = scalar_lea.vmem %s6695_s7, %s6855_s1  ;;  %670 = vst [vmem:[#allocation2 + $0xa0] sm:$0xff] (%p644_p0), %v5180_v0  ;;  %671 = vst [vmem:[#allocation2 + $0xa8] sm:$0xff] (%p644_p0), %v5180_v0 }
  0x8a   : > { %672 = vst [vmem:[#allocation2 + $0xb0] sm:$0xff] (%p644_p0), %v5180_v0  ;;  %673 = vst [vmem:[#allocation2 + $0xb8] sm:$0xff] (%p644_p0), %v5180_v0 }
  0x8b   : > { %674 = vst [vmem:[#allocation2 + $0xc0] sm:$0xff] %v5180_v0  ;;  %675 = vst [vmem:[#allocation2 + $0xc8] sm:$0xff] %v5180_v0 }
  0x8c   : > { %676 = vst [vmem:[#allocation2 + $0xd0] sm:$0xff] %v5180_v0  ;;  %677 = vst [vmem:[#allocation2 + $0xd8] sm:$0xff] %v5180_v0 }
  0x8d   : > { %678 = vst [vmem:[#allocation2 + $0xe0] sm:$0xff] %v5180_v0  ;;  %679 = vst [vmem:[#allocation2 + $0xe8] sm:$0xff] %v5180_v0 }
  0x8e   : > { %680 = vst [vmem:[#allocation2 + $0xf0] sm:$0xff] %v5180_v0  ;;  %681 = vst [vmem:[#allocation2 + $0xf8] sm:$0xff] %v5180_v0 }
  0x8f PF: > { %s689_s24 = sld [smem:[#allocation4 + %s5385_s19]] }
  0x95   : > { %p3865_p4 = scmp.eq.s32.totalorder %s689_s24, 0 }
  0x97   : > { %693 = sbr.rel (%p3865_p4) target bundleno = 910 (0x38e), region = 60 }
  0x9e   : > { %v4396_v1 = vld [vmem:[%s5400_s27 + $0x4] ss:$16 sps:$4 sm:$0xff]   ;;  %v4398_v2 = vld [vmem:[%s5400_s27 + $0xc] ss:$16 sps:$4 sm:$0xff]   ;;  %v5181_v3 = vmov 0  }
  0x9f   : > { %1068 = vmatprep.mubr.bf16.mxu0 %v5181_v3  ;;  %1261 = vmatprep.mubr.bf16.mxu1 %v5181_v3  ;;  %v4400_v4 = vld [vmem:[%s5400_s27] ss:$16 sps:$4 sm:$0xff]   ;;  %v4401_v5 = vld [vmem:[%s5400_s27 + $0x8] ss:$16 sps:$4 sm:$0xff]   ;;  %v4402_v6 = vld [vmem:[%s5400_s27 + $0x24] ss:$16 sps:$4 sm:$0xff]  }
  0xa0   : > { %1036 = vmatprep.subr.bf16.mxu0 %v4396_v1  ;;  %4394 = vset.pattern.permute.xlu0 %v5181_v3  ;;  %v4404_v7 = vld [vmem:[%s5400_s27 + $0x2c] ss:$16 sps:$4 sm:$0xff]   ;;  %v4406_v8 = vld [vmem:[%s5400_s27 + $0x20] ss:$16 sps:$4 sm:$0xff]   ;;  %v4407_v9 = vld [vmem:[%s5400_s27 + $0x28] ss:$16 sps:$4 sm:$0xff]  }
  0xa1   : > { %1229 = vmatprep.subr.bf16.mxu1 %v4398_v2  ;;  %4395 = vset.pattern.permute.xlu1 %v5181_v3  ;;  %v4408_v10 = vld [vmem:[%s5400_s27 + $0x44] ss:$16 sps:$4 sm:$0xff]   ;;  %v4410_v11 = vld [vmem:[%s5400_s27 + $0x4c] ss:$16 sps:$4 sm:$0xff]   ;;  %v4412_v12 = vld [vmem:[%s5400_s27 + $0x40] ss:$16 sps:$4 sm:$0xff]  }
  0xa2   : > { %1037 = vmatpush1.bf16.msra.mxu0 %v4400_v4  ;;  %1230 = vmatpush1.bf16.msra.mxu1 %v4401_v5  ;;  %v4413_v13 = vld [vmem:[%s5400_s27 + $0x48] ss:$16 sps:$4 sm:$0xff]   ;;  %v4414_v14 = vld [vmem:[%s5400_s27 + $0x64] ss:$16 sps:$4 sm:$0xff]   ;;  %v4416_v15 = vld [vmem:[%s5400_s27 + $0x6c] ss:$16 sps:$4 sm:$0xff]  }
  0xa3   : > { %1038 = vmatprep.subr.bf16.mxu0 %v4402_v6  ;;  %1231 = vmatprep.subr.bf16.mxu1 %v4404_v7  ;;  %v4418_v16 = vld [vmem:[%s5400_s27 + $0x60] ss:$16 sps:$4 sm:$0xff]   ;;  %v4419_v17 = vld [vmem:[%s5400_s27 + $0x68] ss:$16 sps:$4 sm:$0xff]   ;;  %v4420_v18 = vld [vmem:[%s5400_s27 + $0x84] ss:$16 sps:$4 sm:$0xff]  }
  0xa4   : > { %v4422_v19 = vld [vmem:[%s5400_s27 + $0x8c] ss:$16 sps:$4 sm:$0xff]   ;;  %v4424_v20 = vld [vmem:[%s5400_s27 + $0x80] ss:$16 sps:$4 sm:$0xff]   ;;  %v4425_v21 = vld [vmem:[%s5400_s27 + $0x88] ss:$16 sps:$4 sm:$0xff]  }
  0xa5   : > { %v4426_v22 = vld [vmem:[%s5400_s27 + $0xa4] ss:$16 sps:$4 sm:$0xff]   ;;  %v4428_v23 = vld [vmem:[%s5400_s27 + $0xac] ss:$16 sps:$4 sm:$0xff]   ;;  %v4430_v24 = vld [vmem:[%s5400_s27 + $0xa0] ss:$16 sps:$4 sm:$0xff]  }
  0xa6   : > { %1039 = vmatpush1.bf16.msra.mxu0 %v4406_v8  ;;  %1232 = vmatpush1.bf16.msra.mxu1 %v4407_v9  ;;  %v4431_v25 = vld [vmem:[%s5400_s27 + $0xa8] ss:$16 sps:$4 sm:$0xff]   ;;  %v4432_v26 = vld [vmem:[%s5400_s27 + $0xc4] ss:$16 sps:$4 sm:$0xff]   ;;  %v4434_v27 = vld [vmem:[%s5400_s27 + $0xcc] ss:$16 sps:$4 sm:$0xff]  }
  0xa7   : > { %1040 = vmatprep.subr.bf16.mxu0 %v4408_v10  ;;  %1233 = vmatprep.subr.bf16.mxu1 %v4410_v11  ;;  %v4436_v28 = vld [vmem:[%s5400_s27 + $0xc0] ss:$16 sps:$4 sm:$0xff]   ;;  %v4437_v29 = vld [vmem:[%s5400_s27 + $0xc8] ss:$16 sps:$4 sm:$0xff]   ;;  %v4438_v30 = vld [vmem:[%s5400_s27 + $0xe4] ss:$16 sps:$4 sm:$0xff]  }
  0xa8   : > { %v4440_v31 = vld [vmem:[%s5400_s27 + $0xec] ss:$16 sps:$4 sm:$0xff]   ;;  %v4442_v32 = vld [vmem:[%s5400_s27 + $0xe0] ss:$16 sps:$4 sm:$0xff]   ;;  %v4443_v33 = vld [vmem:[%s5400_s27 + $0xe8] ss:$16 sps:$4 sm:$0xff]  }
  0xa9   : > { %v4444_v34 = vld [vmem:[#allocation6] sm:$0xff]   ;;  %v4445_v37 = vld [vmem:[#allocation6 + $0x8] sm:$0xff]   ;;  %v4446_v43 = vld [vmem:[#allocation6 + $0x10] sm:$0xff]  }
  0xaa   : > { %1041 = vmatpush1.bf16.msra.mxu0 %v4412_v12  ;;  %1234 = vmatpush1.bf16.msra.mxu1 %v4413_v13  ;;  %v4459_v35 = vld [vmem:[%s5376_s29 + $0x40] sm:$0xff]   ;;  %v4464_v40 = vld [vmem:[%s5376_s29 + $0x48] sm:$0xff]   ;;  %v4468_v45 = vld [vmem:[%s5376_s29 + $0x50] sm:$0xff]  }
  0xab   : > { %1042 = vmatprep.subr.bf16.mxu0 %v4414_v14  ;;  %1235 = vmatprep.subr.bf16.mxu1 %v4416_v15  ;;  %v4460_v36 = vld [vmem:[%s5376_s29 + $0xc0] sm:$0xff]   ;;  %v4465_v41 = vld [vmem:[%s5376_s29 + $0xc8] sm:$0xff]   ;;  %v4469_v46 = vld [vmem:[%s5376_s29 + $0xd0] sm:$0xff]  }
  0xac   : > { %v4462_v38 = vld [vmem:[%s5376_s29] sm:$0xff]   ;;  %v4466_v42 = vld [vmem:[%s5376_s29 + $0x8] sm:$0xff]   ;;  %v4470_v47 = vld [vmem:[%s5376_s29 + $0x10] sm:$0xff]  }
  0xad   : > { %v4463_v39 = vld [vmem:[%s5376_s29 + $0x80] sm:$0xff]   ;;  %v4467_v44 = vld [vmem:[%s5376_s29 + $0x88] sm:$0xff]   ;;  %v4471_v48 = vld [vmem:[%s5376_s29 + $0x90] sm:$0xff]  }
  0xae   : > { %1043 = vmatpush1.bf16.msra.mxu0 %v4418_v16  ;;  %1236 = vmatpush1.bf16.msra.mxu1 %v4419_v17  ;;  %v4472_v49 = vld [vmem:[%s5376_s29 + $0x58] sm:$0xff]   ;;  %v4476_v54 = vld [vmem:[%s5376_s29 + $0x60] sm:$0xff]   ;;  %v4480_v58 = vld [vmem:[%s5376_s29 + $0x68] sm:$0xff]  }
  0xaf   : > { %1044 = vmatprep.subr.bf16.mxu0 %v4420_v18  ;;  %1237 = vmatprep.subr.bf16.mxu1 %v4422_v19  ;;  %v4473_v50 = vld [vmem:[%s5376_s29 + $0xd8] sm:$0xff]   ;;  %v4477_v55 = vld [vmem:[%s5376_s29 + $0xe0] sm:$0xff]   ;;  %v4481_v59 = vld [vmem:[%s5376_s29 + $0xe8] sm:$0xff]  }
  0xb0   : > { %v4474_v51 = vld [vmem:[%s5376_s29 + $0x18] sm:$0xff]   ;;  %v4478_v56 = vld [vmem:[%s5376_s29 + $0x20] sm:$0xff]   ;;  %v4482_v60 = vld [vmem:[%s5376_s29 + $0x28] sm:$0xff]  }
  0xb1   : > { %v4447_v52 = vld [vmem:[#allocation6 + $0x18] sm:$0xff]   ;;  %v4479_v57 = vld [vmem:[%s5376_s29 + $0xa0] sm:$0xff]   ;;  %v4483_v62 = vld [vmem:[%s5376_s29 + $0xa8] sm:$0xff]  }
  0xb2   : > { %1045 = vmatpush1.bf16.msra.mxu0 %v4424_v20  ;;  %1238 = vmatpush1.bf16.msra.mxu1 %v4425_v21  ;;  %v4475_v53 = vld [vmem:[%s5376_s29 + $0x98] sm:$0xff]   ;;  %v4448_v61 = vld [vmem:[#allocation6 + $0x20] sm:$0xff]   ;;  %v4449_v63 = vld [vmem:[#allocation6 + $0x28] sm:$0xff]  }
  0xb3   : > { %1046 = vmatprep.subr.bf16.mxu0 %v4426_v22  ;;  %1239 = vmatprep.subr.bf16.mxu1 %v4428_v23  ;;  %v4450_v0 = vld [vmem:[#allocation6 + $0x30] sm:$0xff]   ;;  %v4451_v1 = vld [vmem:[#allocation6 + $0x38] sm:$0xff]   ;;  %v4452_v2 = vld [vmem:[#allocation6 + $0x40] sm:$0xff]  }
  0xb4   : > { %v4453_v4 = vld [vmem:[#allocation6 + $0x48] sm:$0xff]   ;;  %v4454_v5 = vld [vmem:[#allocation6 + $0x50] sm:$0xff]   ;;  %v4455_v6 = vld [vmem:[#allocation6 + $0x58] sm:$0xff]  }
  0xb5   : > { %v4456_v7 = vld [vmem:[#allocation6 + $0x60] sm:$0xff]   ;;  %v4457_v8 = vld [vmem:[#allocation6 + $0x68] sm:$0xff]   ;;  %v4458_v9 = vld [vmem:[#allocation6 + $0x70] sm:$0xff]  }
  0xb6   : > { %1047 = vmatpush1.bf16.msra.mxu0 %v4430_v24  ;;  %1240 = vmatpush1.bf16.msra.mxu1 %v4431_v25  ;;  %v4484_v10 = vld [vmem:[%s5376_s29 + $0x70] sm:$0xff]   ;;  %v4461_v14 = vld [vmem:[#allocation6 + $0x78] sm:$0xff]   ;;  %v758_v22 = vld [vmem:[%s5405_s21] sm:$0xf] }
  0xb7   : > { %1048 = vmatprep.subr.bf16.mxu0 %v4432_v26  ;;  %1241 = vmatprep.subr.bf16.mxu1 %v4434_v27  ;;  %v4485_v11 = vld [vmem:[%s5376_s29 + $0xf0] sm:$0xff]   ;;  %v4488_v15 = vld [vmem:[%s5376_s29 + $0x78] sm:$0xff]  }
  0xb8   : > { %v4486_v12 = vld [vmem:[%s5376_s29 + $0x30] sm:$0xff]   ;;  %v4489_v16 = vld [vmem:[%s5376_s29 + $0xf8] sm:$0xff]  }
  0xb9   : > { %v4487_v13 = vld [vmem:[%s5376_s29 + $0xb0] sm:$0xff]   ;;  %v4490_v17 = vld [vmem:[%s5376_s29 + $0x38] sm:$0xff]  }
  0xba   : > { %1049 = vmatpush1.bf16.msra.mxu0 %v4436_v28  ;;  %1242 = vmatpush1.bf16.msra.mxu1 %v4437_v29  ;;  %v4491_v18 = vld [vmem:[%s5376_s29 + $0xb8] sm:$0xff]  }
  0xbb   : > { %1050 = vmatprep.subr.bf16.mxu0 %v4438_v30  ;;  %1243 = vmatprep.subr.bf16.mxu1 %v4440_v31 }
  0xbe   : > { %1051 = vmatpush1.bf16.msra.mxu0 %v4442_v32  ;;  %1244 = vmatpush1.bf16.msra.mxu1 %v4443_v33 }
  0xbf   : > { %4085 = vmatprep.subr.bf16.mxu0 %v4459_v35  ;;  %4197 = vmatprep.subr.bf16.mxu1 %v4460_v36 }
  0xc1   : > { %1069 = vmatmul.mubr.bf16.vlgmr.msra.gmra.mrb[0].mxu0 %v4444_v34  ;;  %1262 = vmatmul.mubr.bf16.vlgmr.msra.gmra.mrb[0].mxu1 %v4444_v34 }
  0xc2   : > { %1078 = vmatprep.mubr.bf16.mxu0 %v5181_v3  ;;  %1271 = vmatprep.mubr.bf16.mxu1 %v5181_v3 }
  0xc3   : > { %4086 = vmatpush3.bf16.msra.mxu0 %v4462_v38  ;;  %4198 = vmatpush3.bf16.msra.mxu1 %v4463_v39 }
  0xc4   : > { %4087 = vmatprep.subr.bf16.mxu0 %v4464_v40  ;;  %4199 = vmatprep.subr.bf16.mxu1 %v4465_v41 }
  0xc7   : > { %4088 = vmatpush3.bf16.msra.mxu0 %v4466_v42  ;;  %4200 = vmatpush3.bf16.msra.mxu1 %v4467_v44 }
  0xc8   : > { %4089 = vmatprep.subr.bf16.mxu0 %v4468_v45  ;;  %4201 = vmatprep.subr.bf16.mxu1 %v4469_v46 }
  0xc9   : > { %1079 = vmatmul.mubr.bf16.gmra.mrb[4].mxu0 %v4445_v37  ;;  %1272 = vmatmul.mubr.bf16.gmra.mrb[4].mxu1 %v4445_v37 }
  0xca   : > { %1088 = vmatprep.mubr.bf16.mxu0 %v5181_v3  ;;  %1281 = vmatprep.mubr.bf16.mxu1 %v5181_v3 }
  0xcb   : > { %4090 = vmatpush3.bf16.msra.mxu0 %v4470_v47  ;;  %4202 = vmatpush3.bf16.msra.mxu1 %v4471_v48 }
  0xcc   : > { %4091 = vmatprep.subr.bf16.mxu0 %v4472_v49  ;;  %4203 = vmatprep.subr.bf16.mxu1 %v4473_v50 }
  0xcf   : > { %4092 = vmatpush3.bf16.msra.mxu0 %v4474_v51  ;;  %4204 = vmatpush3.bf16.msra.mxu1 %v4475_v53 }
  0xd0   : > { %4093 = vmatprep.subr.bf16.mxu0 %v4476_v54  ;;  %4205 = vmatprep.subr.bf16.mxu1 %v4477_v55 }
  0xd1   : > { %1089 = vmatmul.mubr.bf16.gmra.mrb[8].mxu0 %v4446_v43  ;;  %1282 = vmatmul.mubr.bf16.gmra.mrb[8].mxu1 %v4446_v43 }
  0xd2   : > { %1098 = vmatprep.mubr.bf16.mxu0 %v5181_v3  ;;  %1291 = vmatprep.mubr.bf16.mxu1 %v5181_v3 }
  0xd3   : > { %4094 = vmatpush3.bf16.msra.mxu0 %v4478_v56  ;;  %4206 = vmatpush3.bf16.msra.mxu1 %v4479_v57 }
  0xd4   : > { %4095 = vmatprep.subr.bf16.mxu0 %v4480_v58  ;;  %4207 = vmatprep.subr.bf16.mxu1 %v4481_v59 }
  0xd7   : > { %4096 = vmatpush3.bf16.msra.mxu0 %v4482_v60  ;;  %4208 = vmatpush3.bf16.msra.mxu1 %v4483_v62 }
  0xd8   : > { %4097 = vmatprep.subr.bf16.mxu0 %v4484_v10  ;;  %4209 = vmatprep.subr.bf16.mxu1 %v4485_v11 }
  0xd9   : > { %1099 = vmatmul.mubr.bf16.gmra.mrb[12].mxu0 %v4447_v52  ;;  %1292 = vmatmul.mubr.bf16.gmra.mrb[12].mxu1 %v4447_v52 }
  0xda   : > { %1108 = vmatprep.mubr.bf16.mxu0 %v5181_v3  ;;  %1301 = vmatprep.mubr.bf16.mxu1 %v5181_v3 }
  0xdb   : > { %4098 = vmatpush3.bf16.msra.mxu0 %v4486_v12  ;;  %4210 = vmatpush3.bf16.msra.mxu1 %v4487_v13 }
  0xdc   : > { %4099 = vmatprep.subr.bf16.mxu0 %v4488_v15  ;;  %4211 = vmatprep.subr.bf16.mxu1 %v4489_v16 }
  0xdf   : > { %4100 = vmatpush3.bf16.msra.mxu0 %v4490_v17  ;;  %4212 = vmatpush3.bf16.msra.mxu1 %v4491_v18 }
  0xe1   : > { %1109 = vmatmul.mubr.bf16.gmra.mrb[16].mxu0 %v4448_v61  ;;  %1302 = vmatmul.mubr.bf16.gmra.mrb[16].mxu1 %v4448_v61 }
  0xe2   : > { %1118 = vmatprep.mubr.bf16.mxu0 %v5181_v3  ;;  %1311 = vmatprep.mubr.bf16.mxu1 %v5181_v3 }
  0xe9   : > { %1119 = vmatmul.mubr.bf16.gmra.mrb[20].mxu0 %v4449_v63  ;;  %1312 = vmatmul.mubr.bf16.gmra.mrb[20].mxu1 %v4449_v63 }
  0xea   : > { %1128 = vmatprep.mubr.bf16.mxu0 %v5181_v3  ;;  %1321 = vmatprep.mubr.bf16.mxu1 %v5181_v3 }
  0xf1   : > { %1129 = vmatmul.mubr.bf16.gmra.mrb[24].mxu0 %v4450_v0  ;;  %1322 = vmatmul.mubr.bf16.gmra.mrb[24].mxu1 %v4450_v0 }
  0xf2   : > { %1138 = vmatprep.mubr.bf16.mxu0 %v5181_v3  ;;  %1331 = vmatprep.mubr.bf16.mxu1 %v5181_v3 }
  0xf9   : > { %1139 = vmatmul.mubr.bf16.gmra.mrb[28].mxu0 %v4451_v1  ;;  %1332 = vmatmul.mubr.bf16.gmra.mrb[28].mxu1 %v4451_v1 }
  0xfa   : > { %1148 = vmatprep.mubr.bf16.mxu0 %v5181_v3  ;;  %1341 = vmatprep.mubr.bf16.mxu1 %v5181_v3 }
 0x101   : > { %1149 = vmatmul.mubr.bf16.gmra.mrb[32].mxu0 %v4452_v2  ;;  %1342 = vmatmul.mubr.bf16.gmra.mrb[32].mxu1 %v4452_v2 }
 0x102   : > { %1158 = vmatprep.mubr.bf16.mxu0 %v5181_v3  ;;  %1351 = vmatprep.mubr.bf16.mxu1 %v5181_v3 }
 0x109   : > { %1159 = vmatmul.mubr.bf16.gmra.mrb[36].mxu0 %v4453_v4  ;;  %1352 = vmatmul.mubr.bf16.gmra.mrb[36].mxu1 %v4453_v4 }
 0x10a   : > { %1168 = vmatprep.mubr.bf16.mxu0 %v5181_v3  ;;  %1361 = vmatprep.mubr.bf16.mxu1 %v5181_v3 }
 0x111   : > { %1169 = vmatmul.mubr.bf16.gmra.mrb[40].mxu0 %v4454_v5  ;;  %1362 = vmatmul.mubr.bf16.gmra.mrb[40].mxu1 %v4454_v5 }
 0x112   : > { %1178 = vmatprep.mubr.bf16.mxu0 %v5181_v3  ;;  %1371 = vmatprep.mubr.bf16.mxu1 %v5181_v3 }
 0x119   : > { %1179 = vmatmul.mubr.bf16.gmra.mrb[44].mxu0 %v4455_v6  ;;  %1372 = vmatmul.mubr.bf16.gmra.mrb[44].mxu1 %v4455_v6 }
 0x11a   : > { %1188 = vmatprep.mubr.bf16.mxu0 %v5181_v3  ;;  %1381 = vmatprep.mubr.bf16.mxu1 %v5181_v3 }
 0x121   : > { %1189 = vmatmul.mubr.bf16.gmra.mrb[48].mxu0 %v4456_v7  ;;  %1382 = vmatmul.mubr.bf16.gmra.mrb[48].mxu1 %v4456_v7 }
 0x122   : > { %1198 = vmatprep.mubr.bf16.mxu0 %v5181_v3  ;;  %1391 = vmatprep.mubr.bf16.mxu1 %v5181_v3 }
 0x129   : > { %1199 = vmatmul.mubr.bf16.gmra.mrb[52].mxu0 %v4457_v8  ;;  %1392 = vmatmul.mubr.bf16.gmra.mrb[52].mxu1 %v4457_v8 }
 0x12a   : > { %1208 = vmatprep.mubr.bf16.mxu0 %v5181_v3  ;;  %1401 = vmatprep.mubr.bf16.mxu1 %v5181_v3 }
 0x131   : > { %1209 = vmatmul.mubr.bf16.gmra.mrb[56].mxu0 %v4458_v9  ;;  %1402 = vmatmul.mubr.bf16.gmra.mrb[56].mxu1 %v4458_v9 }
 0x132   : > { %1218 = vmatprep.mubr.bf16.mxu0 %v5181_v3  ;;  %1411 = vmatprep.mubr.bf16.mxu1 %v5181_v3  ;;  %v760_v3 = vlaneseq }
 0x134   : > { %v761_v19 = vshrl.u32 %v760_v3, 7 }
 0x136   : > { %v762_v20 = vsub.s32 0, %v761_v19  ;;  %v770_v21 = vsub.s32 2, %v761_v19  ;;  %v766_v23 = vsub.s32 1, %v761_v19  ;;  %v774_v24 = vsub.s32 3, %v761_v19 }
 0x138   : > { %v5515_v25 = vrot.slane %v758_v22, %v762_v20  ;;  %v5517_v26 = vrot.slane %v758_v22, %v770_v21  ;;  %v5519_v27 = vrot.slane %v758_v22, %v766_v23  ;;  %v5521_v28 = vrot.slane %v758_v22, %v774_v24 }
 0x139   : > { %1219 = vmatmul.mubr.bf16.gmra.mrb[60].mxu0 %v4461_v14  ;;  %1412 = vmatmul.mubr.bf16.gmra.mrb[60].mxu1 %v4461_v14 }
 0x194   : > { %v1070_v29 = vpop.f32.mrb[0].mxu0  ;;  %v1263_v30 = vpop.f32.mrb[0].mxu1 }
 0x195   : > { %v5524_v31 = vadd.f32 %v1070_v29, %v5515_v25  ;;  %v5527_v32 = vadd.f32 %v1263_v30, %v5517_v26  ;;  %v1072_v33 = vpop.f32.mrb[1].mxu0  ;;  %v1265_v34 = vpop.f32.mrb[1].mxu1 }
 0x196   : > { %v5530_v35 = vadd.f32 %v1072_v33, %v5519_v27  ;;  %v5533_v36 = vadd.f32 %v1265_v34, %v5521_v28  ;;  %v1074_v37 = vpop.f32.mrb[2].mxu0  ;;  %v1267_v38 = vpop.f32.mrb[2].mxu1 }
 0x197   : > { %v3914_v39 = vmul.f32 -1.442695, %v5524_v31  ;;  %v3916_v40 = vmul.f32 -1.442695, %v5527_v32  ;;  %v5538_v41 = vadd.f32 %v1074_v37, %v5515_v25  ;;  %v5541_v42 = vadd.f32 %v1267_v38, %v5517_v26  ;;  %v1076_v43 = vpop.f32.mrb[3].mxu0  ;;  %v1269_v44 = vpop.f32.mrb[3].mxu1 }
 0x198   : > { %v3915_v45 = vmul.f32 -1.442695, %v5530_v35  ;;  %v3917_v46 = vmul.f32 -1.442695, %v5533_v36  ;;  %v5546_v47 = vadd.f32 %v1076_v43, %v5519_v27  ;;  %v5549_v48 = vadd.f32 %v1269_v44, %v5521_v28 }
 0x199   : > { %4492 = vpow2.f32 %v3914_v39  ;;  %v3918_v49 = vmul.f32 -1.442695, %v5538_v41  ;;  %v3920_v50 = vmul.f32 -1.442695, %v5541_v42 }
 0x19a   : > { %4494 = vpow2.f32 %v3916_v40  ;;  %v3919_v51 = vmul.f32 -1.442695, %v5546_v47  ;;  %v3921_v52 = vmul.f32 -1.442695, %v5549_v48 }
 0x19b   : > { %4496 = vpow2.f32 %v3915_v45 }
 0x19c   : > { %4498 = vpow2.f32 %v3917_v46  ;;  %v1080_v53 = vpop.f32.mrb[4].mxu0  ;;  %v1273_v54 = vpop.f32.mrb[4].mxu1 }
 0x19d   : > { %4500 = vpow2.f32 %v3918_v49  ;;  %v5556_v55 = vadd.f32 %v1080_v53, %v5515_v25  ;;  %v5559_v56 = vadd.f32 %v1273_v54, %v5517_v26  ;;  %v1082_v57 = vpop.f32.mrb[5].mxu0  ;;  %v1275_v58 = vpop.f32.mrb[5].mxu1 }
 0x19e   : > { %4502 = vpow2.f32 %v3920_v50  ;;  %v5562_v59 = vadd.f32 %v1082_v57, %v5519_v27  ;;  %v5565_v60 = vadd.f32 %v1275_v58, %v5521_v28  ;;  %v1084_v61 = vpop.f32.mrb[6].mxu0  ;;  %v1277_v62 = vpop.f32.mrb[6].mxu1 }
 0x19f   : > { %4504 = vpow2.f32 %v3919_v51  ;;  %v3922_v63 = vmul.f32 -1.442695, %v5556_v55  ;;  %v3924_v0 = vmul.f32 -1.442695, %v5559_v56  ;;  %v5570_v1 = vadd.f32 %v1084_v61, %v5515_v25  ;;  %v1086_v2 = vpop.f32.mrb[7].mxu0  ;;  %v1279_v4 = vpop.f32.mrb[7].mxu1 }
 0x1a0   : > { %4506 = vpow2.f32 %v3921_v52  ;;  %v3923_v5 = vmul.f32 -1.442695, %v5562_v59  ;;  %v3925_v6 = vmul.f32 -1.442695, %v5565_v60  ;;  %v5576_v38 = vadd.f32 %v1277_v62, %v5517_v26 }
 0x1a1   : > { %4508 = vpow2.f32 %v3922_v63  ;;  %v3926_v7 = vmul.f32 -1.442695, %v5570_v1  ;;  %v5579_v45 = vadd.f32 %v1086_v2, %v5519_v27  ;;  %v5582_v51 = vadd.f32 %v1279_v4, %v5521_v28 }
 0x1a2   : > { %4510 = vpow2.f32 %v3924_v0  ;;  %v3928_v58 = vmul.f32 -1.442695, %v5576_v38 }
 0x1a3   : > { %v4493_v8 = vpop.eup %4492  ;;  %4512 = vpow2.f32 %v3923_v5 }
 0x1a4   : > { %v4495_v9 = vpop.eup %4494  ;;  %v1806_v10 = vadd.f32 1.0, %v4493_v8  ;;  %4514 = vpow2.f32 %v3925_v6  ;;  %v1090_v11 = vpop.f32.mrb[8].mxu0 }
 0x1a5   : > { %v1283_v12 = vpop.f32.mrb[8].mxu1  ;;  %v4497_v13 = vpop.eup %4496  ;;  %v1808_v14 = vadd.f32 1.0, %v4495_v9  ;;  %4516 = vpow2.f32 %v3926_v7  ;;  %v5588_v61 = vadd.f32 %v1090_v11, %v5515_v25 }
 0x1a6   : > { %v1092_v15 = vpop.f32.mrb[9].mxu0  ;;  %v1285_v16 = vpop.f32.mrb[9].mxu1  ;;  %4518 = vrcp.f32 %v1806_v10  ;;  %v1807_v18 = vadd.f32 1.0, %v4497_v13  ;;  %v5595_v4 = vadd.f32 %v1283_v12, %v5517_v26  ;;  %v3927_v10 = vmul.f32 -1.442695, %v5579_v45 }
 0x1a7   : > { %v4499_v17 = vpop.eup %4498  ;;  %v1094_v3 = vpop.f32.mrb[10].mxu0  ;;  %4520 = vrcp.f32 %v1808_v14  ;;  %v5598_v5 = vadd.f32 %v1092_v15, %v5519_v27  ;;  %v5606_v11 = vadd.f32 %v1285_v16, %v5521_v28  ;;  %v3929_v12 = vmul.f32 -1.442695, %v5582_v51 }
 0x1a8   : > { %v1287_v19 = vpop.f32.mrb[10].mxu1  ;;  %v4501_v20 = vpop.eup %4500  ;;  %v1809_v21 = vadd.f32 1.0, %v4499_v17  ;;  %4522 = vrcp.f32 %v1807_v18  ;;  %v5612_v15 = vadd.f32 %v1094_v3, %v5515_v25  ;;  %v3930_v18 = vmul.f32 -1.442695, %v5588_v61 }
 0x1a9   : > { %v1096_v22 = vpop.f32.mrb[11].mxu0  ;;  %v4503_v23 = vpop.eup %4502  ;;  %v1810_v24 = vadd.f32 1.0, %v4501_v20  ;;  %v3931_v16 = vmul.f32 -1.442695, %v5598_v5 }
 0x1aa   : > { %v1289_v29 = vpop.f32.mrb[11].mxu1  ;;  %v4505_v30 = vpop.eup %4504  ;;  %4524 = vrcp.f32 %v1809_v21  ;;  %v1812_v33 = vadd.f32 1.0, %v4503_v23  ;;  %v3932_v21 = vmul.f32 -1.442695, %v5595_v4  ;;  %v5618_v23 = vadd.f32 %v1287_v19, %v5517_v26 }
 0x1ab   : > { %v4507_v34 = vpop.eup %4506  ;;  %4526 = vrcp.f32 %v1810_v24  ;;  %v1811_v37 = vadd.f32 1.0, %v4505_v30  ;;  %v3933_v30 = vmul.f32 -1.442695, %v5606_v11  ;;  %v5622_v3 = vadd.f32 %v1096_v22, %v5519_v27 }
 0x1ac   : > { %v4509_v39 = vpop.eup %4508  ;;  %4528 = vrcp.f32 %v1812_v33  ;;  %v1813_v40 = vadd.f32 1.0, %v4507_v34  ;;  %v1100_v46 = vpop.f32.mrb[12].mxu0  ;;  %v5625_v33 = vadd.f32 %v1289_v29, %v5521_v28 }
 0x1ad   : > { %v4511_v43 = vpop.eup %4510  ;;  %4530 = vrcp.f32 %v1811_v37  ;;  %v1814_v44 = vadd.f32 1.0, %v4509_v39  ;;  %v1293_v52 = vpop.f32.mrb[12].mxu1 }
 0x1ae   : > { %v4513_v49 = vpop.eup %4512  ;;  %4532 = vrcp.f32 %v1813_v40  ;;  %v1816_v50 = vadd.f32 1.0, %v4511_v43  ;;  %v5584_v53 = vpop.f32.mrb[13].mxu0  ;;  %v3934_v43 = vmul.f32 -1.442695, %v5612_v15 }
 0x1af   : > { %v4515_v54 = vpop.eup %4514  ;;  %4534 = vrcp.f32 %v1814_v44  ;;  %v1815_v57 = vadd.f32 1.0, %v4513_v49  ;;  %v5590_v62 = vpop.f32.mrb[13].mxu1 }
 0x1b0   : > { %v5592_v63 = vpop.f32.mrb[14].mxu0  ;;  %v4517_v0 = vpop.eup %4516  ;;  %4536 = vrcp.f32 %v1816_v50  ;;  %v1817_v2 = vadd.f32 1.0, %v4515_v54  ;;  %v5645_v54 = vadd.f32 %v1100_v46, %v5515_v25 }
 0x1b1   : > { %v5600_v6 = vpop.f32.mrb[14].mxu1  ;;  %v5602_v7 = vpop.f32.mrb[15].mxu0  ;;  %4538 = vrcp.f32 %v1815_v57  ;;  %v1818_v9 = vadd.f32 1.0, %v4517_v0  ;;  %v3936_v0 = vmul.f32 -1.442695, %v5618_v23 }
 0x1b2   : > { %v4519_v8 = vpop.eup %4518  ;;  %v5608_v13 = vpop.f32.mrb[15].mxu1  ;;  %4540 = vrcp.f32 %v1817_v2  ;;  %6718 = vst [vmem:[#allocation18_spill] sm:$0xff] %v5645_v54  ;;  %v5655_v2 = vadd.f32 %v1293_v52, %v5517_v26 }
 0x1b3   : > { %v4521_v14 = vpop.eup %4520  ;;  %4542 = vrcp.f32 %v1818_v9  ;;  %v5632_v40 = vmul.f32 %v4519_v8, %v5524_v31  ;;  %v3935_v9 = vmul.f32 -1.442695, %v5622_v3 }
 0x1b4   : > { %v4523_v17 = vpop.eup %4522  ;;  %4544 = vpow2.f32 %v3928_v58  ;;  %v5627_v34 = vpop.f32.mrb[16].mxu0  ;;  %v2192_v49 = vmul.f32 %v4521_v14, %v5527_v32  ;;  %6719 = vst [vmem:[#allocation19_spill] sm:$0xff] %v5655_v2  ;;  %v3937_v14 = vmul.f32 -1.442695, %v5625_v33 }
 0x1b5   : > { %v4525_v20 = vpop.eup %4524  ;;  %4546 = vpow2.f32 %v3927_v10  ;;  %v5629_v37 = vpop.f32.mrb[16].mxu1 }
 0x1b6   : > { %v4527_v24 = vpop.eup %4526  ;;  %4548 = vpow2.f32 %v3929_v12  ;;  %v5638_v44 = vpop.f32.mrb[17].mxu0 }
 0x1b7   : > { %v4529_v39 = vpop.eup %4528  ;;  %v5635_v19 = vmul.f32 %v4527_v24, %v5538_v41  ;;  %v5640_v22 = vpop.f32.mrb[17].mxu1  ;;  %4550 = vpow2.f32 %v3930_v18 }
 0x1b8   : > { %v4531_v29 = vpop.eup %4530  ;;  %v2196_v50 = vmul.f32 %v4529_v39, %v5541_v42  ;;  %v5647_v31 = vpop.f32.mrb[18].mxu0  ;;  %4552 = vpow2.f32 %v3932_v21  ;;  %v3938_v21 = vmul.f32 -1.442695, %v5645_v54 }
 0x1b9   : > { %v5649_v41 = vpop.f32.mrb[18].mxu1  ;;  %v4533_v57 = vpop.eup %4532  ;;  %v2318_v58 = vpack.c.bf16 %v5635_v19, %v5632_v40  ;;  %4554 = vpow2.f32 %v3931_v16  ;;  %v2195_v52 = vmul.f32 %v4531_v29, %v5546_v47  ;;  %v3940_v16 = vmul.f32 -1.442695, %v5655_v2 }
 0x1ba   : > { %v5657_v32 = vpop.f32.mrb[19].mxu0  ;;  %v5659_v42 = vpop.f32.mrb[19].mxu1  ;;  %v2320_v8 = vpack.c.bf16 %v2196_v50, %v2192_v49  ;;  %4556 = vpow2.f32 %v3933_v30  ;;  %v2197_v18 = vmul.f32 %v4533_v57, %v5549_v48  ;;  %v2191_v40 = vmul.f32 %v4523_v17, %v5530_v35 }
 0x1bb   : > { %v5661_v46 = vpop.eup %4534  ;;  %4558 = vpow2.f32 %v3934_v43  ;;  %v2193_v30 = vmul.f32 %v4525_v20, %v5533_v36 }
 0x1bc   : > { %v5664_v10 = vpop.eup %4536  ;;  %4560 = vpow2.f32 %v3936_v0  ;;  %v5677_v19 = vpop.f32.mrb[20].mxu0  ;;  %v2319_v57 = vpack.c.bf16 %v2195_v52, %v2191_v40  ;;  %v5699_v40 = vadd.f32 %v5590_v62, %v5521_v28 }
 0x1bd   : > { %v5667_v12 = vpop.eup %4538  ;;  %4562 = vpow2.f32 %v3935_v9  ;;  %v5679_v49 = vpop.f32.mrb[20].mxu1  ;;  %v2321_v0 = vpack.c.bf16 %v2197_v18, %v2193_v30 }
 0x1be   : > { %v5672_v24 = vpop.eup %4540  ;;  %4564 = vpow2.f32 %v3937_v14  ;;  %v5681_v48 = vpop.f32.mrb[21].mxu0  ;;  %2670 = vmatprep.mubr.bf16.mxu0 %v2319_v57 }
 0x1bf   : > { %v4543_v39 = vpop.eup %4542  ;;  %v5683_v43 = vpop.f32.mrb[21].mxu1  ;;  %4566 = vpow2.f32 %v3938_v21  ;;  %2831 = vmatprep.mubr.bf16.mxu1 %v2321_v0  ;;  %2671 = vmatmul.mubr.bf16.vlgmr.msra.gmra.mrb[64].mxu0 %v2318_v58  ;;  %v5706_v58 = vadd.f32 %v5592_v63, %v5515_v25  ;;  %v5722_v63 = vadd.f32 %v5602_v7, %v5519_v27 }
 0x1c0   : > { %v4545_v47 = vpop.eup %4544  ;;  %v5685_v2 = vpop.f32.mrb[22].mxu0  ;;  %4568 = vpow2.f32 %v3940_v16  ;;  %2832 = vmatmul.mubr.bf16.vlgmr.msra.gmra.mrb[64].mxu1 %v2320_v8  ;;  %v5695_v16 = vadd.f32 %v5584_v53, %v5519_v27  ;;  %v5710_v53 = vadd.f32 %v5600_v6, %v5517_v26 }
 0x1c1   : > { %v4547_v29 = vpop.eup %4546  ;;  %v1820_v50 = vadd.f32 1.0, %v4545_v47  ;;  %v5687_v35 = vpop.f32.mrb[22].mxu1 }
 0x1c2   : > { %v4549_v36 = vpop.eup %4548  ;;  %v1819_v17 = vadd.f32 1.0, %v4547_v29  ;;  %v5689_v20 = vpop.f32.mrb[23].mxu0  ;;  %v5702_v29 = vmul.f32 %v4543_v39, %v5570_v1  ;;  %v5718_v1 = vmul.f32 %v5661_v46, %v5556_v55 }
 0x1c3   : > { %v5691_v9 = vpop.f32.mrb[23].mxu1  ;;  %v4551_v14 = vpop.eup %4550  ;;  %4570 = vrcp.f32 %v1820_v50  ;;  %v1821_v54 = vadd.f32 1.0, %v4549_v36 }
 0x1c4   : > { %v4553_v47 = vpop.eup %4552  ;;  %4572 = vrcp.f32 %v1819_v17  ;;  %v1822_v52 = vadd.f32 1.0, %v4551_v14  ;;  %v5712_v57 = vpop.f32.mrb[24].mxu0  ;;  %v2322_v7 = vpack.c.bf16 %v5702_v29, %v5718_v1  ;;  %v3943_v29 = vmul.f32 -1.442695, %v5722_v63 }
 0x1c5   : > { %v4555_v18 = vpop.eup %4554  ;;  %4574 = vrcp.f32 %v1821_v54  ;;  %v1824_v21 = vadd.f32 1.0, %v4553_v47  ;;  %v5714_v62 = vpop.f32.mrb[24].mxu1  ;;  %v3939_v47 = vmul.f32 -1.442695, %v5695_v16  ;;  %v5749_v1 = vadd.f32 %v5627_v34, %v5515_v25 }
 0x1c6   : > { %v4557_v30 = vpop.eup %4556  ;;  %4576 = vrcp.f32 %v1822_v52  ;;  %v1823_v50 = vadd.f32 1.0, %v4555_v18  ;;  %v5724_v36 = vpop.f32.mrb[25].mxu0  ;;  %v3941_v52 = vmul.f32 -1.442695, %v5699_v40  ;;  %v5764_v34 = vadd.f32 %v5640_v22, %v5521_v28 }
 0x1c7   : > { %v4559_v54 = vpop.eup %4558  ;;  %4578 = vrcp.f32 %v1824_v21  ;;  %v1825_v8 = vadd.f32 1.0, %v4557_v30  ;;  %v5726_v17 = vpop.f32.mrb[25].mxu1  ;;  %v3942_v21 = vmul.f32 -1.442695, %v5706_v58  ;;  %v2201_v22 = vmul.f32 %v5672_v24, %v5565_v60 }
 0x1c8   : > { %v4561_v0 = vpop.eup %4560  ;;  %4580 = vrcp.f32 %v1823_v50  ;;  %v1826_v39 = vadd.f32 1.0, %v4559_v54  ;;  %6720 = vst [vmem:[#allocation20_spill] sm:$0xff] %v5726_v17  ;;  %v5730_v18 = vpop.f32.mrb[26].mxu0  ;;  %6725 = vst [vmem:[#allocation25_spill] sm:$0xff] %v5764_v34  ;;  %v3946_v24 = vmul.f32 -1.442695, %v5749_v1 }
 0x1c9   : > { %v4563_v6 = vpop.eup %4562  ;;  %4582 = vrcp.f32 %v1825_v8  ;;  %v1828_v14 = vadd.f32 1.0, %v4561_v0  ;;  %6721 = vst [vmem:[#allocation21_spill] sm:$0xff] %v5730_v18  ;;  %v5735_v30 = vpop.f32.mrb[26].mxu1  ;;  %v3944_v0 = vmul.f32 -1.442695, %v5710_v53  ;;  %v5742_v18 = vadd.f32 %v5608_v13, %v5521_v28 }
 0x1ca   : > { %v4565_v55 = vpop.eup %4564  ;;  %4584 = vrcp.f32 %v1826_v39  ;;  %v1827_v46 = vadd.f32 1.0, %v4563_v6  ;;  %6722 = vst [vmem:[#allocation22_spill] sm:$0xff] %v5735_v30  ;;  %v5737_v50 = vpop.f32.mrb[27].mxu0  ;;  %v5757_v13 = vadd.f32 %v5638_v44, %v5519_v27  ;;  %v5771_v44 = vadd.f32 %v5647_v31, %v5515_v25 }
 0x1cb   : > { %6723 = vst [vmem:[#allocation23_spill] sm:$0xff] %v5737_v50  ;;  %v4567_v54 = vpop.eup %4566  ;;  %4586 = vrcp.f32 %v1828_v14  ;;  %v1829_v8 = vadd.f32 1.0, %v4565_v55  ;;  %v5744_v39 = vpop.f32.mrb[27].mxu1  ;;  %v5753_v55 = vadd.f32 %v5629_v37, %v5517_v26  ;;  %v2199_v37 = vmul.f32 %v5667_v12, %v5562_v59 }
 0x1cc   : > { %6724 = vst [vmem:[#allocation24_spill] sm:$0xff] %v5744_v39  ;;  %v4569_v6 = vpop.eup %4568  ;;  %4588 = vrcp.f32 %v1827_v46  ;;  %v1830_v17 = vadd.f32 1.0, %v4567_v54  ;;  %v2200_v46 = vmul.f32 %v5664_v10, %v5559_v56  ;;  %v5773_v30 = vpop.f32.mrb[28].mxu0  ;;  %v3945_v31 = vmul.f32 -1.442695, %v5742_v18 }
 0x1cd   : > { %v4571_v50 = vpop.eup %4570  ;;  %4590 = vrcp.f32 %v1829_v8  ;;  %v1832_v14 = vadd.f32 1.0, %v4569_v6  ;;  %v5775_v56 = vpop.f32.mrb[28].mxu1 }
 0x1ce   : > { %v4573_v39 = vpop.eup %4572  ;;  %v2204_v54 = vmul.f32 %v4571_v50, %v5576_v38  ;;  %4592 = vrcp.f32 %v1830_v17  ;;  %v5780_v59 = vpop.f32.mrb[29].mxu0  ;;  %v5787_v50 = vadd.f32 %v5649_v41, %v5517_v26 }
 0x1cf   : > { %v4575_v8 = vpop.eup %4574  ;;  %v2203_v6 = vmul.f32 %v4573_v39, %v5579_v45  ;;  %4594 = vrcp.f32 %v1832_v14  ;;  %v5782_v45 = vpop.f32.mrb[29].mxu1 }
 0x1d0   : > { %v4577_v38 = vpop.eup %4576  ;;  %v2205_v10 = vmul.f32 %v4575_v8, %v5582_v51  ;;  %4596 = vpow2.f32 %v3939_v47  ;;  %v2324_v17 = vpack.c.bf16 %v2204_v54, %v2200_v46  ;;  %v5789_v14 = vpop.f32.mrb[30].mxu0  ;;  %v5796_v47 = vadd.f32 %v5657_v32, %v5519_v27 }
 0x1d1   : > { %v4579_v12 = vpop.eup %4578  ;;  %4598 = vpow2.f32 %v3941_v52  ;;  %v2323_v39 = vpack.c.bf16 %v2203_v6, %v2199_v37  ;;  %v5791_v60 = vpop.f32.mrb[30].mxu1  ;;  %v3948_v8 = vmul.f32 -1.442695, %v5753_v55  ;;  %v3949_v6 = vmul.f32 -1.442695, %v5764_v34 }
 0x1d2   : > { %6726 = vst [vmem:[#allocation26_spill] sm:$0xff] %v5791_v60  ;;  %v4581_v51 = vpop.eup %4580  ;;  %4600 = vpow2.f32 %v3942_v21  ;;  %v2325_v52 = vpack.c.bf16 %v2205_v10, %v2201_v22  ;;  %v5798_v46 = vpop.f32.mrb[31].mxu0  ;;  %v3947_v21 = vmul.f32 -1.442695, %v5757_v13  ;;  %v3950_v60 = vmul.f32 -1.442695, %v5771_v44 }
 0x1d3   : > { %6727 = vst [vmem:[#allocation27_spill] sm:$0xff] %v5798_v46  ;;  %v5800_v54 = vpop.f32.mrb[31].mxu1  ;;  %v4583_v41 = vpop.eup %4582  ;;  %4602 = vpow2.f32 %v3944_v0  ;;  %2678 = vmatprep.mubr.bf16.mxu0 %v2323_v39  ;;  %v2206_v22 = vmul.f32 %v4577_v38, %v5588_v61  ;;  %v3952_v0 = vmul.f32 -1.442695, %v5787_v50  ;;  %v3951_v46 = vmul.f32 -1.442695, %v5796_v47 }
 0x1d4   : > { %6728 = vst [vmem:[#allocation28_spill] sm:$0xff] %v5800_v54  ;;  %v4585_v37 = vpop.eup %4584  ;;  %4604 = vpow2.f32 %v3943_v29  ;;  %2839 = vmatprep.mubr.bf16.mxu1 %v2325_v52  ;;  %2679 = vmatmul.mubr.bf16.gmra.mrb[68].mxu0 %v2322_v7  ;;  %v2208_v29 = vmul.f32 %v4579_v12, %v5595_v4  ;;  %v2207_v7 = vmul.f32 %v4581_v51, %v5598_v5  ;;  %v5816_v38 = vpop.f32.mrb[32].mxu1 }
 0x1d5   : > { %v4587_v32 = vpop.eup %4586  ;;  %v2210_v10 = vmul.f32 %v4585_v37, %v5612_v15  ;;  %4606 = vpow2.f32 %v3945_v31  ;;  %2840 = vmatmul.mubr.bf16.gmra.mrb[68].mxu1 %v2324_v17  ;;  %v5814_v15 = vpop.f32.mrb[32].mxu0  ;;  %v2209_v4 = vmul.f32 %v4583_v41, %v5606_v11 }
 0x1d6   : > { %v4589_v39 = vpop.eup %4588  ;;  %v2212_v54 = vmul.f32 %v4587_v32, %v5618_v23  ;;  %4608 = vpow2.f32 %v3946_v24  ;;  %v5822_v31 = vpop.f32.mrb[33].mxu0 }
 0x1d7   : > { %v4591_v34 = vpop.eup %4590  ;;  %v2211_v52 = vmul.f32 %v4589_v39, %v5622_v3  ;;  %4610 = vpow2.f32 %v3948_v8  ;;  %v2326_v61 = vpack.c.bf16 %v2210_v10, %v2206_v22  ;;  %v5824_v24 = vpop.f32.mrb[33].mxu1 }
 0x1d8   : > { %v5818_v17 = vpop.eup %4592  ;;  %v2213_v23 = vmul.f32 %v4591_v34, %v5625_v33  ;;  %4612 = vpow2.f32 %v3947_v21  ;;  %v2328_v12 = vpack.c.bf16 %v2212_v54, %v2208_v29  ;;  %v5828_v51 = vpop.f32.mrb[34].mxu0 }
 0x1d9   : > { %v5826_v5 = vpop.eup %4594  ;;  %4614 = vpow2.f32 %v3949_v6  ;;  %v2327_v3 = vpack.c.bf16 %v2211_v52, %v2207_v7  ;;  %v5830_v8 = vpop.f32.mrb[34].mxu1  ;;  %v5838_v7 = vadd.f32 %v5659_v42, %v5521_v28 }
 0x1da   : > { %v4597_v37 = vpop.eup %4596  ;;  %4616 = vpow2.f32 %v3950_v60  ;;  %v2329_v32 = vpack.c.bf16 %v2213_v23, %v2209_v4  ;;  %v5832_v11 = vpop.f32.mrb[35].mxu0 }
 0x1db   : > { %v5834_v33 = vpop.f32.mrb[35].mxu1  ;;  %v4599_v34 = vpop.eup %4598  ;;  %v1831_v54 = vadd.f32 1.0, %v4597_v37  ;;  %4618 = vpow2.f32 %v3952_v0  ;;  %2686 = vmatprep.mubr.bf16.mxu0 %v2327_v3 }
 0x1dc   : > { %6729 = vst [vmem:[#allocation29_spill] sm:$0xff] %v5834_v33  ;;  %v4601_v41 = vpop.eup %4600  ;;  %v1833_v21 = vadd.f32 1.0, %v4599_v34  ;;  %4620 = vpow2.f32 %v3951_v46  ;;  %2847 = vmatprep.mubr.bf16.mxu1 %v2329_v32  ;;  %2687 = vmatmul.mubr.bf16.gmra.mrb[72].mxu0 %v2326_v61  ;;  %v5840_v0 = vpop.f32.mrb[36].mxu0  ;;  %v6747_v33 = vld [vmem:[#allocation19_spill] sm:$0xff] }
 0x1dd   : > { %v4603_v6 = vpop.eup %4602  ;;  %4622 = vrcp.f32 %v1831_v54  ;;  %v1834_v22 = vadd.f32 1.0, %v4601_v41  ;;  %2848 = vmatmul.mubr.bf16.gmra.mrb[72].mxu1 %v2328_v12  ;;  %6730 = vst [vmem:[#allocation30_spill] sm:$0xff] %v5840_v0  ;;  %v5842_v52 = vpop.f32.mrb[36].mxu1  ;;  %v5854_v54 = vadd.f32 %v5677_v19, %v5515_v25  ;;  %v5858_v41 = vadd.f32 %v5679_v49, %v5517_v26 }
 0x1de   : > { %v4605_v10 = vpop.eup %4604  ;;  %4624 = vrcp.f32 %v1833_v21  ;;  %v1836_v60 = vadd.f32 1.0, %v4603_v6  ;;  %6731 = vst [vmem:[#allocation31_spill] sm:$0xff] %v5842_v52  ;;  %v5844_v4 = vpop.f32.mrb[37].mxu0  ;;  %v5871_v49 = vadd.f32 %v5683_v43, %v5521_v28 }
 0x1df   : > { %v4607_v39 = vpop.eup %4606  ;;  %4626 = vrcp.f32 %v1834_v22  ;;  %v1835_v29 = vadd.f32 1.0, %v4605_v10  ;;  %6732 = vst [vmem:[#allocation32_spill] sm:$0xff] %v5844_v4  ;;  %v5846_v23 = vpop.f32.mrb[37].mxu1  ;;  %v3953_v10 = vmul.f32 -1.442695, %v5838_v7  ;;  %v6744_v4 = vld [vmem:[#allocation18_spill] sm:$0xff] }
 0x1e0   : > { %v4609_v46 = vpop.eup %4608  ;;  %4628 = vrcp.f32 %v1836_v60  ;;  %v1837_v61 = vadd.f32 1.0, %v4607_v39  ;;  %6733 = vst [vmem:[#allocation33_spill] sm:$0xff] %v5846_v23  ;;  %v5848_v37 = vpop.f32.mrb[38].mxu0  ;;  %v5865_v60 = vadd.f32 %v5681_v48, %v5519_v27  ;;  %v5879_v48 = vadd.f32 %v5687_v35, %v5517_v26 }
 0x1e1   : > { %v4611_v12 = vpop.eup %4610  ;;  %4630 = vrcp.f32 %v1835_v29  ;;  %v1838_v3 = vadd.f32 1.0, %v4609_v46  ;;  %6734 = vst [vmem:[#allocation34_spill] sm:$0xff] %v5848_v37  ;;  %v5850_v32 = vpop.f32.mrb[38].mxu1  ;;  %v5875_v46 = vadd.f32 %v5685_v2, %v5515_v25  ;;  %v3954_v43 = vmul.f32 -1.442695, %v5854_v54 }
 0x1e2   : > { %6735 = vst [vmem:[#allocation35_spill] sm:$0xff] %v5850_v32  ;;  %v4613_v42 = vpop.eup %4612  ;;  %4632 = vrcp.f32 %v1837_v61  ;;  %v1840_v34 = vadd.f32 1.0, %v4611_v12  ;;  %v5860_v21 = vpop.f32.mrb[39].mxu0 }
 0x1e3   : > { %6736 = vst [vmem:[#allocation36_spill] sm:$0xff] %v5860_v21  ;;  %v4615_v6 = vpop.eup %4614  ;;  %4634 = vrcp.f32 %v1838_v3  ;;  %v1839_v22 = vadd.f32 1.0, %v4613_v42  ;;  %v5867_v39 = vpop.f32.mrb[39].mxu1  ;;  %v5883_v3 = vadd.f32 %v5689_v20, %v5519_v27  ;;  %v3957_v20 = vmul.f32 -1.442695, %v5871_v49 }
 0x1e4   : > { %6737 = vst [vmem:[#allocation37_spill] sm:$0xff] %v5867_v39  ;;  %v4617_v29 = vpop.eup %4616  ;;  %4636 = vrcp.f32 %v1840_v34  ;;  %v1841_v19 = vadd.f32 1.0, %v4615_v6  ;;  %v3956_v6 = vmul.f32 -1.442695, %v5858_v41  ;;  %v5890_v35 = vpop.f32.mrb[40].mxu1 }
 0x1e5   : > { %v4619_v61 = vpop.eup %4618  ;;  %4638 = vrcp.f32 %v1839_v22  ;;  %v1842_v12 = vadd.f32 1.0, %v4617_v29  ;;  %v3955_v22 = vmul.f32 -1.442695, %v5865_v60  ;;  %v5888_v29 = vpop.f32.mrb[40].mxu0  ;;  %6739 = vst [vmem:[#allocation39_spill] sm:$0xff] %v5890_v35 }
 0x1e6   : > { %v4621_v42 = vpop.eup %4620  ;;  %4640 = vrcp.f32 %v1841_v19  ;;  %v1844_v34 = vadd.f32 1.0, %v4619_v61  ;;  %6738 = vst [vmem:[#allocation38_spill] sm:$0xff] %v5888_v29  ;;  %v3958_v19 = vmul.f32 -1.442695, %v5875_v46  ;;  %v5896_v61 = vadd.f32 %v5691_v9, %v5521_v28  ;;  %v5898_v32 = vpop.f32.mrb[41].mxu0 }
 0x1e7   : > { %v4623_v2 = vpop.eup %4622  ;;  %4642 = vrcp.f32 %v1842_v12  ;;  %v1843_v39 = vadd.f32 1.0, %v4621_v42  ;;  %6740 = vst [vmem:[#allocation40_spill] sm:$0xff] %v5898_v32  ;;  %v5900_v12 = vpop.f32.mrb[41].mxu1  ;;  %v3960_v29 = vmul.f32 -1.442695, %v5879_v48  ;;  %v2214_v32 = vmul.f32 %v5818_v17, %v6744_v4 }
 0x1e8   : > { %v4625_v21 = vpop.eup %4624  ;;  %4644 = vrcp.f32 %v1844_v34  ;;  %6741 = vst [vmem:[#allocation41_spill] sm:$0xff] %v5900_v12  ;;  %v3959_v35 = vmul.f32 -1.442695, %v5883_v3  ;;  %v5906_v34 = vadd.f32 %v5712_v57, %v5515_v25  ;;  %v5908_v37 = vpop.f32.mrb[42].mxu0  ;;  %v5928_v17 = vadd.f32 %v5724_v36, %v5519_v27  ;;  %v6748_v36 = vld [vmem:[#allocation20_spill] sm:$0xff] }
 0x1e9   : > { %v4627_v42 = vpop.eup %4626  ;;  %4646 = vrcp.f32 %v1843_v39  ;;  %6742 = vst [vmem:[#allocation42_spill] sm:$0xff] %v5908_v37  ;;  %v5910_v23 = vpop.f32.mrb[42].mxu1  ;;  %v5917_v39 = vadd.f32 %v5714_v62, %v5517_v26  ;;  %v2216_v37 = vmul.f32 %v5826_v5, %v6747_v33  ;;  %v2215_v4 = vmul.f32 %v4623_v2, %v5695_v16 }
 0x1ea   : > { %6743 = vst [vmem:[#allocation43_spill] sm:$0xff] %v5910_v23  ;;  %v4629_v9 = vpop.eup %4628  ;;  %v2218_v12 = vmul.f32 %v4627_v42, %v5706_v58  ;;  %4648 = vpow2.f32 %v3953_v10  ;;  %v5919_v52 = vpop.f32.mrb[43].mxu0  ;;  %v3961_v33 = vmul.f32 -1.442695, %v5896_v61 }
 0x1eb   : > { %6745 = vst [vmem:[#allocation18_spill] sm:$0xff] %v5919_v52  ;;  %v5921_v0 = vpop.f32.mrb[43].mxu1  ;;  %v4631_v57 = vpop.eup %4630  ;;  %v2220_v23 = vmul.f32 %v4629_v9, %v5710_v53  ;;  %4650 = vpow2.f32 %v3954_v43  ;;  %v5937_v43 = vadd.f32 %v6748_v36, %v5521_v28 }
 0x1ec   : > { %6746 = vst [vmem:[#allocation44_spill] sm:$0xff] %v5921_v0  ;;  %v4633_v58 = vpop.eup %4632  ;;  %v2219_v62 = vmul.f32 %v4631_v57, %v5722_v63  ;;  %4652 = vpow2.f32 %v3956_v6  ;;  %v2330_v10 = vpack.c.bf16 %v2218_v12, %v2214_v32  ;;  %v2217_v0 = vmul.f32 %v4625_v21, %v5699_v40  ;;  %v5940_v6 = vpop.f32.mrb[44].mxu0 }
 0x1ed   : > { %v4635_v42 = vpop.eup %4634  ;;  %v2221_v52 = vmul.f32 %v4633_v58, %v5742_v18  ;;  %4654 = vpow2.f32 %v3955_v22  ;;  %v2332_v5 = vpack.c.bf16 %v2220_v23, %v2216_v37  ;;  %v3962_v63 = vmul.f32 -1.442695, %v5906_v34  ;;  %v5942_v40 = vpop.f32.mrb[44].mxu1 }
 0x1ee   : > { %v4637_v53 = vpop.eup %4636  ;;  %4656 = vpow2.f32 %v3957_v20  ;;  %v2331_v16 = vpack.c.bf16 %v2219_v62, %v2215_v4  ;;  %v3964_v23 = vmul.f32 -1.442695, %v5917_v39  ;;  %v5947_v37 = vpop.f32.mrb[45].mxu0  ;;  %v3963_v20 = vmul.f32 -1.442695, %v5928_v17 }
 0x1ef   : > { %v4639_v2 = vpop.eup %4638  ;;  %4658 = vpow2.f32 %v3958_v19  ;;  %v2333_v32 = vpack.c.bf16 %v2221_v52, %v2217_v0  ;;  %v5949_v21 = vpop.f32.mrb[45].mxu1  ;;  %v3965_v9 = vmul.f32 -1.442695, %v5937_v43  ;;  %v5964_v4 = vmul.f32 %v4637_v53, %v5753_v55 }
 0x1f0   : > { %v5944_v18 = vpop.eup %4640  ;;  %4660 = vpow2.f32 %v3960_v29  ;;  %2694 = vmatprep.mubr.bf16.mxu0 %v2331_v16  ;;  %v5952_v0 = vpop.f32.mrb[46].mxu0  ;;  %v2222_v29 = vmul.f32 %v4635_v42, %v5749_v1  ;;  %v2223_v1 = vmul.f32 %v4639_v2, %v5757_v13 }
 0x1f1   : > { %v4643_v22 = vpop.eup %4642  ;;  %4662 = vpow2.f32 %v3959_v35  ;;  %2855 = vmatprep.mubr.bf16.mxu1 %v2333_v32  ;;  %2695 = vmatmul.mubr.bf16.gmra.mrb[76].mxu0 %v2330_v10  ;;  %v5954_v52 = vpop.f32.mrb[46].mxu1 }
 0x1f2   : > { %v4645_v19 = vpop.eup %4644  ;;  %v2226_v12 = vmul.f32 %v4643_v22, %v5771_v44  ;;  %4664 = vpow2.f32 %v3961_v33  ;;  %2856 = vmatmul.mubr.bf16.gmra.mrb[76].mxu1 %v2332_v5  ;;  %v5959_v57 = vpop.f32.mrb[47].mxu0 }
 0x1f3   : > { %6749 = vst [vmem:[#allocation19_spill] sm:$0xff] %v5959_v57  ;;  %v5961_v35 = vpop.f32.mrb[47].mxu1  ;;  %v4647_v58 = vpop.eup %4646  ;;  %v5967_v62 = vmul.f32 %v4645_v19, %v5787_v50  ;;  %4666 = vpow2.f32 %v3962_v63 }
 0x1f4   : > { %6750 = vst [vmem:[#allocation20_spill] sm:$0xff] %v5961_v35  ;;  %v4649_v10 = vpop.eup %4648  ;;  %v2227_v44 = vmul.f32 %v4647_v58, %v5796_v47  ;;  %4668 = vpow2.f32 %v3964_v23  ;;  %v2334_v42 = vpack.c.bf16 %v2226_v12, %v2222_v29  ;;  %v5973_v32 = vpop.f32.mrb[48].mxu0  ;;  %v6755_v29 = vld [vmem:[#allocation21_spill] sm:$0xff] }
 0x1f5   : > { %v4651_v5 = vpop.eup %4650  ;;  %v1845_v33 = vadd.f32 1.0, %v4649_v10  ;;  %4670 = vpow2.f32 %v3963_v20  ;;  %6751 = vst [vmem:[#allocation45_spill] sm:$0xff] %v5973_v32  ;;  %v5975_v13 = vpop.f32.mrb[48].mxu1  ;;  %v5983_v12 = vadd.f32 %v6755_v29, %v5515_v25 }
 0x1f6   : > { %v4653_v16 = vpop.eup %4652  ;;  %v1846_v55 = vadd.f32 1.0, %v4651_v5  ;;  %4672 = vpow2.f32 %v3965_v9  ;;  %v2335_v53 = vpack.c.bf16 %v2227_v44, %v2223_v1  ;;  %6752 = vst [vmem:[#allocation46_spill] sm:$0xff] %v5975_v13  ;;  %v5977_v23 = vpop.f32.mrb[49].mxu0  ;;  %v6757_v1 = vld [vmem:[#allocation22_spill] sm:$0xff]  ;;  %v6758_v5 = vld [vmem:[#allocation23_spill] sm:$0xff]  ;;  %v6774_v13 = vld [vmem:[#allocation28_spill] sm:$0xff] }
 0x1f7   : > { %v4655_v50 = vpop.eup %4654  ;;  %4674 = vrcp.f32 %v1845_v33  ;;  %v1848_v63 = vadd.f32 1.0, %v4653_v16  ;;  %6753 = vst [vmem:[#allocation47_spill] sm:$0xff] %v5977_v23  ;;  %v5979_v22 = vpop.f32.mrb[49].mxu1  ;;  %v5989_v44 = vadd.f32 %v6757_v1, %v5517_v26  ;;  %v5993_v33 = vadd.f32 %v6758_v5, %v5519_v27 }
 0x1f8   : > { %v4657_v47 = vpop.eup %4656  ;;  %4676 = vrcp.f32 %v1846_v55  ;;  %v1847_v2 = vadd.f32 1.0, %v4655_v50  ;;  %2702 = vmatprep.mubr.bf16.mxu0 %v2335_v53  ;;  %6754 = vst [vmem:[#allocation48_spill] sm:$0xff] %v5979_v22  ;;  %v5985_v9 = vpop.f32.mrb[50].mxu0  ;;  %v3966_v29 = vmul.f32 -1.442695, %v5983_v12  ;;  %v6064_v32 = vadd.f32 %v6774_v13, %v5521_v28 }
 0x1f9   : > { %v4659_v20 = vpop.eup %4658  ;;  %4678 = vrcp.f32 %v1848_v63  ;;  %v1849_v19 = vadd.f32 1.0, %v4657_v47  ;;  %2703 = vmatmul.mubr.bf16.gmra.mrb[80].mxu0 %v2334_v42  ;;  %6756 = vst [vmem:[#allocation21_spill] sm:$0xff] %v5985_v9  ;;  %v5995_v16 = vpop.f32.mrb[50].mxu1  ;;  %v3968_v36 = vmul.f32 -1.442695, %v5989_v44 }
 0x1fa   : > { %v4661_v58 = vpop.eup %4660  ;;  %4680 = vrcp.f32 %v1847_v2  ;;  %v1850_v10 = vadd.f32 1.0, %v4659_v20  ;;  %6759 = vst [vmem:[#allocation22_spill] sm:$0xff] %v5995_v16  ;;  %v5997_v50 = vpop.f32.mrb[51].mxu0 }
 0x1fb   : > { %v4663_v55 = vpop.eup %4662  ;;  %4682 = vrcp.f32 %v1849_v19  ;;  %v1852_v53 = vadd.f32 1.0, %v4661_v58  ;;  %6760 = vst [vmem:[#allocation23_spill] sm:$0xff] %v5997_v50  ;;  %v5999_v42 = vpop.f32.mrb[51].mxu1  ;;  %v3967_v19 = vmul.f32 -1.442695, %v5993_v33 }
 0x1fc   : > { %6761 = vst [vmem:[#allocation49_spill] sm:$0xff] %v5999_v42  ;;  %v4665_v63 = vpop.eup %4664  ;;  %4684 = vrcp.f32 %v1850_v10  ;;  %v1851_v47 = vadd.f32 1.0, %v4663_v55  ;;  %v6762_v42 = vld [vmem:[#allocation24_spill] sm:$0xff]  ;;  %v6010_v10 = vadd.f32 %v5773_v30, %v5515_v25  ;;  %v6012_v55 = vpop.f32.mrb[52].mxu0 }
 0x1fd   : > { %v4667_v2 = vpop.eup %4666  ;;  %4686 = vrcp.f32 %v1852_v53  ;;  %v1853_v20 = vadd.f32 1.0, %v4665_v63  ;;  %v6006_v16 = vadd.f32 %v6762_v42, %v5521_v28  ;;  %6763 = vst [vmem:[#allocation24_spill] sm:$0xff] %v6012_v55  ;;  %v6014_v53 = vpop.f32.mrb[52].mxu1 }
 0x1fe   : > { %v4669_v1 = vpop.eup %4668  ;;  %4688 = vrcp.f32 %v1851_v47  ;;  %v1854_v5 = vadd.f32 1.0, %v4667_v2  ;;  %6764 = vst [vmem:[#allocation50_spill] sm:$0xff] %v6014_v53  ;;  %v6018_v2 = vadd.f32 %v5775_v56, %v5517_v26  ;;  %v6024_v42 = vpop.f32.mrb[53].mxu0  ;;  %v6030_v53 = vadd.f32 %v5782_v45, %v5521_v28 }
 0x1ff   : > { %v4671_v58 = vpop.eup %4670  ;;  %4690 = vrcp.f32 %v1853_v20  ;;  %v1856_v50 = vadd.f32 1.0, %v4669_v1  ;;  %v6022_v20 = vadd.f32 %v5780_v59, %v5519_v27  ;;  %6765 = vst [vmem:[#allocation51_spill] sm:$0xff] %v6024_v42  ;;  %v6026_v1 = vpop.f32.mrb[53].mxu1  ;;  %v6768_v59 = vld [vmem:[#allocation25_spill] sm:$0xff] }
 0x200   : > { %v4673_v63 = vpop.eup %4672  ;;  %4692 = vrcp.f32 %v1854_v5  ;;  %v1855_v47 = vadd.f32 1.0, %v4671_v58  ;;  %6766 = vst [vmem:[#allocation52_spill] sm:$0xff] %v6026_v1  ;;  %v6034_v5 = vadd.f32 %v5789_v14, %v5515_v25  ;;  %v6036_v56 = vpop.f32.mrb[54].mxu0  ;;  %v2225_v9 = vmul.f32 %v5944_v18, %v6768_v59 }
 0x201   : > { %v4675_v30 = vpop.eup %4674  ;;  %4694 = vrcp.f32 %v1856_v50  ;;  %v1857_v55 = vadd.f32 1.0, %v4673_v63  ;;  %6767 = vst [vmem:[#allocation53_spill] sm:$0xff] %v6036_v56  ;;  %v6769_v50 = vld [vmem:[#allocation26_spill] sm:$0xff]  ;;  %v6045_v1 = vpop.f32.mrb[54].mxu1  ;;  %v3969_v14 = vmul.f32 -1.442695, %v6006_v16 }
 0x202   : > { %v4677_v58 = vpop.eup %4676  ;;  %v2229_v42 = vmul.f32 %v4675_v30, %v5838_v7  ;;  %4696 = vrcp.f32 %v1855_v47  ;;  %v6043_v63 = vadd.f32 %v6769_v50, %v5517_v26  ;;  %6770 = vst [vmem:[#allocation25_spill] sm:$0xff] %v6045_v1  ;;  %v6047_v45 = vpop.f32.mrb[55].mxu0  ;;  %v3970_v18 = vmul.f32 -1.442695, %v6010_v10  ;;  %v6773_v7 = vld [vmem:[#allocation27_spill] sm:$0xff] }
 0x203   : > { %6771 = vst [vmem:[#allocation26_spill] sm:$0xff] %v6047_v45  ;;  %v4679_v22 = vpop.eup %4678  ;;  %4698 = vrcp.f32 %v1857_v55  ;;  %v6050_v56 = vpop.f32.mrb[55].mxu1  ;;  %v6055_v47 = vadd.f32 %v6773_v7, %v5519_v27  ;;  %v3972_v50 = vmul.f32 -1.442695, %v6018_v2  ;;  %v3971_v45 = vmul.f32 -1.442695, %v6022_v20 }
 0x204   : > { %6772 = vst [vmem:[#allocation54_spill] sm:$0xff] %v6050_v56  ;;  %v4681_v23 = vpop.eup %4680  ;;  %4700 = vpow2.f32 %v3966_v29  ;;  %v2337_v30 = vpack.c.bf16 %v2229_v42, %v2225_v9  ;;  %v3973_v55 = vmul.f32 -1.442695, %v6030_v53  ;;  %v3974_v56 = vmul.f32 -1.442695, %v6034_v5  ;;  %v6075_v35 = vpop.f32.mrb[56].mxu0 }
 0x205   : > { %v4683_v59 = vpop.eup %4682  ;;  %4702 = vpow2.f32 %v3968_v36  ;;  %v3976_v29 = vmul.f32 -1.442695, %v6043_v63  ;;  %v2230_v36 = vmul.f32 %v4677_v58, %v5854_v54  ;;  %v6070_v7 = vadd.f32 %v5814_v15, %v5515_v25  ;;  %v6077_v57 = vpop.f32.mrb[56].mxu1 }
 0x206   : > { %v4685_v1 = vpop.eup %4684  ;;  %4704 = vpow2.f32 %v3967_v19  ;;  %2863 = vmatprep.mubr.bf16.mxu1 %v2337_v30  ;;  %v6775_v19 = vpack.c.bf16 %v5967_v62, %v5964_v4  ;;  %6776 = vst [vmem:[#allocation27_spill] sm:$0xff] %v6077_v57  ;;  %v2232_v30 = vmul.f32 %v4679_v22, %v5858_v41  ;;  %v6084_v15 = vpop.f32.mrb[57].mxu1  ;;  %v2231_v4 = vmul.f32 %v4681_v23, %v5865_v60 }
 0x207   : > { %v4687_v9 = vpop.eup %4686  ;;  %v2234_v42 = vmul.f32 %v4685_v1, %v5875_v46  ;;  %4706 = vpow2.f32 %v3969_v14  ;;  %v3975_v46 = vmul.f32 -1.442695, %v6055_v47  ;;  %v6082_v1 = vpop.f32.mrb[57].mxu0  ;;  %v3977_v23 = vmul.f32 -1.442695, %v6064_v32 }
 0x208   : > { %2864 = vmatmul.mubr.bf16.gmra.mrb[80].mxu1 %v6775_v19  ;;  %v4689_v13 = vpop.eup %4688  ;;  %v2236_v54 = vmul.f32 %v4687_v9, %v5879_v48  ;;  %4708 = vpow2.f32 %v3970_v18  ;;  %v6088_v19 = vpop.f32.mrb[58].mxu0  ;;  %v2233_v48 = vmul.f32 %v4683_v59, %v5871_v49  ;;  %v3978_v49 = vmul.f32 -1.442695, %v6070_v7 }
 0x209   : > { %v4691_v58 = vpop.eup %4690  ;;  %v2235_v62 = vmul.f32 %v4689_v13, %v5883_v3  ;;  %4710 = vpow2.f32 %v3972_v50  ;;  %v2338_v14 = vpack.c.bf16 %v2234_v42, %v2230_v36  ;;  %v6090_v57 = vpop.f32.mrb[58].mxu1 }
 0x20a   : > { %6777 = vst [vmem:[#allocation28_spill] sm:$0xff] %v6090_v57  ;;  %v6092_v41 = vpop.eup %4692  ;;  %v2237_v22 = vmul.f32 %v4691_v58, %v5896_v61  ;;  %4712 = vpow2.f32 %v3971_v45  ;;  %v2340_v18 = vpack.c.bf16 %v2236_v54, %v2232_v30  ;;  %v6096_v9 = vpop.f32.mrb[59].mxu0  ;;  %v2960_v45 = vld [vmem:[%s5395_s23] sm:$0xff]  ;;  %v2967_v57 = vld [vmem:[%s5395_s23 + $0x38] sm:$0xff] }
 0x20b   : > { %6778 = vst [vmem:[#allocation55_spill] sm:$0xff] %v6096_v9  ;;  %v6098_v60 = vpop.f32.mrb[59].mxu1  ;;  %v6100_v3 = vpop.eup %4694  ;;  %4714 = vpow2.f32 %v3973_v55  ;;  %v2339_v50 = vpack.c.bf16 %v2235_v62, %v2231_v4  ;;  %3068 = vperm.xlu0 %4394, %v2960_v45  }
 0x20c   : > { %6779 = vst [vmem:[#allocation56_spill] sm:$0xff] %v6098_v60  ;;  %v6103_v36 = vpop.eup %4696  ;;  %4716 = vpow2.f32 %v3974_v56  ;;  %v2341_v59 = vpack.c.bf16 %v2237_v22, %v2233_v48  ;;  %v6109_v30 = vpop.f32.mrb[60].mxu0  ;;  %v2962_v48 = vld [vmem:[%s5395_s23 + $0x10] sm:$0xff]  ;;  %v2961_v22 = vld [vmem:[%s5395_s23 + $0x8] sm:$0xff] }
 0x20d   : > { %v6106_v61 = vpop.eup %4698  ;;  %4718 = vpow2.f32 %v3976_v29  ;;  %2710 = vmatprep.mubr.bf16.mxu0 %v2339_v50  ;;  %6780 = vst [vmem:[#allocation57_spill] sm:$0xff] %v6109_v30  ;;  %v6111_v58 = vpop.f32.mrb[60].mxu1  ;;  %3078 = vperm.xlu1 %4395, %v2962_v48  }
 0x20e   : > { %v4701_v42 = vpop.eup %4700  ;;  %4720 = vpow2.f32 %v3975_v46  ;;  %2871 = vmatprep.mubr.bf16.mxu1 %v2341_v59  ;;  %2711 = vmatmul.mubr.bf16.gmra.mrb[84].mxu0 %v2338_v14  ;;  %6781 = vst [vmem:[#allocation58_spill] sm:$0xff] %v6111_v58  ;;  %v6113_v29 = vpop.f32.mrb[61].mxu0  ;;  %v6790_v58 = vld [vmem:[#allocation31_spill] sm:$0xff] }
 0x20f   : > { %v4703_v13 = vpop.eup %4702  ;;  %v1858_v55 = vadd.f32 1.0, %v4701_v42  ;;  %4722 = vpow2.f32 %v3977_v23  ;;  %6782 = vst [vmem:[#allocation59_spill] sm:$0xff] %v6113_v29  ;;  %v6115_v62 = vpop.f32.mrb[61].mxu1  ;;  %v6127_v42 = vadd.f32 %v5816_v38, %v5517_v26  ;;  %3073 = vperm.xlu0 %4394, %v2961_v22   ;;  %v6141_v38 = vadd.f32 %v5828_v51, %v5515_v25 }
 0x210   : > { %2872 = vmatmul.mubr.bf16.gmra.mrb[84].mxu1 %v2340_v18  ;;  %v4705_v56 = vpop.eup %4704  ;;  %v1860_v54 = vadd.f32 1.0, %v4703_v13  ;;  %4724 = vpow2.f32 %v3978_v49  ;;  %6783 = vst [vmem:[#allocation60_spill] sm:$0xff] %v6115_v62  ;;  %v6117_v14 = vpop.f32.mrb[62].mxu0  ;;  %v6151_v51 = vadd.f32 %v5832_v11, %v5519_v27  ;;  %v6170_v30 = vadd.f32 %v6790_v58, %v5517_v26  ;;  %v6792_v58 = vld [vmem:[#allocation33_spill] sm:$0xff] }
 0x211   : > { %v4707_v4 = vpop.eup %4706  ;;  %4726 = vrcp.f32 %v1858_v55  ;;  %v1859_v46 = vadd.f32 1.0, %v4705_v56  ;;  %6784 = vst [vmem:[#allocation61_spill] sm:$0xff] %v6117_v14  ;;  %v6121_v50 = vpop.f32.mrb[62].mxu1  ;;  %v2964_v14 = vld [vmem:[%s5395_s23 + $0x20] sm:$0xff]  ;;  %v6184_v9 = vadd.f32 %v6792_v58, %v5521_v28 }
 0x212   : > { %v4709_v18 = vpop.eup %4708  ;;  %4728 = vrcp.f32 %v1860_v54  ;;  %v1861_v23 = vadd.f32 1.0, %v4707_v4  ;;  %6785 = vst [vmem:[#allocation62_spill] sm:$0xff] %v6121_v50  ;;  %v6123_v59 = vpop.f32.mrb[63].mxu0  ;;  %v6133_v54 = vadd.f32 %v5822_v31, %v5519_v27  ;;  %v6137_v4 = vadd.f32 %v5824_v24, %v5521_v28  ;;  %v2965_v50 = vld [vmem:[%s5395_s23 + $0x28] sm:$0xff] }
 0x213   : > { %6786 = vst [vmem:[#allocation63_spill] sm:$0xff] %v6123_v59  ;;  %v4711_v49 = vpop.eup %4710  ;;  %4730 = vrcp.f32 %v1859_v46  ;;  %v1862_v45 = vadd.f32 1.0, %v4709_v18  ;;  %v6129_v13 = vpop.f32.mrb[63].mxu1  ;;  %v2963_v18 = vld [vmem:[%s5395_s23 + $0x18] sm:$0xff]  ;;  %v3982_v59 = vmul.f32 -1.442695, %v6141_v38  ;;  %3088 = vperm.xlu0 %4394, %v2964_v14  }
 0x214   : > { %6787 = vst [vmem:[#allocation64_spill] sm:$0xff] %v6129_v13  ;;  %v4713_v55 = vpop.eup %4712  ;;  %4732 = vrcp.f32 %v1861_v23  ;;  %v1864_v56 = vadd.f32 1.0, %v4711_v49  ;;  %v6146_v49 = vadd.f32 %v5830_v8, %v5517_v26  ;;  %3083 = vperm.xlu1 %4395, %v2963_v18   ;;  %v3981_v8 = vmul.f32 -1.442695, %v6137_v4  ;;  %v6791_v14 = vld [vmem:[#allocation32_spill] sm:$0xff] }
 0x215   : > { %v4715_v46 = vpop.eup %4714  ;;  %4734 = vrcp.f32 %v1862_v45  ;;  %v1863_v48 = vadd.f32 1.0, %v4713_v55  ;;  %v3980_v45 = vmul.f32 -1.442695, %v6127_v42 }
 0x216   : > { %v4717_v22 = vpop.eup %4716  ;;  %4736 = vrcp.f32 %v1864_v56  ;;  %v1865_v23 = vadd.f32 1.0, %v4715_v46  ;;  %v3979_v46 = vmul.f32 -1.442695, %v6133_v54 }
 0x217   : > { %v4719_v31 = vpop.eup %4718  ;;  %4738 = vrcp.f32 %v1863_v48  ;;  %v1866_v24 = vadd.f32 1.0, %v4717_v22  ;;  %v6788_v48 = vld [vmem:[#allocation29_spill] sm:$0xff] }
 0x218   : > { %v4721_v55 = vpop.eup %4720  ;;  %4740 = vrcp.f32 %v1865_v23  ;;  %v1868_v56 = vadd.f32 1.0, %v4719_v31  ;;  %v6158_v22 = vadd.f32 %v6788_v48, %v5521_v28  ;;  %v3984_v23 = vmul.f32 -1.442695, %v6146_v49  ;;  %v6789_v31 = vld [vmem:[#allocation30_spill] sm:$0xff]  ;;  %3093 = vperm.xlu1 %4395, %v2965_v50  }
 0x219   : > { %v4723_v13 = vpop.eup %4722  ;;  %4742 = vrcp.f32 %v1866_v24  ;;  %v1867_v18 = vadd.f32 1.0, %v4721_v55  ;;  %v6165_v29 = vadd.f32 %v6789_v31, %v5515_v25  ;;  %v3983_v48 = vmul.f32 -1.442695, %v6151_v51 }
 0x21a   : > { %v4725_v11 = vpop.eup %4724  ;;  %4744 = vrcp.f32 %v1868_v56  ;;  %v1869_v62 = vadd.f32 1.0, %v4723_v13  ;;  %v2238_v56 = vmul.f32 %v6092_v41, %v5906_v34  ;;  %v6177_v50 = vadd.f32 %v6791_v14, %v5519_v27  ;;  %v2966_v34 = vld [vmem:[%s5395_s23 + $0x30] sm:$0xff] }
 0x21b   : > { %v4727_v24 = vpop.eup %4726  ;;  %4746 = vrcp.f32 %v1867_v18  ;;  %v1870_v55 = vadd.f32 1.0, %v4725_v11  ;;  %v2240_v18 = vmul.f32 %v6100_v3, %v5917_v39  ;;  %3098 = vperm.xlu0 %4394, %v2966_v34  }
 0x21c   : > { %v4729_v13 = vpop.eup %4728  ;;  %v2242_v31 = vmul.f32 %v4727_v24, %v5983_v12  ;;  %4748 = vrcp.f32 %v1869_v62  ;;  %v2239_v12 = vmul.f32 %v6103_v36, %v5928_v17  ;;  %3103 = vperm.xlu1 %4395, %v2967_v57   ;;  %v3985_v17 = vmul.f32 -1.442695, %v6158_v22 }
 0x21d   : > { %v4731_v60 = vpop.eup %4730  ;;  %v2244_v11 = vmul.f32 %v4729_v13, %v5989_v44  ;;  %4750 = vrcp.f32 %v1870_v55  ;;  %v2241_v44 = vmul.f32 %v6106_v61, %v5937_v43  ;;  %v2969_v61 = vld [vmem:[%s5395_s23 + $0x48] sm:$0xff] }
 0x21e   : > { %v4733_v41 = vpop.eup %4732  ;;  %v2243_v62 = vmul.f32 %v4731_v60, %v5993_v33  ;;  %4752 = vpow2.f32 %v3980_v45  ;;  %v2342_v24 = vpack.c.bf16 %v2242_v31, %v2238_v56  ;;  %v6793_v33 = vld [vmem:[#allocation34_spill] sm:$0xff]  ;;  %v3986_v45 = vmul.f32 -1.442695, %v6165_v29  ;;  %v6794_v56 = vld [vmem:[#allocation35_spill] sm:$0xff] }
 0x21f   : > { %v4735_v39 = vpop.eup %4734  ;;  %v2245_v3 = vmul.f32 %v4733_v41, %v6006_v16  ;;  %4754 = vpow2.f32 %v3979_v46  ;;  %v2344_v55 = vpack.c.bf16 %v2244_v11, %v2240_v18  ;;  %v6197_v60 = vadd.f32 %v6793_v33, %v5515_v25  ;;  %v2968_v46 = vld [vmem:[%s5395_s23 + $0x40] sm:$0xff] }
 0x220   : > { %v4737_v13 = vpop.eup %4736  ;;  %4756 = vpow2.f32 %v3981_v8  ;;  %v2343_v57 = vpack.c.bf16 %v2243_v62, %v2239_v12  ;;  %v6202_v43 = vadd.f32 %v6794_v56, %v5517_v26  ;;  %v3988_v8 = vmul.f32 -1.442695, %v6170_v30  ;;  %3113 = vperm.xlu1 %4395, %v2969_v61   ;;  %3108 = vperm.xlu0 %4394, %v2968_v46  }
 0x221   : > { %v4739_v36 = vpop.eup %4738  ;;  %4758 = vpow2.f32 %v3982_v59  ;;  %v2345_v16 = vpack.c.bf16 %v2245_v3, %v2241_v44  ;;  %v3987_v18 = vmul.f32 -1.442695, %v6177_v50  ;;  %v3989_v59 = vmul.f32 -1.442695, %v6184_v9  ;;  %v2971_v44 = vld [vmem:[%s5395_s23 + $0x58] sm:$0xff] }
 0x222   : > { %v4741_v31 = vpop.eup %4740  ;;  %4760 = vpow2.f32 %v3984_v23  ;;  %2718 = vmatprep.mubr.bf16.mxu0 %v2343_v57  ;;  %v2246_v58 = vmul.f32 %v4735_v39, %v6010_v10  ;;  %v3990_v23 = vmul.f32 -1.442695, %v6197_v60  ;;  %v3992_v62 = vmul.f32 -1.442695, %v6202_v43  ;;  %v2973_v57 = vld [vmem:[%s5395_s23 + $0x68] sm:$0xff] }
 0x223   : > { %v4743_v14 = vpop.eup %4742  ;;  %4762 = vpow2.f32 %v3983_v48  ;;  %2879 = vmatprep.mubr.bf16.mxu1 %v2345_v16  ;;  %2719 = vmatmul.mubr.bf16.gmra.mrb[88].mxu0 %v2342_v24  ;;  %v2248_v48 = vmul.f32 %v4737_v13, %v6018_v2  ;;  %v2970_v24 = vld [vmem:[%s5395_s23 + $0x50] sm:$0xff]  ;;  %v2247_v10 = vmul.f32 %v4739_v36, %v6022_v20  ;;  %v2249_v2 = vmul.f32 %v4741_v31, %v6030_v53 }
 0x224   : > { %v4745_v11 = vpop.eup %4744  ;;  %v2250_v34 = vmul.f32 %v4743_v14, %v6034_v5  ;;  %4764 = vpow2.f32 %v3985_v17  ;;  %2880 = vmatmul.mubr.bf16.gmra.mrb[88].mxu1 %v2344_v55  ;;  %3123 = vperm.xlu1 %4395, %v2971_v44   ;;  %v6795_v31 = vld [vmem:[#allocation36_spill] sm:$0xff] }
 0x225   : > { %v4747_v41 = vpop.eup %4746  ;;  %v2252_v12 = vmul.f32 %v4745_v11, %v6043_v63  ;;  %4766 = vpow2.f32 %v3986_v45  ;;  %3118 = vperm.xlu0 %4394, %v2970_v24   ;;  %v2972_v45 = vld [vmem:[%s5395_s23 + $0x60] sm:$0xff]  ;;  %v2974_v11 = vld [vmem:[%s5395_s23 + $0x70] sm:$0xff] }
 0x226   : > { %v4749_v3 = vpop.eup %4748  ;;  %v2251_v5 = vmul.f32 %v4747_v41, %v6055_v47  ;;  %4768 = vpow2.f32 %v3988_v8  ;;  %v2346_v39 = vpack.c.bf16 %v2250_v34, %v2246_v58  ;;  %v6227_v8 = vadd.f32 %v6795_v31, %v5519_v27 }
 0x227   : > { %v6219_v55 = vpop.eup %4750  ;;  %v2253_v63 = vmul.f32 %v4749_v3, %v6064_v32  ;;  %4770 = vpow2.f32 %v3987_v18  ;;  %v2348_v13 = vpack.c.bf16 %v2252_v12, %v2248_v48  ;;  %v2977_v48 = vld [vmem:[%s5395_s23 + $0x88] sm:$0xff] }
 0x228   : > { %v4753_v17 = vpop.eup %4752  ;;  %4772 = vpow2.f32 %v3989_v59  ;;  %v2347_v33 = vpack.c.bf16 %v2251_v5, %v2247_v10  ;;  %3133 = vperm.xlu1 %4395, %v2973_v57   ;;  %v2975_v59 = vld [vmem:[%s5395_s23 + $0x78] sm:$0xff]  ;;  %v3991_v44 = vmul.f32 -1.442695, %v6227_v8 }
 0x229   : > { %v4755_v20 = vpop.eup %4754  ;;  %v1872_v36 = vadd.f32 1.0, %v4753_v17  ;;  %4774 = vpow2.f32 %v3990_v23  ;;  %v2349_v47 = vpack.c.bf16 %v2253_v63, %v2249_v2  ;;  %3128 = vperm.xlu0 %4394, %v2972_v45   ;;  %v6796_v10 = vld [vmem:[#allocation37_spill] sm:$0xff]  ;;  %v2976_v63 = vld [vmem:[%s5395_s23 + $0x80] sm:$0xff] }
 0x22a   : > { %v4757_v56 = vpop.eup %4756  ;;  %v1871_v16 = vadd.f32 1.0, %v4755_v20  ;;  %4776 = vpow2.f32 %v3992_v62  ;;  %2726 = vmatprep.mubr.bf16.mxu0 %v2347_v33  ;;  %v6235_v5 = vadd.f32 %v6796_v10, %v5521_v28  ;;  %v6798_v33 = vld [vmem:[#allocation39_spill] sm:$0xff]  ;;  %v6799_v20 = vld [vmem:[#allocation40_spill] sm:$0xff] }
 0x22b   : > { %v4759_v32 = vpop.eup %4758  ;;  %4778 = vrcp.f32 %v1872_v36  ;;  %v1873_v53 = vadd.f32 1.0, %v4757_v56  ;;  %2887 = vmatprep.mubr.bf16.mxu1 %v2349_v47  ;;  %2727 = vmatmul.mubr.bf16.gmra.mrb[92].mxu0 %v2346_v39  ;;  %v6797_v39 = vld [vmem:[#allocation38_spill] sm:$0xff]  ;;  %v6244_v57 = vadd.f32 %v6798_v33, %v5517_v26  ;;  %v6248_v36 = vadd.f32 %v6799_v20, %v5519_v27  ;;  %v6800_v56 = vld [vmem:[#allocation41_spill] sm:$0xff] }
 0x22c   : > { %v4761_v61 = vpop.eup %4760  ;;  %4780 = vrcp.f32 %v1871_v16  ;;  %v1874_v46 = vadd.f32 1.0, %v4759_v32  ;;  %2888 = vmatmul.mubr.bf16.gmra.mrb[92].mxu1 %v2348_v13  ;;  %3143 = vperm.xlu1 %4395, %v2975_v59   ;;  %v6239_v2 = vadd.f32 %v6797_v39, %v5515_v25  ;;  %v6252_v16 = vadd.f32 %v6800_v56, %v5521_v28  ;;  %v6801_v32 = vld [vmem:[#allocation42_spill] sm:$0xff] }
 0x22d   : > { %v4763_v14 = vpop.eup %4762  ;;  %4782 = vrcp.f32 %v1873_v53  ;;  %v1876_v18 = vadd.f32 1.0, %v4761_v61  ;;  %3138 = vperm.xlu0 %4394, %v2974_v11   ;;  %v6256_v53 = vadd.f32 %v6801_v32, %v5515_v25  ;;  %v2979_v61 = vld [vmem:[%s5395_s23 + $0x98] sm:$0xff]  ;;  %v6803_v59 = vld [vmem:[#allocation18_spill] sm:$0xff]  ;;  %v2254_v32 = vmul.f32 %v6219_v55, %v6070_v7 }
 0x22e   : > { %v4765_v58 = vpop.eup %4764  ;;  %4784 = vrcp.f32 %v1874_v46  ;;  %v1875_v34 = vadd.f32 1.0, %v4763_v14  ;;  %v6802_v14 = vld [vmem:[#allocation43_spill] sm:$0xff]  ;;  %v6265_v11 = vadd.f32 %v6803_v59, %v5519_v27  ;;  %v3997_v10 = vmul.f32 -1.442695, %v6252_v16 }
 0x22f   : > { %v4767_v23 = vpop.eup %4766  ;;  %4786 = vrcp.f32 %v1876_v18  ;;  %v1877_v41 = vadd.f32 1.0, %v4765_v58  ;;  %v6261_v18 = vadd.f32 %v6802_v14, %v5517_v26  ;;  %v3998_v39 = vmul.f32 -1.442695, %v6256_v53 }
 0x230   : > { %v4769_v12 = vpop.eup %4768  ;;  %4788 = vrcp.f32 %v1875_v34  ;;  %v1878_v62 = vadd.f32 1.0, %v4767_v23  ;;  %3153 = vperm.xlu1 %4395, %v2977_v48   ;;  %v3993_v23 = vmul.f32 -1.442695, %v6235_v5  ;;  %v6297_v59 = vadd.f32 %v5947_v37, %v5519_v27 }
 0x231   : > { %v4771_v24 = vpop.eup %4770  ;;  %4790 = vrcp.f32 %v1877_v41  ;;  %v1880_v3 = vadd.f32 1.0, %v4769_v12  ;;  %3148 = vperm.xlu0 %4394, %v2976_v63   ;;  %v2978_v41 = vld [vmem:[%s5395_s23 + $0x90] sm:$0xff]  ;;  %v3994_v12 = vmul.f32 -1.442695, %v6239_v2  ;;  %v4000_v20 = vmul.f32 -1.442695, %v6261_v18 }
 0x232   : > { %v4773_v13 = vpop.eup %4772  ;;  %4792 = vrcp.f32 %v1878_v62  ;;  %v1879_v17 = vadd.f32 1.0, %v4771_v24  ;;  %v3996_v62 = vmul.f32 -1.442695, %v6244_v57  ;;  %v3995_v24 = vmul.f32 -1.442695, %v6248_v36  ;;  %v6804_v63 = vld [vmem:[#allocation44_spill] sm:$0xff] }
 0x233   : > { %v4775_v47 = vpop.eup %4774  ;;  %4794 = vrcp.f32 %v1880_v3  ;;  %v1881_v45 = vadd.f32 1.0, %v4773_v13  ;;  %v6276_v13 = vadd.f32 %v6804_v63, %v5521_v28 }
 0x234   : > { %v4777_v46 = vpop.eup %4776  ;;  %4796 = vrcp.f32 %v1879_v17  ;;  %v1882_v31 = vadd.f32 1.0, %v4775_v47  ;;  %3163 = vperm.xlu1 %4395, %v2979_v61   ;;  %v2981_v17 = vld [vmem:[%s5395_s23 + $0xa8] sm:$0xff]  ;;  %v3999_v47 = vmul.f32 -1.442695, %v6265_v11 }
 0x235   : > { %v4779_v58 = vpop.eup %4778  ;;  %4798 = vrcp.f32 %v1881_v45  ;;  %v1884_v34 = vadd.f32 1.0, %v4777_v46  ;;  %v6283_v45 = vadd.f32 %v5940_v6, %v5515_v25  ;;  %3158 = vperm.xlu0 %4394, %v2978_v41   ;;  %v2980_v46 = vld [vmem:[%s5395_s23 + $0xa0] sm:$0xff]  ;;  %v4001_v41 = vmul.f32 -1.442695, %v6276_v13 }
 0x236   : > { %v4781_v48 = vpop.eup %4780  ;;  %4800 = vrcp.f32 %v1882_v31  ;;  %v2256_v14 = vmul.f32 %v4779_v58, %v6127_v42 }
 0x237   : > { %v4783_v3 = vpop.eup %4782  ;;  %4802 = vrcp.f32 %v1884_v34  ;;  %v2983_v34 = vld [vmem:[%s5395_s23 + $0xb8] sm:$0xff] }
 0x238   : > { %v4785_v33 = vpop.eup %4784  ;;  %4804 = vpow2.f32 %v3991_v44  ;;  %v6290_v44 = vadd.f32 %v5942_v40, %v5517_v26  ;;  %3173 = vperm.xlu1 %4395, %v2981_v17   ;;  %v2257_v42 = vmul.f32 %v4783_v3, %v6137_v4 }
 0x239   : > { %v4787_v56 = vpop.eup %4786  ;;  %v2258_v61 = vmul.f32 %v4785_v33, %v6141_v38  ;;  %4806 = vpow2.f32 %v3993_v23  ;;  %v2255_v38 = vmul.f32 %v4781_v48, %v6133_v54  ;;  %3168 = vperm.xlu0 %4394, %v2980_v46  }
 0x23a   : > { %v4789_v31 = vpop.eup %4788  ;;  %v2260_v6 = vmul.f32 %v4787_v56, %v6146_v49  ;;  %4808 = vpow2.f32 %v3994_v12  ;;  %v2984_v56 = vld [vmem:[%s5395_s23 + $0xc0] sm:$0xff] }
 0x23b   : > { %v4791_v7 = vpop.eup %4790  ;;  %v2259_v55 = vmul.f32 %v4789_v31, %v6151_v51  ;;  %4810 = vpow2.f32 %v3996_v62  ;;  %v2350_v40 = vpack.c.bf16 %v2258_v61, %v2254_v32  ;;  %v4002_v51 = vmul.f32 -1.442695, %v6283_v45  ;;  %v2982_v62 = vld [vmem:[%s5395_s23 + $0xb0] sm:$0xff] }
 0x23c   : > { %v4793_v23 = vpop.eup %4792  ;;  %v2261_v49 = vmul.f32 %v4791_v7, %v6158_v22  ;;  %4812 = vpow2.f32 %v3995_v24  ;;  %v2352_v58 = vpack.c.bf16 %v2260_v6, %v2256_v14  ;;  %3183 = vperm.xlu1 %4395, %v2983_v34   ;;  %v4004_v22 = vmul.f32 -1.442695, %v6290_v44  ;;  %v2985_v24 = vld [vmem:[%s5395_s23 + $0xc8] sm:$0xff] }
 0x23d   : > { %v4795_v37 = vpop.eup %4794  ;;  %4814 = vpow2.f32 %v3997_v10  ;;  %v2351_v54 = vpack.c.bf16 %v2259_v55, %v2255_v38  ;;  %v4003_v10 = vmul.f32 -1.442695, %v6297_v59  ;;  %v6315_v63 = vmul.f32 %v4793_v23, %v6165_v29  ;;  %3178 = vperm.xlu0 %4394, %v2982_v62   ;;  %v2986_v38 = vld [vmem:[%s5395_s23 + $0xd0] sm:$0xff]  ;;  %v2989_v34 = vld [vmem:[%s5395_s23 + $0xe8] sm:$0xff] }
 0x23e   : > { %v6305_v48 = vpop.eup %4796  ;;  %4816 = vpow2.f32 %v3998_v39  ;;  %v2353_v12 = vpack.c.bf16 %v2261_v49, %v2257_v42  ;;  %v6336_v49 = vadd.f32 %v5949_v21, %v5521_v28  ;;  %v6805_v62 = vld [vmem:[#allocation19_spill] sm:$0xff] }
 0x23f   : > { %v6309_v4 = vpop.eup %4798  ;;  %4818 = vpow2.f32 %v4000_v20  ;;  %2734 = vmatprep.mubr.bf16.mxu0 %v2351_v54  ;;  %v6321_v20 = vmul.f32 %v4795_v37, %v6170_v30  ;;  %v6348_v21 = vadd.f32 %v6805_v62, %v5519_v27  ;;  %v6810_v62 = vld [vmem:[#allocation48_spill] sm:$0xff] }
 0x240   : > { %v4801_v3 = vpop.eup %4800  ;;  %4820 = vpow2.f32 %v3999_v47  ;;  %2895 = vmatprep.mubr.bf16.mxu1 %v2353_v12  ;;  %2735 = vmatmul.mubr.bf16.gmra.mrb[96].mxu0 %v2350_v40  ;;  %v6344_v12 = vadd.f32 %v5954_v52, %v5517_v26 }
 0x241   : > { %v4803_v39 = vpop.eup %4802  ;;  %v6318_v17 = vmul.f32 %v4801_v3, %v6197_v60  ;;  %4822 = vpow2.f32 %v4001_v41  ;;  %2896 = vmatmul.mubr.bf16.gmra.mrb[96].mxu1 %v2352_v58  ;;  %3193 = vperm.xlu1 %4395, %v2985_v24   ;;  %v2987_v60 = vld [vmem:[%s5395_s23 + $0xd8] sm:$0xff]  ;;  %v6340_v58 = vadd.f32 %v5952_v0, %v5515_v25 }
 0x242   : > { %v4805_v33 = vpop.eup %4804  ;;  %v6324_v47 = vmul.f32 %v4803_v39, %v6202_v43  ;;  %4824 = vpow2.f32 %v4002_v51  ;;  %3188 = vperm.xlu0 %4394, %v2984_v56   ;;  %v2991_v3 = vld [vmem:[%s5395_s23 + $0xf8] sm:$0xff] }
 0x243   : > { %v4807_v32 = vpop.eup %4806  ;;  %v1883_v61 = vadd.f32 1.0, %v4805_v33  ;;  %4826 = vpow2.f32 %v4004_v22  ;;  %v2354_v29 = vpack.c.bf16 %v6318_v17, %v6315_v63  ;;  %v2988_v22 = vld [vmem:[%s5395_s23 + $0xe0] sm:$0xff]  ;;  %v4005_v33 = vmul.f32 -1.442695, %v6336_v49 }
 0x244   : > { %v4809_v46 = vpop.eup %4808  ;;  %v1885_v31 = vadd.f32 1.0, %v4807_v32  ;;  %4828 = vpow2.f32 %v4003_v10  ;;  %v2356_v30 = vpack.c.bf16 %v6324_v47, %v6321_v20  ;;  %v4006_v56 = vmul.f32 -1.442695, %v6340_v58 }
 0x245   : > { %v4811_v43 = vpop.eup %4810  ;;  %4830 = vrcp.f32 %v1883_v61  ;;  %v1886_v14 = vadd.f32 1.0, %v4809_v46  ;;  %3203 = vperm.xlu1 %4395, %v2987_v60   ;;  %v6806_v61 = vld [vmem:[#allocation20_spill] sm:$0xff]  ;;  %v6807_v46 = vld [vmem:[#allocation45_spill] sm:$0xff] }
 0x246   : > { %v4813_v6 = vpop.eup %4812  ;;  %4832 = vrcp.f32 %v1885_v31  ;;  %v1888_v7 = vadd.f32 1.0, %v4811_v43  ;;  %3198 = vperm.xlu0 %4394, %v2986_v38   ;;  %v6356_v60 = vadd.f32 %v6806_v61, %v5521_v28  ;;  %v6360_v31 = vadd.f32 %v6807_v46, %v5515_v25  ;;  %v2990_v38 = vld [vmem:[%s5395_s23 + $0xf0] sm:$0xff] }
 0x247   : > { %v4815_v55 = vpop.eup %4814  ;;  %4834 = vrcp.f32 %v1886_v14  ;;  %v1887_v40 = vadd.f32 1.0, %v4813_v6  ;;  %v4008_v6 = vmul.f32 -1.442695, %v6344_v12 }
 0x248   : > { %v4817_v23 = vpop.eup %4816  ;;  %4836 = vrcp.f32 %v1888_v7  ;;  %v1889_v42 = vadd.f32 1.0, %v4815_v55  ;;  %v4007_v7 = vmul.f32 -1.442695, %v6348_v21 }
 0x249   : > { %v4819_v37 = vpop.eup %4818  ;;  %4838 = vrcp.f32 %v1887_v40  ;;  %v1890_v41 = vadd.f32 1.0, %v4817_v23  ;;  %3213 = vperm.xlu1 %4395, %v2989_v34   ;;  %v6808_v34 = vld [vmem:[#allocation46_spill] sm:$0xff] }
 0x24a   : > { %v4821_v54 = vpop.eup %4820  ;;  %4840 = vrcp.f32 %v1889_v42  ;;  %v1892_v51 = vadd.f32 1.0, %v4819_v37  ;;  %3208 = vperm.xlu0 %4394, %v2988_v22   ;;  %v6367_v23 = vadd.f32 %v6808_v34, %v5517_v26  ;;  %v6809_v42 = vld [vmem:[#allocation47_spill] sm:$0xff]  ;;  %v6378_v22 = vadd.f32 %v6810_v62, %v5521_v28 }
 0x24b   : > { %v4823_v24 = vpop.eup %4822  ;;  %4842 = vrcp.f32 %v1890_v41  ;;  %v1891_v0 = vadd.f32 1.0, %v4821_v54  ;;  %v6371_v37 = vadd.f32 %v6809_v42, %v5519_v27  ;;  %v2263_v54 = vmul.f32 %v6305_v48, %v6177_v50  ;;  %v6812_v48 = vld [vmem:[#allocation22_spill] sm:$0xff] }
 0x24c   : > { %v4825_v10 = vpop.eup %4824  ;;  %4844 = vrcp.f32 %v1892_v51  ;;  %v1893_v39 = vadd.f32 1.0, %v4823_v24 }
 0x24d   : > { %v4827_v52 = vpop.eup %4826  ;;  %4846 = vrcp.f32 %v1891_v0  ;;  %v1894_v32 = vadd.f32 1.0, %v4825_v10  ;;  %3223 = vperm.xlu1 %4395, %v2991_v3   ;;  %v2265_v0 = vmul.f32 %v6309_v4, %v6184_v9  ;;  %v6811_v10 = vld [vmem:[#allocation21_spill] sm:$0xff]  ;;  %v4010_v9 = vmul.f32 -1.442695, %v6360_v31 }
 0x24e   : > { %v4829_v43 = vpop.eup %4828  ;;  %4848 = vrcp.f32 %v1893_v39  ;;  %v1896_v14 = vadd.f32 1.0, %v4827_v52  ;;  %v6385_v39 = vadd.f32 %v6811_v10, %v5515_v25  ;;  %3218 = vperm.xlu0 %4394, %v2990_v38   ;;  %v6390_v52 = vadd.f32 %v6812_v48, %v5517_v26 }
 0x24f   : > { %v4831_v55 = vpop.eup %4830  ;;  %4850 = vrcp.f32 %v1894_v32  ;;  %v1895_v40 = vadd.f32 1.0, %v4829_v43 }
 0x250   : > { %v4833_v41 = vpop.eup %4832  ;;  %v2267_v51 = vmul.f32 %v4831_v55, %v6227_v8  ;;  %4852 = vrcp.f32 %v1896_v14  ;;  %v4009_v8 = vmul.f32 -1.442695, %v6356_v60  ;;  %v4011_v14 = vmul.f32 -1.442695, %v6371_v37 }
 0x251   : > { %v4835_v24 = vpop.eup %4834  ;;  %v2269_v3 = vmul.f32 %v4833_v41, %v6235_v5  ;;  %4854 = vrcp.f32 %v1895_v40  ;;  %v6813_v5 = vld [vmem:[#allocation23_spill] sm:$0xff]  ;;  %v4013_v55 = vmul.f32 -1.442695, %v6378_v22  ;;  %v6814_v40 = vld [vmem:[#allocation49_spill] sm:$0xff] }
 0x252   : > { %v4837_v50 = vpop.eup %4836  ;;  %4856 = vpow2.f32 %v4005_v33  ;;  %v2355_v32 = vpack.c.bf16 %v2267_v51, %v2263_v54  ;;  %v6395_v4 = vadd.f32 %v6813_v5, %v5519_v27  ;;  %v4012_v33 = vmul.f32 -1.442695, %v6367_v23 }
 0x253   : > { %v4839_v61 = vpop.eup %4838  ;;  %4858 = vpow2.f32 %v4006_v56  ;;  %v2357_v46 = vpack.c.bf16 %v2269_v3, %v2265_v0  ;;  %v4014_v56 = vmul.f32 -1.442695, %v6385_v39  ;;  %v6403_v34 = vadd.f32 %v6814_v40, %v5521_v28 }
 0x254   : > { %v4841_v43 = vpop.eup %4840  ;;  %4860 = vpow2.f32 %v4008_v6  ;;  %2742 = vmatprep.mubr.bf16.mxu0 %v2355_v32  ;;  %v2270_v42 = vmul.f32 %v4835_v24, %v6239_v2  ;;  %v2272_v51 = vmul.f32 %v4837_v50, %v6244_v57  ;;  %v4015_v63 = vmul.f32 -1.442695, %v6395_v4 }
 0x255   : > { %v4843_v38 = vpop.eup %4842  ;;  %4862 = vpow2.f32 %v4007_v7  ;;  %2903 = vmatprep.mubr.bf16.mxu1 %v2357_v46  ;;  %2743 = vmatmul.mubr.bf16.gmra.mrb[100].mxu0 %v2354_v29  ;;  %v4016_v7 = vmul.f32 -1.442695, %v6390_v52  ;;  %v2271_v2 = vmul.f32 %v4839_v61, %v6248_v36  ;;  %v2273_v20 = vmul.f32 %v4841_v43, %v6252_v16 }
 0x256   : > { %v4845_v6 = vpop.eup %4844  ;;  %v2274_v41 = vmul.f32 %v4843_v38, %v6256_v53  ;;  %4864 = vpow2.f32 %v4009_v8  ;;  %2904 = vmatmul.mubr.bf16.gmra.mrb[100].mxu1 %v2356_v30  ;;  %v6815_v38 = vld [vmem:[#allocation24_spill] sm:$0xff] }
 0x257   : > { %v4847_v54 = vpop.eup %4846  ;;  %v2276_v62 = vmul.f32 %v4845_v6, %v6261_v18  ;;  %4866 = vpow2.f32 %v4010_v9  ;;  %v4017_v18 = vmul.f32 -1.442695, %v6403_v34  ;;  %v6816_v6 = vld [vmem:[#allocation50_spill] sm:$0xff] }
 0x258   : > { %v4849_v17 = vpop.eup %4848  ;;  %v2275_v53 = vmul.f32 %v4847_v54, %v6265_v11  ;;  %4868 = vpow2.f32 %v4012_v33  ;;  %v2358_v29 = vpack.c.bf16 %v2274_v41, %v2270_v42  ;;  %v6434_v42 = vadd.f32 %v6816_v6, %v5517_v26  ;;  %v6817_v41 = vld [vmem:[#allocation51_spill] sm:$0xff] }
 0x259   : > { %v6419_v24 = vpop.eup %4850  ;;  %v2277_v47 = vmul.f32 %v4849_v17, %v6276_v13  ;;  %4870 = vpow2.f32 %v4011_v14  ;;  %v2360_v57 = vpack.c.bf16 %v2276_v62, %v2272_v51  ;;  %v6818_v62 = vld [vmem:[#allocation52_spill] sm:$0xff]  ;;  %v6819_v17 = vld [vmem:[#allocation53_spill] sm:$0xff] }
 0x25a   : > { %v6423_v30 = vpop.eup %4852  ;;  %4872 = vpow2.f32 %v4013_v55  ;;  %v2359_v0 = vpack.c.bf16 %v2275_v53, %v2271_v2  ;;  %v6430_v55 = vadd.f32 %v6815_v38, %v5515_v25  ;;  %v6446_v2 = vadd.f32 %v6819_v17, %v5515_v25 }
 0x25b   : > { %v6426_v3 = vpop.eup %4854  ;;  %4874 = vpow2.f32 %v4014_v56  ;;  %v2361_v36 = vpack.c.bf16 %v2277_v47, %v2273_v20  ;;  %v6820_v20 = vld [vmem:[#allocation25_spill] sm:$0xff]  ;;  %v2278_v38 = vmul.f32 %v6419_v24, %v6283_v45 }
 0x25c   : > { %v4857_v11 = vpop.eup %4856  ;;  %4876 = vpow2.f32 %v4016_v7  ;;  %2750 = vmatprep.mubr.bf16.mxu0 %v2359_v0  ;;  %v6438_v7 = vadd.f32 %v6817_v41, %v5519_v27  ;;  %v6450_v47 = vadd.f32 %v6820_v20, %v5517_v26  ;;  %v2280_v41 = vmul.f32 %v6423_v30, %v6290_v44 }
 0x25d   : > { %v4859_v10 = vpop.eup %4858  ;;  %v1897_v50 = vadd.f32 1.0, %v4857_v11  ;;  %4878 = vpow2.f32 %v4015_v63  ;;  %2911 = vmatprep.mubr.bf16.mxu1 %v2361_v36  ;;  %2751 = vmatmul.mubr.bf16.gmra.mrb[104].mxu0 %v2358_v29  ;;  %v6442_v63 = vadd.f32 %v6818_v62, %v5521_v28  ;;  %v4018_v11 = vmul.f32 -1.442695, %v6430_v55 }
 0x25e   : > { %v4861_v16 = vpop.eup %4860  ;;  %v1898_v13 = vadd.f32 1.0, %v4859_v10  ;;  %4880 = vpow2.f32 %v4017_v18  ;;  %2912 = vmatmul.mubr.bf16.gmra.mrb[104].mxu1 %v2360_v57  ;;  %v6821_v57 = vld [vmem:[#allocation26_spill] sm:$0xff]  ;;  %v2279_v45 = vmul.f32 %v6426_v3, %v6297_v59  ;;  %v6489_v20 = vadd.f32 %v6082_v1, %v5519_v27 }
 0x25f   : > { %v4863_v8 = vpop.eup %4862  ;;  %4882 = vrcp.f32 %v1897_v50  ;;  %v1900_v48 = vadd.f32 1.0, %v4861_v16  ;;  %v6454_v18 = vadd.f32 %v6821_v57, %v5519_v27  ;;  %v4020_v16 = vmul.f32 -1.442695, %v6434_v42 }
 0x260   : > { %v4865_v32 = vpop.eup %4864  ;;  %4884 = vrcp.f32 %v1898_v13  ;;  %v1899_v61 = vadd.f32 1.0, %v4863_v8  ;;  %v4019_v13 = vmul.f32 -1.442695, %v6438_v7 }
 0x261   : > { %v4867_v9 = vpop.eup %4866  ;;  %4886 = vrcp.f32 %v1900_v48  ;;  %v1901_v5 = vadd.f32 1.0, %v4865_v32  ;;  %v4021_v32 = vmul.f32 -1.442695, %v6442_v63 }
 0x262   : > { %v4869_v46 = vpop.eup %4868  ;;  %4888 = vrcp.f32 %v1899_v61  ;;  %v1902_v43 = vadd.f32 1.0, %v4867_v9  ;;  %v4022_v61 = vmul.f32 -1.442695, %v6446_v2 }
 0x263   : > { %v4871_v33 = vpop.eup %4870  ;;  %4890 = vrcp.f32 %v1901_v5  ;;  %v1904_v14 = vadd.f32 1.0, %v4869_v46  ;;  %v4024_v5 = vmul.f32 -1.442695, %v6450_v47  ;;  %v4023_v46 = vmul.f32 -1.442695, %v6454_v18 }
 0x264   : > { %v4873_v56 = vpop.eup %4872  ;;  %4892 = vrcp.f32 %v1902_v43  ;;  %v1903_v40 = vadd.f32 1.0, %v4871_v33  ;;  %v6822_v43 = vld [vmem:[#allocation54_spill] sm:$0xff] }
 0x265   : > { %v4875_v54 = vpop.eup %4874  ;;  %4894 = vrcp.f32 %v1904_v14  ;;  %v1905_v51 = vadd.f32 1.0, %v4873_v56  ;;  %v6465_v33 = vadd.f32 %v6822_v43, %v5521_v28 }
 0x266   : > { %v4877_v53 = vpop.eup %4876  ;;  %4896 = vrcp.f32 %v1903_v40  ;;  %v1906_v29 = vadd.f32 1.0, %v4875_v54  ;;  %v6472_v40 = vadd.f32 %v6075_v35, %v5515_v25 }
 0x267   : > { %v4879_v0 = vpop.eup %4878  ;;  %4898 = vrcp.f32 %v1905_v51  ;;  %v1908_v36 = vadd.f32 1.0, %v4877_v53  ;;  %v6823_v51 = vld [vmem:[#allocation27_spill] sm:$0xff] }
 0x268   : > { %v4881_v10 = vpop.eup %4880  ;;  %4900 = vrcp.f32 %v1906_v29  ;;  %v1907_v50 = vadd.f32 1.0, %v4879_v0  ;;  %v6479_v62 = vadd.f32 %v6823_v51, %v5517_v26  ;;  %v4025_v29 = vmul.f32 -1.442695, %v6465_v33 }
 0x269   : > { %v4883_v8 = vpop.eup %4882  ;;  %4902 = vrcp.f32 %v1908_v36  ;;  %v1909_v48 = vadd.f32 1.0, %v4881_v10 }
 0x26a   : > { %v4885_v9 = vpop.eup %4884  ;;  %4904 = vrcp.f32 %v1907_v50  ;;  %v2281_v53 = vmul.f32 %v4883_v8, %v6336_v49  ;;  %v6494_v49 = vadd.f32 %v6088_v19, %v5515_v25  ;;  %v4028_v0 = vmul.f32 -1.442695, %v6479_v62 }
 0x26b   : > { %v4887_v14 = vpop.eup %4886  ;;  %v2282_v56 = vmul.f32 %v4885_v9, %v6340_v58  ;;  %4906 = vrcp.f32 %v1909_v48  ;;  %v4027_v50 = vmul.f32 -1.442695, %v6489_v20 }
 0x26c   : > { %v4889_v6 = vpop.eup %4888  ;;  %v2284_v54 = vmul.f32 %v4887_v14, %v6344_v12  ;;  %4908 = vpow2.f32 %v4018_v11  ;;  %v4030_v8 = vmul.f32 -1.442695, %v6494_v49 }
 0x26d   : > { %v4891_v17 = vpop.eup %4890  ;;  %v2283_v58 = vmul.f32 %v4889_v6, %v6348_v21  ;;  %4910 = vpow2.f32 %v4020_v16  ;;  %v2362_v35 = vpack.c.bf16 %v2282_v56, %v2278_v38  ;;  %v4026_v21 = vmul.f32 -1.442695, %v6472_v40 }
 0x26e   : > { %v4893_v24 = vpop.eup %4892  ;;  %v2285_v44 = vmul.f32 %v4891_v17, %v6356_v60  ;;  %4912 = vpow2.f32 %v4019_v13  ;;  %v2364_v12 = vpack.c.bf16 %v2284_v54, %v2280_v41 }
 0x26f   : > { %v4895_v30 = vpop.eup %4894  ;;  %4914 = vpow2.f32 %v4021_v32  ;;  %v2363_v59 = vpack.c.bf16 %v2283_v58, %v2279_v45  ;;  %v2286_v11 = vmul.f32 %v4893_v24, %v6360_v31 }
 0x270   : > { %v4897_v3 = vpop.eup %4896  ;;  %4916 = vpow2.f32 %v4022_v61  ;;  %v2365_v60 = vpack.c.bf16 %v2285_v44, %v2281_v53  ;;  %v2288_v16 = vmul.f32 %v4895_v30, %v6367_v23 }
 0x271   : > { %v4899_v57 = vpop.eup %4898  ;;  %4918 = vpow2.f32 %v4024_v5  ;;  %2758 = vmatprep.mubr.bf16.mxu0 %v2363_v59  ;;  %v2287_v32 = vmul.f32 %v4897_v3, %v6371_v37 }
 0x272   : > { %v4901_v36 = vpop.eup %4900  ;;  %4920 = vpow2.f32 %v4023_v46  ;;  %2919 = vmatprep.mubr.bf16.mxu1 %v2365_v60  ;;  %2759 = vmatmul.mubr.bf16.gmra.mrb[108].mxu0 %v2362_v35  ;;  %v2289_v9 = vmul.f32 %v4899_v57, %v6378_v22 }
 0x273   : > { %v4903_v1 = vpop.eup %4902  ;;  %v2290_v10 = vmul.f32 %v4901_v36, %v6385_v39  ;;  %4922 = vpow2.f32 %v4025_v29  ;;  %2920 = vmatmul.mubr.bf16.gmra.mrb[108].mxu1 %v2364_v12  ;;  %v6825_v12 = vld [vmem:[#allocation55_spill] sm:$0xff]  ;;  %v6827_v36 = vld [vmem:[#allocation57_spill] sm:$0xff] }
 0x274   : > { %v4905_v19 = vpop.eup %4904  ;;  %v2292_v13 = vmul.f32 %v4903_v1, %v6390_v52  ;;  %4924 = vpow2.f32 %v4026_v21  ;;  %v6518_v30 = vadd.f32 %v6825_v12, %v5519_v27  ;;  %v6826_v21 = vld [vmem:[#allocation56_spill] sm:$0xff]  ;;  %v6527_v1 = vadd.f32 %v6827_v36, %v5515_v25 }
 0x275   : > { %v4907_v48 = vpop.eup %4906  ;;  %v2291_v61 = vmul.f32 %v4905_v19, %v6395_v4  ;;  %4926 = vpow2.f32 %v4028_v0  ;;  %v2366_v31 = vpack.c.bf16 %v2290_v10, %v2286_v11  ;;  %v6509_v4 = vadd.f32 %v6084_v15, %v5521_v28  ;;  %v6824_v15 = vld [vmem:[#allocation28_spill] sm:$0xff] }
 0x276   : > { %v4909_v39 = vpop.eup %4908  ;;  %v2293_v5 = vmul.f32 %v4907_v48, %v6403_v34  ;;  %v2368_v46 = vpack.c.bf16 %v2292_v13, %v2288_v16  ;;  %4928 = vpow2.f32 %v4027_v50  ;;  %v6514_v24 = vadd.f32 %v6824_v15, %v5517_v26  ;;  %v6828_v50 = vld [vmem:[#allocation58_spill] sm:$0xff]  ;;  %v6829_v16 = vld [vmem:[#allocation59_spill] sm:$0xff] }
 0x277   : > { %v4911_v43 = vpop.eup %4910  ;;  %v1910_v23 = vadd.f32 1.0, %v4909_v39  ;;  %v2367_v52 = vpack.c.bf16 %v2291_v61, %v2287_v32  ;;  %4930 = vpow2.f32 %v4030_v8  ;;  %v4029_v35 = vmul.f32 -1.442695, %v6509_v4  ;;  %v6830_v8 = vld [vmem:[#allocation60_spill] sm:$0xff] }
 0x278   : > { %v4913_v14 = vpop.eup %4912  ;;  %v1912_v38 = vadd.f32 1.0, %v4911_v43  ;;  %v2369_v56 = vpack.c.bf16 %v2293_v5, %v2289_v9  ;;  %v6522_v60 = vadd.f32 %v6826_v21, %v5521_v28  ;;  %v4032_v0 = vmul.f32 -1.442695, %v6514_v24  ;;  %v6832_v9 = vld [vmem:[#allocation62_spill] sm:$0xff] }
 0x279   : > { %v4915_v6 = vpop.eup %4914  ;;  %4932 = vrcp.f32 %v1910_v23  ;;  %v1911_v37 = vadd.f32 1.0, %v4913_v14  ;;  %2766 = vmatprep.mubr.bf16.mxu0 %v2367_v52  ;;  %v4031_v10 = vmul.f32 -1.442695, %v6518_v30  ;;  %v6532_v19 = vadd.f32 %v6828_v50, %v5517_v26  ;;  %v6833_v14 = vld [vmem:[#allocation63_spill] sm:$0xff] }
 0x27a   : > { %v4917_v22 = vpop.eup %4916  ;;  %4934 = vrcp.f32 %v1912_v38  ;;  %v1913_v34 = vadd.f32 1.0, %v4915_v6  ;;  %2927 = vmatprep.mubr.bf16.mxu1 %v2369_v56  ;;  %2767 = vmatmul.mubr.bf16.gmra.mrb[112].mxu0 %v2366_v31  ;;  %v6536_v13 = vadd.f32 %v6829_v16, %v5519_v27  ;;  %v6540_v48 = vadd.f32 %v6830_v8, %v5521_v28  ;;  %v6831_v31 = vld [vmem:[#allocation61_spill] sm:$0xff] }
 0x27b   : > { %v4919_v41 = vpop.eup %4918  ;;  %4936 = vrcp.f32 %v1911_v37  ;;  %v1914_v54 = vadd.f32 1.0, %v4917_v22  ;;  %2928 = vmatmul.mubr.bf16.gmra.mrb[112].mxu1 %v2368_v46  ;;  %v6544_v39 = vadd.f32 %v6831_v31, %v5515_v25  ;;  %v6548_v5 = vadd.f32 %v6832_v9, %v5517_v26 }
 0x27c   : > { %v4921_v51 = vpop.eup %4920  ;;  %4938 = vrcp.f32 %v1913_v34  ;;  %v1916_v17 = vadd.f32 1.0, %v4919_v41  ;;  %v4033_v43 = vmul.f32 -1.442695, %v6522_v60  ;;  %v4034_v52 = vmul.f32 -1.442695, %v6527_v1 }
 0x27d   : > { %v4923_v45 = vpop.eup %4922  ;;  %4940 = vrcp.f32 %v1914_v54  ;;  %v1915_v58 = vadd.f32 1.0, %v4921_v51  ;;  %v6554_v38 = vadd.f32 %v6833_v14, %v5519_v27  ;;  %v4036_v25 = vmul.f32 -1.442695, %v6532_v19  ;;  %v6834_v51 = vld [vmem:[#allocation64_spill] sm:$0xff] }
 0x27e   : > { %v4925_v53 = vpop.eup %4924  ;;  %4942 = vrcp.f32 %v1916_v17  ;;  %v1917_v44 = vadd.f32 1.0, %v4923_v45  ;;  %v4035_v6 = vmul.f32 -1.442695, %v6536_v13  ;;  %v4037_v37 = vmul.f32 -1.442695, %v6540_v48 }
 0x27f   : > { %v4927_v29 = vpop.eup %4926  ;;  %4944 = vrcp.f32 %v1915_v58  ;;  %v1918_v59 = vadd.f32 1.0, %v4925_v53  ;;  %v4038_v22 = vmul.f32 -1.442695, %v6544_v39  ;;  %v4040_v34 = vmul.f32 -1.442695, %v6548_v5 }
 0x280   : > { %4946 = vrcp.f32 %v1917_v44  ;;  %v1920_v3 = vadd.f32 1.0, %v4927_v29  ;;  %v4929_v57 = vpop.eup %4928  ;;  %v6565_v17 = vadd.f32 %v6834_v51, %v5521_v28  ;;  %v4039_v15 = vmul.f32 -1.442695, %v6554_v38 }
 0x281   : > { %4948 = vpow2.f32 %v4029_v35  ;;  %v4931_v11 = vpop.eup %4930  ;;  %v1919_v21 = vadd.f32 1.0, %v4929_v57 }
 0x282   : > { %4950 = vrcp.f32 %v1918_v59  ;;  %v1922_v61 = vadd.f32 1.0, %v4931_v11 }
 0x283   : > { %v4933_v32 = vpop.eup %4932  ;;  %4952 = vrcp.f32 %v1920_v3 }
 0x284   : > { %v4935_v46 = vpop.eup %4934  ;;  %4954 = vrcp.f32 %v1922_v61  ;;  %v2294_v54 = vmul.f32 %v4933_v32, %v6430_v55 }
 0x285   : > { %v4937_v23 = vpop.eup %4936  ;;  %4956 = vpow2.f32 %v4032_v0  ;;  %v2296_v58 = vmul.f32 %v4935_v46, %v6434_v42  ;;  %v4041_v42 = vmul.f32 -1.442695, %v6565_v17 }
 0x286   : > { %v4939_v56 = vpop.eup %4938  ;;  %4958 = vpow2.f32 %v4031_v10  ;;  %v2295_v44 = vmul.f32 %v4937_v23, %v6438_v7 }
 0x287   : > { %v4941_v26 = vpop.eup %4940  ;;  %4960 = vpow2.f32 %v4033_v43  ;;  %v2297_v29 = vmul.f32 %v4939_v56, %v6442_v63 }
 0x288   : > { %v4943_v41 = vpop.eup %4942  ;;  %v2298_v27 = vmul.f32 %v4941_v26, %v6446_v2  ;;  %4962 = vpow2.f32 %v4034_v52 }
 0x289   : > { %v4945_v45 = vpop.eup %4944  ;;  %v2300_v35 = vmul.f32 %v4943_v41, %v6450_v47  ;;  %4964 = vpow2.f32 %v4036_v25 }
 0x28a   : > { %v4947_v53 = vpop.eup %4946  ;;  %v2299_v55 = vmul.f32 %v4945_v45, %v6454_v18  ;;  %v2370_v2 = vpack.c.bf16 %v2298_v27, %v2294_v54  ;;  %4966 = vpow2.f32 %v4035_v6  ;;  %v3069_v23 = vpop.permute.xlu0 %3068 }
 0x28b   : > { %v4949_v12 = vpop.eup %4948  ;;  %v2301_v28 = vmul.f32 %v4947_v53, %v6465_v33  ;;  %v2372_v59 = vpack.c.bf16 %v2300_v35, %v2296_v58  ;;  %4968 = vpow2.f32 %v4037_v37 }
 0x28c   : > { %v2371_v47 = vpack.c.bf16 %v2299_v55, %v2295_v44  ;;  %v4951_v3 = vpop.eup %4950  ;;  %4970 = vpow2.f32 %v4038_v22  ;;  %v1921_v18 = vadd.f32 1.0, %v4949_v12  ;;  %v6590_v44 = vld [vmem:[%s633_s12] ss:$0 sm:$0xff] }
 0x28d   : > { %v2373_v0 = vpack.c.bf16 %v2301_v28, %v2297_v29  ;;  %v6575_v7 = vpop.eup %4952  ;;  %4972 = vpow2.f32 %v4040_v34  ;;  %v6578_v33 = vmul.f32 %v4951_v3, %v6472_v40 }
 0x28e   : > { %2774 = vmatprep.mubr.bf16.mxu0 %v2371_v47  ;;  %v4955_v36 = vpop.eup %4954  ;;  %4974 = vpow2.f32 %v4039_v15 }
 0x28f   : > { %2935 = vmatprep.mubr.bf16.mxu1 %v2373_v0  ;;  %2775 = vmatmul.mubr.bf16.gmra.mrb[116].mxu0 %v2370_v2  ;;  %v4957_v63 = vpop.eup %4956  ;;  %v6581_v11 = vmul.f32 %v4955_v36, %v6494_v49  ;;  %4976 = vpow2.f32 %v4041_v42  ;;  %v2995_v36 = vld [vmem:[#allocation2] sm:$0xff] }
 0x290   : > { %2936 = vmatmul.mubr.bf16.gmra.mrb[116].mxu1 %v2372_v59  ;;  %v4959_v57 = vpop.eup %4958  ;;  %4978 = vrcp.f32 %v1919_v21  ;;  %v1924_v10 = vadd.f32 1.0, %v4957_v63  ;;  %v2304_v21 = vmul.f32 %v6575_v7, %v6479_v62 }
 0x291   : > { %v4961_v50 = vpop.eup %4960  ;;  %4980 = vrcp.f32 %v1921_v18  ;;  %v1923_v16 = vadd.f32 1.0, %v4959_v57  ;;  %v2374_v8 = vpack.c.bf16 %v6581_v11, %v6578_v33 }
 0x292   : > { %v4963_v32 = vpop.eup %4962  ;;  %4982 = vrcp.f32 %v1924_v10  ;;  %v1925_v61 = vadd.f32 1.0, %v4961_v50  ;;  %v4101_v56 = vpop.f32.mrb[64].mxu0 }
 0x293   : > { %v4965_v31 = vpop.eup %4964  ;;  %4984 = vrcp.f32 %v1923_v16  ;;  %v1926_v40 = vadd.f32 1.0, %v4963_v32  ;;  %v4213_v25 = vpop.f32.mrb[64].mxu1 }
 0x294   : > { %v4967_v9 = vpop.eup %4966  ;;  %4986 = vrcp.f32 %v1925_v61  ;;  %v1928_v49 = vadd.f32 1.0, %v4965_v31  ;;  %v4102_v37 = vpop.f32.mrb[65].mxu0 }
 0x295   : > { %v4969_v46 = vpop.eup %4968  ;;  %4988 = vrcp.f32 %v1926_v40  ;;  %v1927_v43 = vadd.f32 1.0, %v4967_v9  ;;  %v4214_v22 = vpop.f32.mrb[65].mxu1  ;;  %v4103_v54 = vadd.f32 %v4102_v37, %v4101_v56 }
 0x296   : > { %v4971_v52 = vpop.eup %4970  ;;  %4990 = vrcp.f32 %v1928_v49  ;;  %v1929_v14 = vadd.f32 1.0, %v4969_v46  ;;  %v4215_v27 = vadd.f32 %v4214_v22, %v4213_v25  ;;  %v4104_v51 = vpop.f32.mrb[66].mxu0  ;;  %v2996_v49 = vld [vmem:[#allocation2 + $0x8] sm:$0xff] }
 0x297   : > { %v4973_v6 = vpop.eup %4972  ;;  %4992 = vrcp.f32 %v1927_v43  ;;  %v1930_v26 = vadd.f32 1.0, %v4971_v52  ;;  %v4216_v45 = vpop.f32.mrb[66].mxu1 }
 0x298   : > { %v4975_v34 = vpop.eup %4974  ;;  %4994 = vrcp.f32 %v1929_v14  ;;  %v1932_v41 = vadd.f32 1.0, %v4973_v6  ;;  %v4105_v15 = vpop.f32.mrb[67].mxu0  ;;  %v2834_v12 = vadd.f32 %v4215_v27, %v4103_v54 }
 0x299   : > { %v4977_v58 = vpop.eup %4976  ;;  %4996 = vrcp.f32 %v1930_v26  ;;  %v1931_v35 = vadd.f32 1.0, %v4975_v34  ;;  %v4217_v53 = vpop.f32.mrb[67].mxu1  ;;  %v4106_v29 = vadd.f32 %v4105_v15, %v4104_v51 }
 0x29a   : > { %v4979_v55 = vpop.eup %4978  ;;  %4998 = vrcp.f32 %v1932_v41  ;;  %v1933_v2 = vadd.f32 1.0, %v4977_v58  ;;  %v4218_v59 = vadd.f32 %v4217_v53, %v4216_v45  ;;  %v3034_v47 = vadd.f32 %v6590_v44, %v2834_v12  ;;  %v3074_v16 = vpop.permute.xlu0 %3073 }
 0x29b   : > { %v4981_v28 = vpop.eup %4980  ;;  %5000 = vrcp.f32 %v1931_v35  ;;  %v2303_v57 = vmul.f32 %v4979_v55, %v6489_v20 }
 0x29c   : > { %v4983_v42 = vpop.eup %4982  ;;  %5002 = vrcp.f32 %v1933_v2  ;;  %v2837_v18 = vadd.f32 %v4218_v59, %v4106_v29  ;;  %v3226_v50 = vmul.f32 %v3069_v23, %v3034_v47  ;;  %v2305_v61 = vmul.f32 %v4981_v28, %v6509_v4  ;;  %v2997_v2 = vld [vmem:[#allocation2 + $0x10] sm:$0xff] }
 0x29d   : > { %v4985_v3 = vpop.eup %4984  ;;  %v2308_v0 = vmul.f32 %v4983_v42, %v6514_v24 }
 0x29e   : > { %v4987_v63 = vpop.eup %4986  ;;  %v2307_v10 = vmul.f32 %v4985_v3, %v6518_v30  ;;  %v3035_v9 = vadd.f32 %v6590_v44, %v2837_v18  ;;  %v3258_v24 = vadd.f32 %v3226_v50, %v2995_v36  ;;  %v2998_v3 = vld [vmem:[#allocation2 + $0x18] sm:$0xff] }
 0x29f   : > { %v4989_v32 = vpop.eup %4988  ;;  %v2309_v31 = vmul.f32 %v4987_v63, %v6522_v60  ;;  %v2376_v40 = vpack.c.bf16 %v2308_v0, %v2304_v21 }
 0x2a0   : > { %v4991_v62 = vpop.eup %4990  ;;  %v2375_v7 = vpack.c.bf16 %v2307_v10, %v2303_v57  ;;  %v3227_v52 = vmul.f32 %v3074_v16, %v3035_v9  ;;  %3290 = vst [vmem:[#allocation2] sm:$0xff] %v3258_v24  ;;  %v2310_v23 = vmul.f32 %v4989_v32, %v6527_v1  ;;  %v2999_v24 = vld [vmem:[#allocation2 + $0x20] sm:$0xff] }
 0x2a1   : > { %v4993_v46 = vpop.eup %4992  ;;  %v2377_v43 = vpack.c.bf16 %v2309_v31, %v2305_v61  ;;  %v2312_v25 = vmul.f32 %v4991_v62, %v6532_v19 }
 0x2a2   : > { %v4995_v20 = vpop.eup %4994  ;;  %2782 = vmatprep.mubr.bf16.mxu0 %v2375_v7  ;;  %v3259_v4 = vadd.f32 %v3227_v52, %v2996_v49  ;;  %v2311_v37 = vmul.f32 %v4993_v46, %v6536_v13  ;;  %v3089_v7 = vpop.permute.xlu0 %3088  ;;  %v3000_v52 = vld [vmem:[#allocation2 + $0x28] sm:$0xff] }
 0x2a3   : > { %v4997_v30 = vpop.eup %4996  ;;  %2943 = vmatprep.mubr.bf16.mxu1 %v2377_v43  ;;  %2783 = vmatmul.mubr.bf16.gmra.mrb[120].mxu0 %v2374_v8  ;;  %v3079_v8 = vpop.permute.xlu1 %3078  ;;  %v2313_v34 = vmul.f32 %v4995_v20, %v6540_v48 }
 0x2a4   : > { %v4999_v60 = vpop.eup %4998  ;;  %v2314_v14 = vmul.f32 %v4997_v30, %v6544_v39  ;;  %2944 = vmatmul.mubr.bf16.gmra.mrb[120].mxu1 %v2376_v40  ;;  %3291 = vst [vmem:[#allocation2 + $0x8] sm:$0xff] %v3259_v4 }
 0x2a5   : > { %v5001_v56 = vpop.eup %5000  ;;  %v2316_v6 = vmul.f32 %v4999_v60, %v6548_v5 }
 0x2a6   : > { %v5003_v26 = vpop.eup %5002  ;;  %v2315_v22 = vmul.f32 %v5001_v56, %v6554_v38  ;;  %v2378_v33 = vpack.c.bf16 %v2314_v14, %v2310_v23 }
 0x2a7   : > { %v4107_v11 = vpop.f32.mrb[68].mxu0  ;;  %v2317_v1 = vmul.f32 %v5003_v26, %v6565_v17  ;;  %v2380_v39 = vpack.c.bf16 %v2316_v6, %v2312_v25  ;;  %v3084_v12 = vpop.permute.xlu1 %3083 }
 0x2a8   : > { %v4219_v41 = vpop.f32.mrb[68].mxu1  ;;  %v4108_v54 = vpop.f32.mrb[69].mxu0  ;;  %v2379_v27 = vpack.c.bf16 %v2315_v22, %v2311_v37 }
 0x2a9   : > { %v4109_v19 = vadd.f32 %v4108_v54, %v4107_v11  ;;  %v4220_v51 = vpop.f32.mrb[69].mxu1  ;;  %v4110_v5 = vpop.f32.mrb[70].mxu0  ;;  %v2381_v45 = vpack.c.bf16 %v2317_v1, %v2313_v34  ;;  %v3001_v54 = vld [vmem:[#allocation2 + $0x30] sm:$0xff] }
 0x2aa   : > { %v4221_v58 = vadd.f32 %v4220_v51, %v4219_v41  ;;  %v4222_v35 = vpop.f32.mrb[70].mxu1  ;;  %v4111_v13 = vpop.f32.mrb[71].mxu0  ;;  %2790 = vmatprep.mubr.bf16.mxu0 %v2379_v27 }
 0x2ab   : > { %v4112_v38 = vadd.f32 %v4111_v13, %v4110_v5  ;;  %v4223_v15 = vpop.f32.mrb[71].mxu1  ;;  %2951 = vmatprep.mubr.bf16.mxu1 %v2381_v45  ;;  %2791 = vmatmul.mubr.bf16.gmra.mrb[124].mxu0 %v2378_v33  ;;  %v3094_v43 = vpop.permute.xlu1 %3093 }
 0x2ac   : > { %v2842_v53 = vadd.f32 %v4221_v58, %v4109_v19  ;;  %v4224_v48 = vadd.f32 %v4223_v15, %v4222_v35  ;;  %2952 = vmatmul.mubr.bf16.gmra.mrb[124].mxu1 %v2380_v39  ;;  %v3099_v41 = vpop.permute.xlu0 %3098  ;;  %v3002_v58 = vld [vmem:[#allocation2 + $0x38] sm:$0xff] }
 0x2ae   : > { %v3036_v17 = vadd.f32 %v6590_v44, %v2842_v53  ;;  %v2845_v55 = vadd.f32 %v4224_v48, %v4112_v38 }
 0x2af   : > { %v4113_v29 = vpop.f32.mrb[72].mxu0  ;;  %v3104_v45 = vpop.permute.xlu1 %3103 }
 0x2b0   : > { %v3228_v28 = vmul.f32 %v3079_v8, %v3036_v17  ;;  %v3037_v59 = vadd.f32 %v6590_v44, %v2845_v55  ;;  %v4225_v42 = vpop.f32.mrb[72].mxu1  ;;  %v4114_v47 = vpop.f32.mrb[73].mxu0 }
 0x2b1   : > { %v4115_v21 = vadd.f32 %v4114_v47, %v4113_v29  ;;  %v4226_v0 = vpop.f32.mrb[73].mxu1  ;;  %v4116_v18 = vpop.f32.mrb[74].mxu0 }
 0x2b2   : > { %v3260_v36 = vadd.f32 %v3228_v28, %v2997_v2  ;;  %v3229_v63 = vmul.f32 %v3084_v12, %v3037_v59  ;;  %v4227_v57 = vadd.f32 %v4226_v0, %v4225_v42  ;;  %v4228_v10 = vpop.f32.mrb[74].mxu1  ;;  %v4117_v50 = vpop.f32.mrb[75].mxu0 }
 0x2b3   : > { %v4118_v16 = vadd.f32 %v4117_v50, %v4116_v18  ;;  %v4229_v32 = vpop.f32.mrb[75].mxu1  ;;  %v3114_v47 = vpop.permute.xlu1 %3113  ;;  %v3003_v18 = vld [vmem:[#allocation2 + $0x40] sm:$0xff] }
 0x2b4   : > { %3292 = vst [vmem:[#allocation2 + $0x10] sm:$0xff] %v3260_v36  ;;  %v3261_v61 = vadd.f32 %v3229_v63, %v2998_v3  ;;  %v2850_v31 = vadd.f32 %v4227_v57, %v4115_v21  ;;  %v4230_v40 = vadd.f32 %v4229_v32, %v4228_v10  ;;  %v3109_v0 = vpop.permute.xlu0 %3108 }
 0x2b6   : > { %3293 = vst [vmem:[#allocation2 + $0x18] sm:$0xff] %v3261_v61  ;;  %v3038_v9 = vadd.f32 %v6590_v44, %v2850_v31  ;;  %v2853_v62 = vadd.f32 %v4230_v40, %v4118_v16  ;;  %v3004_v16 = vld [vmem:[#allocation2 + $0x48] sm:$0xff] }
 0x2b8   : > { %v3230_v49 = vmul.f32 %v3089_v7, %v3038_v9  ;;  %v3039_v46 = vadd.f32 %v6590_v44, %v2853_v62 }
 0x2ba   : > { %v3262_v20 = vadd.f32 %v3230_v49, %v2999_v24  ;;  %v3231_v30 = vmul.f32 %v3094_v43, %v3039_v46 }
 0x2bc   : > { %3294 = vst [vmem:[#allocation2 + $0x20] sm:$0xff] %v3262_v20  ;;  %v3263_v4 = vadd.f32 %v3231_v30, %v3000_v52 }
 0x2be   : > { %3295 = vst [vmem:[#allocation2 + $0x28] sm:$0xff] %v3263_v4 }
 0x2c4   : > { %v4119_v60 = vpop.f32.mrb[76].mxu0 }
 0x2c5   : > { %v4231_v23 = vpop.f32.mrb[76].mxu1  ;;  %v4120_v14 = vpop.f32.mrb[77].mxu0 }
 0x2c6   : > { %v4121_v56 = vadd.f32 %v4120_v14, %v4119_v60  ;;  %v4232_v25 = vpop.f32.mrb[77].mxu1  ;;  %v4122_v6 = vpop.f32.mrb[78].mxu0 }
 0x2c7   : > { %v4233_v26 = vadd.f32 %v4232_v25, %v4231_v23  ;;  %v4234_v37 = vpop.f32.mrb[78].mxu1  ;;  %v4123_v22 = vpop.f32.mrb[79].mxu0  ;;  %v3005_v23 = vld [vmem:[#allocation2 + $0x50] sm:$0xff] }
 0x2c8   : > { %v4124_v33 = vadd.f32 %v4123_v22, %v4122_v6  ;;  %v4235_v11 = vpop.f32.mrb[79].mxu1  ;;  %v3119_v60 = vpop.permute.xlu0 %3118  ;;  %v3006_v6 = vld [vmem:[#allocation2 + $0x58] sm:$0xff] }
 0x2c9   : > { %v2858_v8 = vadd.f32 %v4233_v26, %v4121_v56  ;;  %v4236_v34 = vadd.f32 %v4235_v11, %v4234_v37  ;;  %v3124_v25 = vpop.permute.xlu1 %3123 }
 0x2cb   : > { %v3040_v1 = vadd.f32 %v6590_v44, %v2858_v8  ;;  %v2861_v39 = vadd.f32 %v4236_v34, %v4124_v33 }
 0x2cc   : > { %v4125_v27 = vpop.f32.mrb[80].mxu0 }
 0x2cd   : > { %v3232_v19 = vmul.f32 %v3099_v41, %v3040_v1  ;;  %v3041_v51 = vadd.f32 %v6590_v44, %v2861_v39  ;;  %v4126_v5 = vpop.f32.mrb[81].mxu0 }
 0x2ce   : > { %v4127_v35 = vadd.f32 %v4126_v5, %v4125_v27  ;;  %v4128_v13 = vpop.f32.mrb[82].mxu0 }
 0x2cf   : > { %v3264_v38 = vadd.f32 %v3232_v19, %v3001_v54  ;;  %v3233_v15 = vmul.f32 %v3104_v45, %v3041_v51  ;;  %v4129_v53 = vpop.f32.mrb[83].mxu0 }
 0x2d0   : > { %v4130_v48 = vadd.f32 %v4129_v53, %v4128_v13 }
 0x2d1   : > { %3296 = vst [vmem:[#allocation2 + $0x30] sm:$0xff] %v3264_v38  ;;  %v3265_v17 = vadd.f32 %v3233_v15, %v3002_v58  ;;  %v3134_v58 = vpop.permute.xlu1 %3133  ;;  %v3129_v38 = vpop.permute.xlu0 %3128  ;;  %v3007_v15 = vld [vmem:[#allocation2 + $0x60] sm:$0xff] }
 0x2d3   : > { %3297 = vst [vmem:[#allocation2 + $0x38] sm:$0xff] %v3265_v17 }
 0x2db   : > { %v4237_v55 = vpop.f32.mrb[80].mxu1 }
 0x2dc   : > { %v4238_v2 = vpop.f32.mrb[81].mxu1 }
 0x2dd   : > { %v4239_v12 = vadd.f32 %v4238_v2, %v4237_v55  ;;  %v4240_v29 = vpop.f32.mrb[82].mxu1 }
 0x2de   : > { %v4241_v28 = vpop.f32.mrb[83].mxu1 }
 0x2df   : > { %v2866_v59 = vadd.f32 %v4239_v12, %v4127_v35  ;;  %v4242_v42 = vadd.f32 %v4241_v28, %v4240_v29  ;;  %v3008_v12 = vld [vmem:[#allocation2 + $0x68] sm:$0xff] }
 0x2e1   : > { %v3042_v3 = vadd.f32 %v6590_v44, %v2866_v59  ;;  %v2869_v21 = vadd.f32 %v4242_v42, %v4130_v48  ;;  %v4131_v36 = vpop.f32.mrb[84].mxu0 }
 0x2e2   : > { %v4132_v50 = vpop.f32.mrb[85].mxu0 }
 0x2e3   : > { %v3234_v63 = vmul.f32 %v3109_v0, %v3042_v3  ;;  %v3043_v57 = vadd.f32 %v6590_v44, %v2869_v21  ;;  %v4243_v10 = vpop.f32.mrb[84].mxu1  ;;  %v4133_v32 = vadd.f32 %v4132_v50, %v4131_v36  ;;  %v4134_v31 = vpop.f32.mrb[86].mxu0 }
 0x2e4   : > { %v4244_v61 = vpop.f32.mrb[85].mxu1  ;;  %v4135_v24 = vpop.f32.mrb[87].mxu0 }
 0x2e5   : > { %v3266_v40 = vadd.f32 %v3234_v63, %v3003_v18  ;;  %v3235_v9 = vmul.f32 %v3114_v47, %v3043_v57  ;;  %v4245_v62 = vadd.f32 %v4244_v61, %v4243_v10  ;;  %v4246_v7 = vpop.f32.mrb[86].mxu1  ;;  %v4136_v49 = vadd.f32 %v4135_v24, %v4134_v31  ;;  %v3009_v61 = vld [vmem:[#allocation2 + $0x70] sm:$0xff] }
 0x2e6   : > { %v4247_v46 = vpop.f32.mrb[87].mxu1 }
 0x2e7   : > { %3298 = vst [vmem:[#allocation2 + $0x40] sm:$0xff] %v3266_v40  ;;  %v3267_v43 = vadd.f32 %v3235_v9, %v3004_v16  ;;  %v2874_v52 = vadd.f32 %v4245_v62, %v4133_v32  ;;  %v4248_v20 = vadd.f32 %v4247_v46, %v4246_v7  ;;  %v3139_v32 = vpop.permute.xlu0 %3138  ;;  %v3144_v9 = vpop.permute.xlu1 %3143  ;;  %v3010_v62 = vld [vmem:[#allocation2 + $0x78] sm:$0xff] }
 0x2e9   : > { %3299 = vst [vmem:[#allocation2 + $0x48] sm:$0xff] %v3267_v43  ;;  %v3044_v30 = vadd.f32 %v6590_v44, %v2874_v52  ;;  %v2877_v4 = vadd.f32 %v4248_v20, %v4136_v49 }
 0x2eb   : > { %v3236_v14 = vmul.f32 %v3119_v60, %v3044_v30  ;;  %v3045_v56 = vadd.f32 %v6590_v44, %v2877_v4 }
 0x2ed   : > { %v3268_v26 = vadd.f32 %v3236_v14, %v3005_v23  ;;  %v3237_v37 = vmul.f32 %v3124_v25, %v3045_v56 }
 0x2ef   : > { %3300 = vst [vmem:[#allocation2 + $0x50] sm:$0xff] %v3268_v26  ;;  %v3269_v22 = vadd.f32 %v3237_v37, %v3006_v6 }
 0x2f1   : > { %3301 = vst [vmem:[#allocation2 + $0x58] sm:$0xff] %v3269_v22 }
 0x2f6   : > { %v4137_v33 = vpop.f32.mrb[88].mxu0 }
 0x2f7   : > { %v4249_v11 = vpop.f32.mrb[88].mxu1  ;;  %v4138_v8 = vpop.f32.mrb[89].mxu0 }
 0x2f8   : > { %v4139_v34 = vadd.f32 %v4138_v8, %v4137_v33  ;;  %v4250_v1 = vpop.f32.mrb[89].mxu1  ;;  %v4140_v39 = vpop.f32.mrb[90].mxu0 }
 0x2f9   : > { %v4251_v41 = vadd.f32 %v4250_v1, %v4249_v11  ;;  %v4252_v54 = vpop.f32.mrb[90].mxu1  ;;  %v4141_v27 = vpop.f32.mrb[91].mxu0  ;;  %v3011_v11 = vld [vmem:[#allocation2 + $0x80] sm:$0xff] }
 0x2fa   : > { %v4142_v19 = vadd.f32 %v4141_v27, %v4140_v39  ;;  %v4253_v51 = vpop.f32.mrb[91].mxu1  ;;  %v3149_v33 = vpop.permute.xlu0 %3148  ;;  %v3012_v39 = vld [vmem:[#allocation2 + $0x88] sm:$0xff] }
 0x2fb   : > { %v2882_v5 = vadd.f32 %v4251_v41, %v4139_v34  ;;  %v4254_v45 = vadd.f32 %v4253_v51, %v4252_v54  ;;  %v3154_v1 = vpop.permute.xlu1 %3153 }
 0x2fd   : > { %v3046_v35 = vadd.f32 %v6590_v44, %v2882_v5  ;;  %v2885_v13 = vadd.f32 %v4254_v45, %v4142_v19 }
 0x2fe   : > { %v4143_v53 = vpop.f32.mrb[92].mxu0 }
 0x2ff   : > { %v3238_v48 = vmul.f32 %v3129_v38, %v3046_v35  ;;  %v3047_v17 = vadd.f32 %v6590_v44, %v2885_v13  ;;  %v4255_v55 = vpop.f32.mrb[92].mxu1  ;;  %v4144_v2 = vpop.f32.mrb[93].mxu0 }
 0x300   : > { %v4145_v29 = vadd.f32 %v4144_v2, %v4143_v53  ;;  %v4256_v28 = vpop.f32.mrb[93].mxu1  ;;  %v4146_v59 = vpop.f32.mrb[94].mxu0 }
 0x301   : > { %v3270_v42 = vadd.f32 %v3238_v48, %v3007_v15  ;;  %v3239_v47 = vmul.f32 %v3134_v58, %v3047_v17  ;;  %v4257_v3 = vadd.f32 %v4256_v28, %v4255_v55  ;;  %v4258_v21 = vpop.f32.mrb[94].mxu1  ;;  %v4147_v0 = vpop.f32.mrb[95].mxu0 }
 0x302   : > { %v4148_v18 = vadd.f32 %v4147_v0, %v4146_v59  ;;  %v4259_v36 = vpop.f32.mrb[95].mxu1  ;;  %v3164_v2 = vpop.permute.xlu1 %3163  ;;  %v3013_v59 = vld [vmem:[#allocation2 + $0x90] sm:$0xff] }
 0x303   : > { %3302 = vst [vmem:[#allocation2 + $0x60] sm:$0xff] %v3270_v42  ;;  %v3271_v63 = vadd.f32 %v3239_v47, %v3008_v12  ;;  %v2890_v57 = vadd.f32 %v4257_v3, %v4145_v29  ;;  %v4260_v10 = vadd.f32 %v4259_v36, %v4258_v21  ;;  %v3159_v28 = vpop.permute.xlu0 %3158 }
 0x305   : > { %3303 = vst [vmem:[#allocation2 + $0x68] sm:$0xff] %v3271_v63  ;;  %v3048_v50 = vadd.f32 %v6590_v44, %v2890_v57  ;;  %v2893_v16 = vadd.f32 %v4260_v10, %v4148_v18  ;;  %v3014_v18 = vld [vmem:[#allocation2 + $0x98] sm:$0xff] }
 0x307   : > { %v3240_v31 = vmul.f32 %v3139_v32, %v3048_v50  ;;  %v3049_v40 = vadd.f32 %v6590_v44, %v2893_v16 }
 0x309   : > { %v3272_v7 = vadd.f32 %v3240_v31, %v3009_v61  ;;  %v3241_v24 = vmul.f32 %v3144_v9, %v3049_v40 }
 0x30b   : > { %3304 = vst [vmem:[#allocation2 + $0x70] sm:$0xff] %v3272_v7  ;;  %v3273_v49 = vadd.f32 %v3241_v24, %v3010_v62 }
 0x30d   : > { %3305 = vst [vmem:[#allocation2 + $0x78] sm:$0xff] %v3273_v49 }
 0x313   : > { %v4149_v46 = vpop.f32.mrb[96].mxu0 }
 0x314   : > { %v4261_v43 = vpop.f32.mrb[96].mxu1  ;;  %v4150_v52 = vpop.f32.mrb[97].mxu0 }
 0x315   : > { %v4151_v20 = vadd.f32 %v4150_v52, %v4149_v46  ;;  %v4262_v30 = vpop.f32.mrb[97].mxu1  ;;  %v4152_v4 = vpop.f32.mrb[98].mxu0 }
 0x316   : > { %v4263_v60 = vadd.f32 %v4262_v30, %v4261_v43  ;;  %v4264_v23 = vpop.f32.mrb[98].mxu1  ;;  %v4153_v14 = vpop.f32.mrb[99].mxu0  ;;  %v3015_v43 = vld [vmem:[#allocation2 + $0xa0] sm:$0xff] }
 0x317   : > { %v4154_v56 = vadd.f32 %v4153_v14, %v4152_v4  ;;  %v4265_v25 = vpop.f32.mrb[99].mxu1  ;;  %v3169_v46 = vpop.permute.xlu0 %3168  ;;  %v3016_v4 = vld [vmem:[#allocation2 + $0xa8] sm:$0xff] }
 0x318   : > { %v2898_v6 = vadd.f32 %v4263_v60, %v4151_v20  ;;  %v4266_v26 = vadd.f32 %v4265_v25, %v4264_v23  ;;  %v3174_v30 = vpop.permute.xlu1 %3173 }
 0x31a   : > { %v3050_v37 = vadd.f32 %v6590_v44, %v2898_v6  ;;  %v2901_v22 = vadd.f32 %v4266_v26, %v4154_v56 }
 0x31c   : > { %v3242_v8 = vmul.f32 %v3149_v33, %v3050_v37  ;;  %v3051_v34 = vadd.f32 %v6590_v44, %v2901_v22 }
 0x31e   : > { %v3274_v41 = vadd.f32 %v3242_v8, %v3011_v11  ;;  %v3243_v54 = vmul.f32 %v3154_v1, %v3051_v34 }
 0x320   : > { %3306 = vst [vmem:[#allocation2 + $0x80] sm:$0xff] %v3274_v41  ;;  %v3275_v27 = vadd.f32 %v3243_v54, %v3012_v39  ;;  %v3184_v54 = vpop.permute.xlu1 %3183 }
 0x322   : > { %3307 = vst [vmem:[#allocation2 + $0x88] sm:$0xff] %v3275_v27 }
 0x328   : > { %v4155_v19 = vpop.f32.mrb[100].mxu0 }
 0x329   : > { %v4267_v51 = vpop.f32.mrb[100].mxu1  ;;  %v4156_v5 = vpop.f32.mrb[101].mxu0 }
 0x32a   : > { %v4157_v45 = vadd.f32 %v4156_v5, %v4155_v19  ;;  %v4268_v58 = vpop.f32.mrb[101].mxu1  ;;  %v4158_v35 = vpop.f32.mrb[102].mxu0  ;;  %v3017_v5 = vld [vmem:[#allocation2 + $0xb0] sm:$0xff] }
 0x32b   : > { %v4269_v13 = vadd.f32 %v4268_v58, %v4267_v51  ;;  %v4270_v38 = vpop.f32.mrb[102].mxu1  ;;  %v4159_v15 = vpop.f32.mrb[103].mxu0 }
 0x32c   : > { %v4160_v53 = vadd.f32 %v4159_v15, %v4158_v35  ;;  %v4271_v48 = vpop.f32.mrb[103].mxu1  ;;  %v3179_v51 = vpop.permute.xlu0 %3178  ;;  %v3018_v15 = vld [vmem:[#allocation2 + $0xb8] sm:$0xff] }
 0x32d   : > { %v2906_v17 = vadd.f32 %v4269_v13, %v4157_v45  ;;  %v4272_v55 = vadd.f32 %v4271_v48, %v4270_v38 }
 0x32f   : > { %v3052_v12 = vadd.f32 %v6590_v44, %v2906_v17  ;;  %v2909_v29 = vadd.f32 %v4272_v55, %v4160_v53 }
 0x330   : > { %v4161_v42 = vpop.f32.mrb[104].mxu0 }
 0x331   : > { %v3244_v47 = vmul.f32 %v3159_v28, %v3052_v12  ;;  %v3053_v3 = vadd.f32 %v6590_v44, %v2909_v29  ;;  %v4273_v21 = vpop.f32.mrb[104].mxu1  ;;  %v4162_v0 = vpop.f32.mrb[105].mxu0 }
 0x332   : > { %v4163_v36 = vadd.f32 %v4162_v0, %v4161_v42  ;;  %v4274_v63 = vpop.f32.mrb[105].mxu1  ;;  %v4164_v57 = vpop.f32.mrb[106].mxu0 }
 0x333   : > { %v3276_v10 = vadd.f32 %v3244_v47, %v3013_v59  ;;  %v3245_v50 = vmul.f32 %v3164_v2, %v3053_v3  ;;  %v4275_v16 = vadd.f32 %v4274_v63, %v4273_v21  ;;  %v4276_v32 = vpop.f32.mrb[106].mxu1  ;;  %v4165_v61 = vpop.f32.mrb[107].mxu0  ;;  %v3019_v63 = vld [vmem:[#allocation2 + $0xc0] sm:$0xff] }
 0x334   : > { %v4166_v31 = vadd.f32 %v4165_v61, %v4164_v57  ;;  %v4277_v40 = vpop.f32.mrb[107].mxu1 }
 0x335   : > { %3308 = vst [vmem:[#allocation2 + $0x90] sm:$0xff] %v3276_v10  ;;  %v3277_v9 = vadd.f32 %v3245_v50, %v3014_v18  ;;  %v2914_v62 = vadd.f32 %v4275_v16, %v4163_v36  ;;  %v4278_v7 = vadd.f32 %v4277_v40, %v4276_v32  ;;  %v3189_v36 = vpop.permute.xlu0 %3188  ;;  %v3194_v50 = vpop.permute.xlu1 %3193  ;;  %v3020_v16 = vld [vmem:[#allocation2 + $0xc8] sm:$0xff] }
 0x337   : > { %3309 = vst [vmem:[#allocation2 + $0x98] sm:$0xff] %v3277_v9  ;;  %v3054_v24 = vadd.f32 %v6590_v44, %v2914_v62  ;;  %v2917_v49 = vadd.f32 %v4278_v7, %v4166_v31 }
 0x339   : > { %v3246_v52 = vmul.f32 %v3169_v46, %v3054_v24  ;;  %v3055_v20 = vadd.f32 %v6590_v44, %v2917_v49 }
 0x33b   : > { %v3278_v60 = vadd.f32 %v3246_v52, %v3015_v43  ;;  %v3247_v23 = vmul.f32 %v3174_v30, %v3055_v20 }
 0x33d   : > { %3310 = vst [vmem:[#allocation2 + $0xa0] sm:$0xff] %v3278_v60  ;;  %v3279_v14 = vadd.f32 %v3247_v23, %v3016_v4 }
 0x33f   : > { %3311 = vst [vmem:[#allocation2 + $0xa8] sm:$0xff] %v3279_v14 }
 0x345   : > { %v4167_v56 = vpop.f32.mrb[108].mxu0 }
 0x346   : > { %v4279_v25 = vpop.f32.mrb[108].mxu1  ;;  %v4168_v6 = vpop.f32.mrb[109].mxu0 }
 0x347   : > { %v4169_v26 = vadd.f32 %v4168_v6, %v4167_v56  ;;  %v4280_v37 = vpop.f32.mrb[109].mxu1  ;;  %v4170_v22 = vpop.f32.mrb[110].mxu0 }
 0x348   : > { %v4281_v33 = vadd.f32 %v4280_v37, %v4279_v25  ;;  %v4282_v11 = vpop.f32.mrb[110].mxu1  ;;  %v4171_v8 = vpop.f32.mrb[111].mxu0  ;;  %v3021_v25 = vld [vmem:[#allocation2 + $0xd0] sm:$0xff] }
 0x349   : > { %v4172_v34 = vadd.f32 %v4171_v8, %v4170_v22  ;;  %v4283_v1 = vpop.f32.mrb[111].mxu1  ;;  %v3199_v56 = vpop.permute.xlu0 %3198  ;;  %v3022_v22 = vld [vmem:[#allocation2 + $0xd8] sm:$0xff] }
 0x34a   : > { %v2922_v39 = vadd.f32 %v4281_v33, %v4169_v26  ;;  %v4284_v41 = vadd.f32 %v4283_v1, %v4282_v11  ;;  %v3204_v37 = vpop.permute.xlu1 %3203 }
 0x34c   : > { %v3056_v27 = vadd.f32 %v6590_v44, %v2922_v39  ;;  %v2925_v19 = vadd.f32 %v4284_v41, %v4172_v34 }
 0x34d   : > { %v4173_v45 = vpop.f32.mrb[112].mxu0 }
 0x34e   : > { %v3248_v58 = vmul.f32 %v3179_v51, %v3056_v27  ;;  %v3057_v35 = vadd.f32 %v6590_v44, %v2925_v19  ;;  %v4285_v13 = vpop.f32.mrb[112].mxu1  ;;  %v4174_v38 = vpop.f32.mrb[113].mxu0 }
 0x34f   : > { %v4175_v53 = vadd.f32 %v4174_v38, %v4173_v45  ;;  %v4286_v48 = vpop.f32.mrb[113].mxu1  ;;  %v4176_v17 = vpop.f32.mrb[114].mxu0 }
 0x350   : > { %v3280_v55 = vadd.f32 %v3248_v58, %v3017_v5  ;;  %v3249_v2 = vmul.f32 %v3184_v54, %v3057_v35  ;;  %v4287_v12 = vadd.f32 %v4286_v48, %v4285_v13  ;;  %v4288_v29 = vpop.f32.mrb[114].mxu1  ;;  %v4177_v28 = vpop.f32.mrb[115].mxu0 }
 0x351   : > { %v4178_v59 = vadd.f32 %v4177_v28, %v4176_v17  ;;  %v4289_v42 = vpop.f32.mrb[115].mxu1  ;;  %v3214_v38 = vpop.permute.xlu1 %3213  ;;  %v3023_v17 = vld [vmem:[#allocation2 + $0xe0] sm:$0xff] }
 0x352   : > { %3312 = vst [vmem:[#allocation2 + $0xb0] sm:$0xff] %v3280_v55  ;;  %v3281_v47 = vadd.f32 %v3249_v2, %v3018_v15  ;;  %v2930_v3 = vadd.f32 %v4287_v12, %v4175_v53  ;;  %v4290_v21 = vadd.f32 %v4289_v42, %v4288_v29  ;;  %v3209_v48 = vpop.permute.xlu0 %3208 }
 0x354   : > { %3313 = vst [vmem:[#allocation2 + $0xb8] sm:$0xff] %v3281_v47  ;;  %v3058_v0 = vadd.f32 %v6590_v44, %v2930_v3  ;;  %v2933_v18 = vadd.f32 %v4290_v21, %v4178_v59  ;;  %v3024_v59 = vld [vmem:[#allocation2 + $0xe8] sm:$0xff] }
 0x356   : > { %v3250_v57 = vmul.f32 %v3189_v36, %v3058_v0  ;;  %v3059_v10 = vadd.f32 %v6590_v44, %v2933_v18 }
 0x358   : > { %v3282_v32 = vadd.f32 %v3250_v57, %v3019_v63  ;;  %v3251_v61 = vmul.f32 %v3194_v50, %v3059_v10 }
 0x35a   : > { %3314 = vst [vmem:[#allocation2 + $0xc0] sm:$0xff] %v3282_v32  ;;  %v3283_v31 = vadd.f32 %v3251_v61, %v3020_v16 }
 0x35c   : > { %3315 = vst [vmem:[#allocation2 + $0xc8] sm:$0xff] %v3283_v31 }
 0x362   : > { %v4179_v40 = vpop.f32.mrb[116].mxu0 }
 0x363   : > { %v4291_v9 = vpop.f32.mrb[116].mxu1  ;;  %v4180_v62 = vpop.f32.mrb[117].mxu0 }
 0x364   : > { %v4181_v7 = vadd.f32 %v4180_v62, %v4179_v40  ;;  %v4292_v24 = vpop.f32.mrb[117].mxu1  ;;  %v4182_v49 = vpop.f32.mrb[118].mxu0 }
 0x365   : > { %v4293_v46 = vadd.f32 %v4292_v24, %v4291_v9  ;;  %v4294_v43 = vpop.f32.mrb[118].mxu1  ;;  %v4183_v52 = vpop.f32.mrb[119].mxu0  ;;  %v3025_v9 = vld [vmem:[#allocation2 + $0xf0] sm:$0xff] }
 0x366   : > { %v4184_v20 = vadd.f32 %v4183_v52, %v4182_v49  ;;  %v4295_v30 = vpop.f32.mrb[119].mxu1  ;;  %v3219_v40 = vpop.permute.xlu0 %3218  ;;  %v3026_v49 = vld [vmem:[#allocation2 + $0xf8] sm:$0xff] }
 0x367   : > { %v2938_v4 = vadd.f32 %v4293_v46, %v4181_v7  ;;  %v4296_v60 = vadd.f32 %v4295_v30, %v4294_v43  ;;  %v3224_v24 = vpop.permute.xlu1 %3223 }
 0x369   : > { %v3060_v23 = vadd.f32 %v6590_v44, %v2938_v4  ;;  %v2941_v14 = vadd.f32 %v4296_v60, %v4184_v20 }
 0x36b   : > { %v3252_v6 = vmul.f32 %v3199_v56, %v3060_v23  ;;  %v3061_v26 = vadd.f32 %v6590_v44, %v2941_v14 }
 0x36d   : > { %v3284_v33 = vadd.f32 %v3252_v6, %v3021_v25  ;;  %v3253_v11 = vmul.f32 %v3204_v37, %v3061_v26 }
 0x36f   : > { %3316 = vst [vmem:[#allocation2 + $0xd0] sm:$0xff] %v3284_v33  ;;  %v3285_v8 = vadd.f32 %v3253_v11, %v3022_v22 }
 0x371   : > { %3317 = vst [vmem:[#allocation2 + $0xd8] sm:$0xff] %v3285_v8 }
 0x376   : > { %v4185_v34 = vpop.f32.mrb[120].mxu0 }
 0x377   : > { %v4297_v1 = vpop.f32.mrb[120].mxu1  ;;  %v4186_v39 = vpop.f32.mrb[121].mxu0 }
 0x378   : > { %v4187_v41 = vadd.f32 %v4186_v39, %v4185_v34  ;;  %v4298_v54 = vpop.f32.mrb[121].mxu1  ;;  %v4188_v27 = vpop.f32.mrb[122].mxu0 }
 0x379   : > { %v4299_v19 = vadd.f32 %v4298_v54, %v4297_v1  ;;  %v4300_v51 = vpop.f32.mrb[122].mxu1  ;;  %v4189_v5 = vpop.f32.mrb[123].mxu0 }
 0x37a   : > { %v4190_v45 = vadd.f32 %v4189_v5, %v4188_v27  ;;  %v4301_v58 = vpop.f32.mrb[123].mxu1 }
 0x37b   : > { %v2946_v35 = vadd.f32 %v4299_v19, %v4187_v41  ;;  %v4302_v13 = vadd.f32 %v4301_v58, %v4300_v51 }
 0x37d   : > { %v3062_v15 = vadd.f32 %v6590_v44, %v2946_v35  ;;  %v2949_v53 = vadd.f32 %v4302_v13, %v4190_v45 }
 0x37e   : > { %v4191_v55 = vpop.f32.mrb[124].mxu0 }
 0x37f   : > { %v3254_v2 = vmul.f32 %v3209_v48, %v3062_v15  ;;  %v3063_v12 = vadd.f32 %v6590_v44, %v2949_v53  ;;  %v4303_v29 = vpop.f32.mrb[124].mxu1  ;;  %v4192_v28 = vpop.f32.mrb[125].mxu0 }
 0x380   : > { %v4193_v42 = vadd.f32 %v4192_v28, %v4191_v55  ;;  %v4304_v47 = vpop.f32.mrb[125].mxu1  ;;  %v4194_v3 = vpop.f32.mrb[126].mxu0 }
 0x381   : > { %v3286_v21 = vadd.f32 %v3254_v2, %v3023_v17  ;;  %v3255_v0 = vmul.f32 %v3214_v38, %v3063_v12  ;;  %v4305_v18 = vadd.f32 %v4304_v47, %v4303_v29  ;;  %v4306_v36 = vpop.f32.mrb[126].mxu1  ;;  %v4195_v63 = vpop.f32.mrb[127].mxu0 }
 0x382   : > { %v4196_v57 = vadd.f32 %v4195_v63, %v4194_v3  ;;  %v4307_v10 = vpop.f32.mrb[127].mxu1 }
 0x383   : > { %3318 = vst [vmem:[#allocation2 + $0xe0] sm:$0xff] %v3286_v21  ;;  %v3287_v50 = vadd.f32 %v3255_v0, %v3024_v59  ;;  %v2954_v16 = vadd.f32 %v4305_v18, %v4193_v42  ;;  %v4308_v32 = vadd.f32 %v4307_v10, %v4306_v36 }
 0x385   : > { %3319 = vst [vmem:[#allocation2 + $0xe8] sm:$0xff] %v3287_v50  ;;  %v3064_v61 = vadd.f32 %v6590_v44, %v2954_v16  ;;  %v2957_v31 = vadd.f32 %v4308_v32, %v4196_v57 }
 0x387   : > { %v3256_v62 = vmul.f32 %v3219_v40, %v3064_v61  ;;  %v3065_v7 = vadd.f32 %v6590_v44, %v2957_v31 }
 0x389   : > { %v3288_v46 = vadd.f32 %v3256_v62, %v3025_v9  ;;  %v3257_v43 = vmul.f32 %v3224_v24, %v3065_v7 }
 0x38b   : > { %3320 = vst [vmem:[#allocation2 + $0xf0] sm:$0xff] %v3288_v46  ;;  %v3289_v52 = vadd.f32 %v3257_v43, %v3026_v49 }
 0x38d   : > { %3321 = vst [vmem:[#allocation2 + $0xf8] sm:$0xff] %v3289_v52 }
 0x38e PF: > { %p3614_p5 = scmp.eq.s32.totalorder %s5164_s16, 3 }
 0x38f   : > { %v3619_v20 = vld [vmem:[#allocation2] sm:$0xff] (%p3614_p5)  ;;  %v3620_v30 = vld [vmem:[#allocation2 + $0x8] sm:$0xff] (%p3614_p5)  ;;  %v3621_v4 = vld [vmem:[#allocation2 + $0x10] sm:$0xff] (%p3614_p5) }
 0x390   : > { %3618 = sbr.rel (!%p3614_p5) target bundleno = 928 (0x3a0), region = 72  ;;  %3651 = vst [vmem:[#allocation11] sm:$0xff] (%p3614_p5), %v3619_v20  ;;  %3652 = vst [vmem:[#allocation11 + $0x8] sm:$0xff] (%p3614_p5), %v3620_v30  ;;  %v3622_v60 = vld [vmem:[#allocation2 + $0x18] sm:$0xff] (%p3614_p5)  ;;  %v3623_v23 = vld [vmem:[#allocation2 + $0x20] sm:$0xff] (%p3614_p5) }
 0x391   : > { %3653 = vst [vmem:[#allocation11 + $0x10] sm:$0xff] (%p3614_p5), %v3621_v4  ;;  %v3624_v44 = vld [vmem:[#allocation2 + $0x28] sm:$0xff] (%p3614_p5)  ;;  %3654 = vst [vmem:[#allocation11 + $0x18] sm:$0xff] (%p3614_p5), %v3622_v60  ;;  %v3625_v14 = vld [vmem:[#allocation2 + $0x30] sm:$0xff] (%p3614_p5) }
 0x392   : > { %3655 = vst [vmem:[#allocation11 + $0x20] sm:$0xff] (%p3614_p5), %v3623_v23  ;;  %3656 = vst [vmem:[#allocation11 + $0x28] sm:$0xff] (%p3614_p5), %v3624_v44  ;;  %v3626_v56 = vld [vmem:[#allocation2 + $0x38] sm:$0xff] (%p3614_p5)  ;;  %v3627_v25 = vld [vmem:[#allocation2 + $0x40] sm:$0xff] (%p3614_p5) }
 0x393   : > { %3657 = vst [vmem:[#allocation11 + $0x30] sm:$0xff] (%p3614_p5), %v3625_v14  ;;  %3658 = vst [vmem:[#allocation11 + $0x38] sm:$0xff] (%p3614_p5), %v3626_v56  ;;  %v3628_v6 = vld [vmem:[#allocation2 + $0x48] sm:$0xff] (%p3614_p5)  ;;  %v3629_v26 = vld [vmem:[#allocation2 + $0x50] sm:$0xff] (%p3614_p5) }
 0x394   : > { %3659 = vst [vmem:[#allocation11 + $0x40] sm:$0xff] (%p3614_p5), %v3627_v25  ;;  %v3630_v37 = vld [vmem:[#allocation2 + $0x58] sm:$0xff] (%p3614_p5)  ;;  %3660 = vst [vmem:[#allocation11 + $0x48] sm:$0xff] (%p3614_p5), %v3628_v6  ;;  %v3631_v22 = vld [vmem:[#allocation2 + $0x60] sm:$0xff] (%p3614_p5) }
 0x395   : > { %3661 = vst [vmem:[#allocation11 + $0x50] sm:$0xff] (%p3614_p5), %v3629_v26  ;;  %3662 = vst [vmem:[#allocation11 + $0x58] sm:$0xff] (%p3614_p5), %v3630_v37  ;;  %v3632_v33 = vld [vmem:[#allocation2 + $0x68] sm:$0xff] (%p3614_p5)  ;;  %v3633_v11 = vld [vmem:[#allocation2 + $0x70] sm:$0xff] (%p3614_p5) }
 0x396   : > { %3663 = vst [vmem:[#allocation11 + $0x60] sm:$0xff] (%p3614_p5), %v3631_v22  ;;  %3664 = vst [vmem:[#allocation11 + $0x68] sm:$0xff] (%p3614_p5), %v3632_v33  ;;  %v3634_v8 = vld [vmem:[#allocation2 + $0x78] sm:$0xff] (%p3614_p5)  ;;  %v3635_v34 = vld [vmem:[#allocation2 + $0x80] sm:$0xff] (%p3614_p5) }
 0x397   : > { %3665 = vst [vmem:[#allocation11 + $0x70] sm:$0xff] %v3633_v11  ;;  %v3636_v1 = vld [vmem:[#allocation2 + $0x88] sm:$0xff]  ;;  %3666 = vst [vmem:[#allocation11 + $0x78] sm:$0xff] %v3634_v8  ;;  %v3637_v39 = vld [vmem:[#allocation2 + $0x90] sm:$0xff] }
 0x398   : > { %3667 = vst [vmem:[#allocation11 + $0x80] sm:$0xff] %v3635_v34  ;;  %3668 = vst [vmem:[#allocation11 + $0x88] sm:$0xff] %v3636_v1  ;;  %v3638_v41 = vld [vmem:[#allocation2 + $0x98] sm:$0xff]  ;;  %v3639_v54 = vld [vmem:[#allocation2 + $0xa0] sm:$0xff] }
 0x399   : > { %3669 = vst [vmem:[#allocation11 + $0x90] sm:$0xff] %v3637_v39  ;;  %3670 = vst [vmem:[#allocation11 + $0x98] sm:$0xff] %v3638_v41  ;;  %v3640_v27 = vld [vmem:[#allocation2 + $0xa8] sm:$0xff]  ;;  %v3641_v19 = vld [vmem:[#allocation2 + $0xb0] sm:$0xff] }
 0x39a   : > { %3671 = vst [vmem:[#allocation11 + $0xa0] sm:$0xff] %v3639_v54  ;;  %v3642_v51 = vld [vmem:[#allocation2 + $0xb8] sm:$0xff]  ;;  %3672 = vst [vmem:[#allocation11 + $0xa8] sm:$0xff] %v3640_v27  ;;  %v3643_v5 = vld [vmem:[#allocation2 + $0xc0] sm:$0xff] }
 0x39b   : > { %3673 = vst [vmem:[#allocation11 + $0xb0] sm:$0xff] %v3641_v19  ;;  %3674 = vst [vmem:[#allocation11 + $0xb8] sm:$0xff] %v3642_v51  ;;  %v3644_v45 = vld [vmem:[#allocation2 + $0xc8] sm:$0xff]  ;;  %v3645_v58 = vld [vmem:[#allocation2 + $0xd0] sm:$0xff] }
 0x39c   : > { %3675 = vst [vmem:[#allocation11 + $0xc0] sm:$0xff] %v3643_v5  ;;  %3676 = vst [vmem:[#allocation11 + $0xc8] sm:$0xff] %v3644_v45  ;;  %v3646_v35 = vld [vmem:[#allocation2 + $0xd8] sm:$0xff]  ;;  %v3647_v13 = vld [vmem:[#allocation2 + $0xe0] sm:$0xff] }
 0x39d   : > { %3677 = vst [vmem:[#allocation11 + $0xd0] sm:$0xff] %v3645_v58  ;;  %v3648_v38 = vld [vmem:[#allocation2 + $0xe8] sm:$0xff]  ;;  %3678 = vst [vmem:[#allocation11 + $0xd8] sm:$0xff] %v3646_v35  ;;  %v3649_v15 = vld [vmem:[#allocation2 + $0xf0] sm:$0xff] }
 0x39e   : > { %3679 = vst [vmem:[#allocation11 + $0xe0] sm:$0xff] %v3647_v13  ;;  %3680 = vst [vmem:[#allocation11 + $0xe8] sm:$0xff] %v3648_v38  ;;  %v3650_v53 = vld [vmem:[#allocation2 + $0xf8] sm:$0xff] }
 0x39f   : > { %3681 = vst [vmem:[#allocation11 + $0xf0] sm:$0xff] %v3649_v15  ;;  %3682 = vst [vmem:[#allocation11 + $0xf8] sm:$0xff] %v3650_v53 }
 0x3a0 PF: > { %s6835_s16 = sadd.s32 4294967295, %s5172_s18   ;;  %s5182_s1 = smov [#allocation11]  }
 0x3a1   : > { %p6645_p7 = scmp.eq.s32.totalorder %s6835_s16, 3  ;;  %s3692_s23 = sshll.u32 %s5182_s1, 4  ;;  %s3693_s23 = int_to_ptr.vmem [resolvable:$true] %s3692_s23 }
 0x3a2   : > { %s5086_s13 = scalar_lea.vmem %s3693_s23, 4096  ;;  %p5093_p8 = scmp.lt.s32.totalorder %s3693_s23, %s3693_s23 }
 0x3a3   : > { %p5087_p9 = scmp.ne.s32.totalorder %s3693_s23, %s5086_s13  ;;  %p5094_p10 = scmp.lt.s32.totalorder %s5086_s13, %s5086_s13 }
 0x3a5   : > { %p5088_p12 = pnand %p5087_p9, %p6645_p7  ;;  %p5095_p2 = por %p5094_p10, %p5093_p8 }
 0x3a7   : > { %p5089_p13 = pneg %p5088_p12 }
 0x3a9   : > { %p5096_p6 = pnand %p5095_p2, %p5089_p13 }
 0x3ab   : > { %5099 = shalt.err (!%p5096_p6)
}
 0x3ac   : > { %s5100_s27 = scalar_lea.hbm %s6696_s8, 4096 }
 0x3ad   : > { %p5101_p0 = scmp.ne.s32.totalorder %s6696_s8, %s5100_s27  ;;  %p5106_p3 = scmp.lt.u32.totalorder %s5100_s27, %s6696_s8 }
 0x3af   : > { %p5102_p11 = pnand %p5101_p0, %p6645_p7 }
 0x3b1   : > { %p5103_p1 = pneg %p5102_p11 }
 0x3b3   : > { %p5108_p4 = pnand %p5106_p3, %p5103_p1 }
 0x3b5   : > { %5111 = shalt.err (!%p5108_p4)
}
 0x3b6   : > { %s5183_s11 = smov 128   ;;  %s5184_s25 = smov 8  }
 0x3b7   : > { %4318 = dma.vmem_to_hbm [thread:$0]  (%p6645_p7), %s3693_s23, 4096, %s6696_s8, [#allocation8], %s5183_s11, %s5183_s11, %s5184_s25  }
 0x3b8   : > { %5147 = dma.done.wait (%p6645_p7), [#allocation8], 4096  }
 0x3b9   : > { %5149 = vsyncadd (%p6645_p7), [#allocation8], 4294963200 }
 0x3ba PF: > { %s33_s18 = sadd.s32 1, %s5172_s18   ;;  %s6837_s1 = smov %s5156_s14 }
 0x3bb   : > { %p30_p5 = scmp.ge.s32.totalorder %s33_s18, 6   ;;  %s6838_s14 = smov %s5160_s15 }
 0x3bc   : > { %s6839_s15 = smov %s5329_s28  ;;  %s6840_s16 = smov %s5168_s17 }
 0x3bd   : > { %s6841_s17 = smov %s6843_s26  ;;  %32 = sbr.rel (!%p30_p5) target bundleno = 31 (0x1f), region = 120 }
 0x3c4   :  { %3708 = vsyncpa [#allocation7], 1 }
 0x3c5   :  { %3710 = vsyncpa [#allocation7 + $0x1], 1 }
 0x3c6   :  { %3711 = vsyncpa [#allocation10], 1 }
 0x3c7   :  { %3713 = vsyncpa [#allocation10 + $0x1], 1 }
 0x3c8   :  { %3714 = vsyncpa [#allocation8], 1 }
 0x3c9   :  { %3716 = vsyncpa [#allocation8 + $0x1], 1 }

</bundles_post_ra>
